<compile_context>
chip_gen: v6e
topology: v6e:2x2x1
jax: 0.10.0
libtpu: 0.0.40
codegen_flags: <defaults>
</compile_context>

<pallas_src>
import functools

import numpy as np
import jax
import jax.numpy as jnp
from jax.experimental import pallas as pl
from jax.experimental.pallas import tpu as pltpu


HIDDEN_DIMS_ENC = (32, 64, 128, 256)
KERNEL_ENC = (3, 3, 3, 3)
STRIDE_ENC = (2, 2, 2, 2)
PADDING_ENC = (1, 1, 1, 1)


# ----------------------------------------------------------------------------
# Static geometry: 0/1 gather matrices for each conv tap (built with numpy at
# trace time; they become compile-time constants fed to the kernel).
# ----------------------------------------------------------------------------
def _conv_out_size(size, k, stride, pad):
    return (size - k + 2 * pad) // stride + 1


def _selection_matrices(H, W, k, stride, pad):
    """G[kh*k+kw] has shape (Ho*Wo, H*W); G[t] @ A gathers the (kh, kw) tap of
    the conv from a row-major (h*W + w, C) activation matrix (zero padding is
    represented by all-zero rows)."""
    Ho = _conv_out_size(H, k, stride, pad)
    Wo = _conv_out_size(W, k, stride, pad)
    G = np.zeros((k * k, Ho * Wo, H * W), np.float32)
    for kh in range(k):
        for kw in range(k):
            t = kh * k + kw
            for ho in range(Ho):
                h_in = ho * stride + kh - pad
                if not (0 <= h_in < H):
                    continue
                for wo in range(Wo):
                    w_in = wo * stride + kw - pad
                    if 0 <= w_in < W:
                        G[t, ho * Wo + wo, h_in * W + w_in] = 1.0
    return G, Ho, Wo


def _encoder_geometry(image_h, image_w, input_channels):
    layers = []
    h, w, cin = image_h, image_w, input_channels
    for i, cout in enumerate(HIDDEN_DIMS_ENC):
        k, s, p = KERNEL_ENC[i], STRIDE_ENC[i], PADDING_ENC[i]
        G, ho, wo = _selection_matrices(h, w, k, s, p)
        alive = tuple(int(t) for t in range(k * k) if G[t].any())
        layers.append(dict(G=G, alive=alive, k=k, cin=cin, cout=cout,
                           h_out=ho, w_out=wo))
        h, w, cin = ho, wo, cout
    return layers, (h, w)


# ----------------------------------------------------------------------------
# The single fused Pallas kernel (one grid step == one image).
# ----------------------------------------------------------------------------
def _encoder_kernel(x_ref, *refs, alive_taps, num_layers, fc_spatial):
    out_ref = refs[-1]
    fcb_ref = refs[-2]
    fcw_ref = refs[-3]
    layer_refs = refs[:-3]                       # (g, w, b) per conv layer

    # Activation matrix for the current layer: (H*W, Cin), channels on lanes.
    a = x_ref[0].astype(jnp.bfloat16)

    for li in range(num_layers):
        g_ref, w_ref, b_ref = layer_refs[3 * li:3 * li + 3]
        hw_out = g_ref.shape[1]
        cout = w_ref.shape[2]
        acc = jnp.zeros((hw_out, cout), jnp.float32)
        for t in alive_taps[li]:                 # statically skip all-padding taps
            # Gather the (kh, kw) tap (exact: G is 0/1), then hit the MXU.
            sel = jnp.dot(g_ref[t], a, preferred_element_type=jnp.float32)
            acc = acc + jnp.dot(sel.astype(jnp.bfloat16), w_ref[t],
                                preferred_element_type=jnp.float32)
        acc = jnp.maximum(acc + b_ref[...], 0.0)  # bias + ReLU in f32
        a = acc.astype(jnp.bfloat16)

    # Fused fc_mu / fc_log_var:  out = b + sum_p a[p] @ Wfc[p]   (torch flatten
    # order is encoded in how Wfc was regrouped on the host).
    fc_out = fcb_ref[...]                        # (1, 2*latent), f32
    for p in range(fc_spatial):
        fc_out = fc_out + jnp.dot(a[p:p + 1, :], fcw_ref[p],
                                  preferred_element_type=jnp.float32)
    out_ref[0] = fc_out.astype(out_ref.dtype)


# ----------------------------------------------------------------------------
# Parameters (deterministic synthetic init) and forward pass.
# ----------------------------------------------------------------------------
def init_encoder_params(key, image_h, image_w, input_channels, latent_dim):
    layers, (oh, ow) = _encoder_geometry(image_h, image_w, input_channels)
    params = {"convs": []}
    for L in layers:
        k, cin, cout = L["k"], L["cin"], L["cout"]
        key, kw_key, kb_key = jax.random.split(key, 3)
        scale = 1.0 / np.sqrt(k * k * cin)
        w = jax.random.normal(kw_key, (k * k, cin, cout), jnp.float32) * scale
        b = jax.random.normal(kb_key, (1, cout), jnp.float32) * scale
        params["convs"].append((w, b))

    c_last = HIDDEN_DIMS_ENC[-1]
    fc_dim = c_last * oh * ow
    fscale = 1.0 / np.sqrt(fc_dim)
    key, k1, k2, k3, k4 = jax.random.split(key, 5)
    # Weights laid out in torch flatten order (c, h, w) along the fc_dim axis.
    mu_w = jax.random.normal(k1, (fc_dim, latent_dim), jnp.float32) * fscale
    lv_w = jax.random.normal(k3, (fc_dim, latent_dim), jnp.float32) * fscale
    mu_b = jax.random.normal(k2, (latent_dim,), jnp.float32) * fscale
    lv_b = jax.random.normal(k4, (latent_dim,), jnp.float32) * fscale
    # Fuse mu/log_var and regroup (c, h, w)-flatten order -> per-spatial layout
    # (h*w, c, 2*latent) used by the kernel (identical math).
    w_cat = jnp.concatenate([mu_w, lv_w], axis=1)               # (C*H*W, 2L)
    w_cat = w_cat.reshape(c_last, oh, ow, 2 * latent_dim)
    w_cat = jnp.transpose(w_cat, (1, 2, 0, 3)).reshape(oh * ow, c_last,
                                                       2 * latent_dim)
    params["fc_w"] = w_cat
    params["fc_b"] = jnp.concatenate([mu_b, lv_b]).reshape(1, 2 * latent_dim)
    return params


def encoder_forward(params, x_nchw):
    N, C, H, W = x_nchw.shape
    layers, (oh, ow) = _encoder_geometry(H, W, C)
    two_l = params["fc_b"].shape[1]

    # One-time boundary glue: NCHW -> row-major (h*W + w, c) activation matrix.
    x = jnp.transpose(x_nchw, (0, 2, 3, 1)).reshape(N, H * W, C)
    x = x.astype(jnp.float32)

    inputs = [x]
    in_specs = [pl.BlockSpec((1, H * W, C), lambda b: (b, 0, 0))]
    alive_taps = []
    for L, (w, b) in zip(layers, params["convs"]):
        g = jnp.asarray(L["G"], dtype=jnp.bfloat16)             # exact 0/1
        inputs += [g, w.astype(jnp.bfloat16), b.astype(jnp.float32)]
        in_specs += [
            pl.BlockSpec(g.shape, lambda b_: (0, 0, 0)),
            pl.BlockSpec(w.shape, lambda b_: (0, 0, 0)),
            pl.BlockSpec(b.shape, lambda b_: (0, 0)),
        ]
        alive_taps.append(L["alive"])

    fc_w = params["fc_w"].astype(jnp.bfloat16)
    fc_b = params["fc_b"].astype(jnp.float32)
    inputs += [fc_w, fc_b]
    in_specs += [pl.BlockSpec(fc_w.shape, lambda b_: (0, 0, 0)),
                 pl.BlockSpec(fc_b.shape, lambda b_: (0, 0))]

    kernel = functools.partial(
        _encoder_kernel,
        alive_taps=tuple(alive_taps),
        num_layers=len(layers),
        fc_spatial=oh * ow,
    )

    out = pl.pallas_call(
        kernel,
        out_shape=jax.ShapeDtypeStruct((N, 1, two_l), jnp.float32),
        grid=(N,),
        in_specs=in_specs,
        out_specs=pl.BlockSpec((1, 1, two_l), lambda b: (b, 0, 0)),
        compiler_params=pltpu.CompilerParams(
            dimension_semantics=("parallel",),
            vmem_limit_bytes=32 * 1024 * 1024,
        ),
    )(*inputs)

    out = out[:, 0, :]
    latent = two_l // 2
    return out[:, :latent], out[:, latent:]


# Pure-JAX reference (f32) for a correctness sanity check.
def _reference_forward(params, x_nchw):
    x = jnp.transpose(x_nchw, (0, 2, 3, 1)).astype(jnp.float32)   # NHWC
    for i, (w, b) in enumerate(params["convs"]):
        kk, cin, cout = w.shape
        k = int(round(kk ** 0.5))
        wk = w.reshape(k, k, cin, cout)
        x = jax.lax.conv_general_dilated(
            x, wk,
            window_strides=(STRIDE_ENC[i], STRIDE_ENC[i]),
            padding=((PADDING_ENC[i], PADDING_ENC[i]),
                     (PADDING_ENC[i], PADDING_ENC[i])),
            dimension_numbers=("NHWC", "HWIO", "NHWC"))
        x = jnp.maximum(x + b.reshape(1, 1, 1, cout), 0.0)
    n, oh, ow, c = x.shape
    feat = x.reshape(n, oh * ow, c)
    out = params["fc_b"] + jnp.einsum("npc,pcl->nl", feat, params["fc_w"])
    latent = out.shape[1] // 2
    return out[:, :latent], out[:, latent:]


if __name__ == "__main__":
    # Small shapes consistent with the module: batch=2, channels=4, 16x16 image,
    # latent_dim=32.  After four stride-2 convs: 16 -> 8 -> 4 -> 2 -> 1, so
    # fc_dim = 256.
    image_h = image_w = 16
    input_channels = 4
    latent_dim = 32
    batch = 2

    key = jax.random.PRNGKey(0)
    key, pkey, xkey = jax.random.split(key, 3)
    params = init_encoder_params(pkey, image_h, image_w, input_channels,
                                 latent_dim)
    x = jax.random.normal(xkey, (batch, input_channels, image_h, image_w),
                          jnp.float32)

    mu, log_var = jax.jit(encoder_forward)(params, x)
    mu = jax.block_until_ready(mu)
    log_var = jax.block_until_ready(log_var)

    assert mu.shape == (batch, latent_dim), mu.shape
    assert log_var.shape == (batch, latent_dim), log_var.shape
    assert bool(jnp.all(jnp.isfinite(mu))) and bool(jnp.all(jnp.isfinite(log_var)))

    # Numerical sanity check against a pure-JAX f32 reference (kernel uses bf16
    # matmul operands with f32 accumulation, so allow a loose tolerance).
    mu_ref, lv_ref = jax.jit(_reference_forward)(params, x)
    err = max(float(jnp.max(jnp.abs(mu - mu_ref))),
              float(jnp.max(jnp.abs(log_var - lv_ref))))
    assert err < 0.1, f"max abs error vs reference too large: {err}"

    print("KERNEL_OK")
</pallas_src>

<mosaic_0001>
module attributes {stable_mosaic.version = 11 : i64} {
  func.func @_encoder_kernel(%arg0: i32, %arg1: memref<1x256x4xf32, #tpu.memory_space<vmem>>, %arg2: memref<9x64x256xbf16, #tpu.memory_space<vmem>>, %arg3: memref<9x4x32xbf16, #tpu.memory_space<vmem>>, %arg4: memref<1x32xf32, #tpu.memory_space<vmem>>, %arg5: memref<9x16x64xbf16, #tpu.memory_space<vmem>>, %arg6: memref<9x32x64xbf16, #tpu.memory_space<vmem>>, %arg7: memref<1x64xf32, #tpu.memory_space<vmem>>, %arg8: memref<9x4x16xbf16, #tpu.memory_space<vmem>>, %arg9: memref<9x64x128xbf16, #tpu.memory_space<vmem>>, %arg10: memref<1x128xf32, #tpu.memory_space<vmem>>, %arg11: memref<9x1x4xbf16, #tpu.memory_space<vmem>>, %arg12: memref<9x128x256xbf16, #tpu.memory_space<vmem>>, %arg13: memref<1x256xf32, #tpu.memory_space<vmem>>, %arg14: memref<1x256x64xbf16, #tpu.memory_space<vmem>>, %arg15: memref<1x64xf32, #tpu.memory_space<vmem>>, %arg16: memref<1x1x64xf32, #tpu.memory_space<vmem>>) attributes {dimension_semantics = [#tpu.dimension_semantics<parallel>], iteration_bounds = array<i64: 2>, scalar_prefetch = 0 : i64, scratch_operands = 0 : i64, tpu.core_type = #tpu.core_type<tc>, window_params = [{transform_indices = @transform_0, window_bounds = array<i64: 1, 256, 4>}, {pipeline_mode = #tpu.pipeline_mode<synchronous>, transform_indices = @transform_1, window_bounds = array<i64: 9, 64, 256>}, {pipeline_mode = #tpu.pipeline_mode<synchronous>, transform_indices = @transform_2, window_bounds = array<i64: 9, 4, 32>}, {pipeline_mode = #tpu.pipeline_mode<synchronous>, transform_indices = @transform_3, window_bounds = array<i64: 1, 32>}, {pipeline_mode = #tpu.pipeline_mode<synchronous>, transform_indices = @transform_4, window_bounds = array<i64: 9, 16, 64>}, {pipeline_mode = #tpu.pipeline_mode<synchronous>, transform_indices = @transform_5, window_bounds = array<i64: 9, 32, 64>}, {pipeline_mode = #tpu.pipeline_mode<synchronous>, transform_indices = @transform_6, window_bounds = array<i64: 1, 64>}, {pipeline_mode = #tpu.pipeline_mode<synchronous>, transform_indices = @transform_7, window_bounds = array<i64: 9, 4, 16>}, {pipeline_mode = #tpu.pipeline_mode<synchronous>, transform_indices = @transform_8, window_bounds = array<i64: 9, 64, 128>}, {pipeline_mode = #tpu.pipeline_mode<synchronous>, transform_indices = @transform_9, window_bounds = array<i64: 1, 128>}, {pipeline_mode = #tpu.pipeline_mode<synchronous>, transform_indices = @transform_10, window_bounds = array<i64: 9, 1, 4>}, {pipeline_mode = #tpu.pipeline_mode<synchronous>, transform_indices = @transform_11, window_bounds = array<i64: 9, 128, 256>}, {pipeline_mode = #tpu.pipeline_mode<synchronous>, transform_indices = @transform_12, window_bounds = array<i64: 1, 256>}, {pipeline_mode = #tpu.pipeline_mode<synchronous>, transform_indices = @transform_13, window_bounds = array<i64: 1, 256, 64>}, {pipeline_mode = #tpu.pipeline_mode<synchronous>, transform_indices = @transform_14, window_bounds = array<i64: 1, 64>}, {transform_indices = @transform_15, window_bounds = array<i64: 1, 1, 64>}]} {
    %c0 = arith.constant 0 : index
    %c0_0 = arith.constant 0 : index
    %c0_1 = arith.constant 0 : index
    %0 = vector.load %arg1[%c0, %c0_0, %c0_1] : memref<1x256x4xf32, #tpu.memory_space<vmem>>, vector<1x256x4xf32>
    %1 = vector.shape_cast %0 : vector<1x256x4xf32> to vector<256x4xf32>
    %2 = arith.truncf %1 : vector<256x4xf32> to vector<256x4xbf16>
    %cst = arith.constant 0.000000e+00 : f32
    %3 = vector.broadcast %cst : f32 to vector<64x32xf32>
    %c0_2 = arith.constant 0 : index
    %c0_3 = arith.constant 0 : index
    %c0_4 = arith.constant 0 : index
    %4 = vector.load %arg2[%c0_2, %c0_3, %c0_4] : memref<9x64x256xbf16, #tpu.memory_space<vmem>>, vector<1x64x256xbf16>
    %5 = vector.shape_cast %4 : vector<1x64x256xbf16> to vector<64x256xbf16>
    %cst_5 = arith.constant dense<0.000000e+00> : vector<64x4xf32>
    %6 = tpu.matmul %5, %2, %cst_5 {dimension_numbers = #tpu.dot_dimension_numbers<[1], [0], [0], [1], [0, 0, 1, 1], [], []>} : vector<64x256xbf16>, vector<256x4xbf16>, vector<64x4xf32> -> vector<64x4xf32>
    %7 = arith.truncf %6 : vector<64x4xf32> to vector<64x4xbf16>
    %c0_6 = arith.constant 0 : index
    %c0_7 = arith.constant 0 : index
    %c0_8 = arith.constant 0 : index
    %8 = vector.load %arg3[%c0_6, %c0_7, %c0_8] : memref<9x4x32xbf16, #tpu.memory_space<vmem>>, vector<1x4x32xbf16>
    %9 = vector.shape_cast %8 : vector<1x4x32xbf16> to vector<4x32xbf16>
    %cst_9 = arith.constant dense<0.000000e+00> : vector<64x32xf32>
    %10 = tpu.matmul %7, %9, %cst_9 {dimension_numbers = #tpu.dot_dimension_numbers<[1], [0], [0], [1], [0, 0, 1, 1], [], []>} : vector<64x4xbf16>, vector<4x32xbf16>, vector<64x32xf32> -> vector<64x32xf32>
    %11 = arith.addf %3, %10 : vector<64x32xf32>
    %c1 = arith.constant 1 : index
    %c0_10 = arith.constant 0 : index
    %c0_11 = arith.constant 0 : index
    %12 = vector.load %arg2[%c1, %c0_10, %c0_11] : memref<9x64x256xbf16, #tpu.memory_space<vmem>>, vector<1x64x256xbf16>
    %13 = vector.shape_cast %12 : vector<1x64x256xbf16> to vector<64x256xbf16>
    %cst_12 = arith.constant dense<0.000000e+00> : vector<64x4xf32>
    %14 = tpu.matmul %13, %2, %cst_12 {dimension_numbers = #tpu.dot_dimension_numbers<[1], [0], [0], [1], [0, 0, 1, 1], [], []>} : vector<64x256xbf16>, vector<256x4xbf16>, vector<64x4xf32> -> vector<64x4xf32>
    %15 = arith.truncf %14 : vector<64x4xf32> to vector<64x4xbf16>
    %c1_13 = arith.constant 1 : index
    %c0_14 = arith.constant 0 : index
    %c0_15 = arith.constant 0 : index
    %16 = vector.load %arg3[%c1_13, %c0_14, %c0_15] : memref<9x4x32xbf16, #tpu.memory_space<vmem>>, vector<1x4x32xbf16>
    %17 = vector.shape_cast %16 : vector<1x4x32xbf16> to vector<4x32xbf16>
    %cst_16 = arith.constant dense<0.000000e+00> : vector<64x32xf32>
    %18 = tpu.matmul %15, %17, %cst_16 {dimension_numbers = #tpu.dot_dimension_numbers<[1], [0], [0], [1], [0, 0, 1, 1], [], []>} : vector<64x4xbf16>, vector<4x32xbf16>, vector<64x32xf32> -> vector<64x32xf32>
    %19 = arith.addf %11, %18 : vector<64x32xf32>
    %c2 = arith.constant 2 : index
    %c0_17 = arith.constant 0 : index
    %c0_18 = arith.constant 0 : index
    %20 = vector.load %arg2[%c2, %c0_17, %c0_18] : memref<9x64x256xbf16, #tpu.memory_space<vmem>>, vector<1x64x256xbf16>
    %21 = vector.shape_cast %20 : vector<1x64x256xbf16> to vector<64x256xbf16>
    %cst_19 = arith.constant dense<0.000000e+00> : vector<64x4xf32>
    %22 = tpu.matmul %21, %2, %cst_19 {dimension_numbers = #tpu.dot_dimension_numbers<[1], [0], [0], [1], [0, 0, 1, 1], [], []>} : vector<64x256xbf16>, vector<256x4xbf16>, vector<64x4xf32> -> vector<64x4xf32>
    %23 = arith.truncf %22 : vector<64x4xf32> to vector<64x4xbf16>
    %c2_20 = arith.constant 2 : index
    %c0_21 = arith.constant 0 : index
    %c0_22 = arith.constant 0 : index
    %24 = vector.load %arg3[%c2_20, %c0_21, %c0_22] : memref<9x4x32xbf16, #tpu.memory_space<vmem>>, vector<1x4x32xbf16>
    %25 = vector.shape_cast %24 : vector<1x4x32xbf16> to vector<4x32xbf16>
    %cst_23 = arith.constant dense<0.000000e+00> : vector<64x32xf32>
    %26 = tpu.matmul %23, %25, %cst_23 {dimension_numbers = #tpu.dot_dimension_numbers<[1], [0], [0], [1], [0, 0, 1, 1], [], []>} : vector<64x4xbf16>, vector<4x32xbf16>, vector<64x32xf32> -> vector<64x32xf32>
    %27 = arith.addf %19, %26 : vector<64x32xf32>
    %c3 = arith.constant 3 : index
    %c0_24 = arith.constant 0 : index
    %c0_25 = arith.constant 0 : index
    %28 = vector.load %arg2[%c3, %c0_24, %c0_25] : memref<9x64x256xbf16, #tpu.memory_space<vmem>>, vector<1x64x256xbf16>
    %29 = vector.shape_cast %28 : vector<1x64x256xbf16> to vector<64x256xbf16>
    %cst_26 = arith.constant dense<0.000000e+00> : vector<64x4xf32>
    %30 = tpu.matmul %29, %2, %cst_26 {dimension_numbers = #tpu.dot_dimension_numbers<[1], [0], [0], [1], [0, 0, 1, 1], [], []>} : vector<64x256xbf16>, vector<256x4xbf16>, vector<64x4xf32> -> vector<64x4xf32>
    %31 = arith.truncf %30 : vector<64x4xf32> to vector<64x4xbf16>
    %c3_27 = arith.constant 3 : index
    %c0_28 = arith.constant 0 : index
    %c0_29 = arith.constant 0 : index
    %32 = vector.load %arg3[%c3_27, %c0_28, %c0_29] : memref<9x4x32xbf16, #tpu.memory_space<vmem>>, vector<1x4x32xbf16>
    %33 = vector.shape_cast %32 : vector<1x4x32xbf16> to vector<4x32xbf16>
    %cst_30 = arith.constant dense<0.000000e+00> : vector<64x32xf32>
    %34 = tpu.matmul %31, %33, %cst_30 {dimension_numbers = #tpu.dot_dimension_numbers<[1], [0], [0], [1], [0, 0, 1, 1], [], []>} : vector<64x4xbf16>, vector<4x32xbf16>, vector<64x32xf32> -> vector<64x32xf32>
    %35 = arith.addf %27, %34 : vector<64x32xf32>
    %c4 = arith.constant 4 : index
    %c0_31 = arith.constant 0 : index
    %c0_32 = arith.constant 0 : index
    %36 = vector.load %arg2[%c4, %c0_31, %c0_32] : memref<9x64x256xbf16, #tpu.memory_space<vmem>>, vector<1x64x256xbf16>
    %37 = vector.shape_cast %36 : vector<1x64x256xbf16> to vector<64x256xbf16>
    %cst_33 = arith.constant dense<0.000000e+00> : vector<64x4xf32>
    %38 = tpu.matmul %37, %2, %cst_33 {dimension_numbers = #tpu.dot_dimension_numbers<[1], [0], [0], [1], [0, 0, 1, 1], [], []>} : vector<64x256xbf16>, vector<256x4xbf16>, vector<64x4xf32> -> vector<64x4xf32>
    %39 = arith.truncf %38 : vector<64x4xf32> to vector<64x4xbf16>
    %c4_34 = arith.constant 4 : index
    %c0_35 = arith.constant 0 : index
    %c0_36 = arith.constant 0 : index
    %40 = vector.load %arg3[%c4_34, %c0_35, %c0_36] : memref<9x4x32xbf16, #tpu.memory_space<vmem>>, vector<1x4x32xbf16>
    %41 = vector.shape_cast %40 : vector<1x4x32xbf16> to vector<4x32xbf16>
    %cst_37 = arith.constant dense<0.000000e+00> : vector<64x32xf32>
    %42 = tpu.matmul %39, %41, %cst_37 {dimension_numbers = #tpu.dot_dimension_numbers<[1], [0], [0], [1], [0, 0, 1, 1], [], []>} : vector<64x4xbf16>, vector<4x32xbf16>, vector<64x32xf32> -> vector<64x32xf32>
    %43 = arith.addf %35, %42 : vector<64x32xf32>
    %c5 = arith.constant 5 : index
    %c0_38 = arith.constant 0 : index
    %c0_39 = arith.constant 0 : index
    %44 = vector.load %arg2[%c5, %c0_38, %c0_39] : memref<9x64x256xbf16, #tpu.memory_space<vmem>>, vector<1x64x256xbf16>
    %45 = vector.shape_cast %44 : vector<1x64x256xbf16> to vector<64x256xbf16>
    %cst_40 = arith.constant dense<0.000000e+00> : vector<64x4xf32>
    %46 = tpu.matmul %45, %2, %cst_40 {dimension_numbers = #tpu.dot_dimension_numbers<[1], [0], [0], [1], [0, 0, 1, 1], [], []>} : vector<64x256xbf16>, vector<256x4xbf16>, vector<64x4xf32> -> vector<64x4xf32>
    %47 = arith.truncf %46 : vector<64x4xf32> to vector<64x4xbf16>
    %c5_41 = arith.constant 5 : index
    %c0_42 = arith.constant 0 : index
    %c0_43 = arith.constant 0 : index
    %48 = vector.load %arg3[%c5_41, %c0_42, %c0_43] : memref<9x4x32xbf16, #tpu.memory_space<vmem>>, vector<1x4x32xbf16>
    %49 = vector.shape_cast %48 : vector<1x4x32xbf16> to vector<4x32xbf16>
    %cst_44 = arith.constant dense<0.000000e+00> : vector<64x32xf32>
    %50 = tpu.matmul %47, %49, %cst_44 {dimension_numbers = #tpu.dot_dimension_numbers<[1], [0], [0], [1], [0, 0, 1, 1], [], []>} : vector<64x4xbf16>, vector<4x32xbf16>, vector<64x32xf32> -> vector<64x32xf32>
    %51 = arith.addf %43, %50 : vector<64x32xf32>
    %c6 = arith.constant 6 : index
    %c0_45 = arith.constant 0 : index
    %c0_46 = arith.constant 0 : index
    %52 = vector.load %arg2[%c6, %c0_45, %c0_46] : memref<9x64x256xbf16, #tpu.memory_space<vmem>>, vector<1x64x256xbf16>
    %53 = vector.shape_cast %52 : vector<1x64x256xbf16> to vector<64x256xbf16>
    %cst_47 = arith.constant dense<0.000000e+00> : vector<64x4xf32>
    %54 = tpu.matmul %53, %2, %cst_47 {dimension_numbers = #tpu.dot_dimension_numbers<[1], [0], [0], [1], [0, 0, 1, 1], [], []>} : vector<64x256xbf16>, vector<256x4xbf16>, vector<64x4xf32> -> vector<64x4xf32>
    %55 = arith.truncf %54 : vector<64x4xf32> to vector<64x4xbf16>
    %c6_48 = arith.constant 6 : index
    %c0_49 = arith.constant 0 : index
    %c0_50 = arith.constant 0 : index
    %56 = vector.load %arg3[%c6_48, %c0_49, %c0_50] : memref<9x4x32xbf16, #tpu.memory_space<vmem>>, vector<1x4x32xbf16>
    %57 = vector.shape_cast %56 : vector<1x4x32xbf16> to vector<4x32xbf16>
    %cst_51 = arith.constant dense<0.000000e+00> : vector<64x32xf32>
    %58 = tpu.matmul %55, %57, %cst_51 {dimension_numbers = #tpu.dot_dimension_numbers<[1], [0], [0], [1], [0, 0, 1, 1], [], []>} : vector<64x4xbf16>, vector<4x32xbf16>, vector<64x32xf32> -> vector<64x32xf32>
    %59 = arith.addf %51, %58 : vector<64x32xf32>
    %c7 = arith.constant 7 : index
    %c0_52 = arith.constant 0 : index
    %c0_53 = arith.constant 0 : index
    %60 = vector.load %arg2[%c7, %c0_52, %c0_53] : memref<9x64x256xbf16, #tpu.memory_space<vmem>>, vector<1x64x256xbf16>
    %61 = vector.shape_cast %60 : vector<1x64x256xbf16> to vector<64x256xbf16>
    %cst_54 = arith.constant dense<0.000000e+00> : vector<64x4xf32>
    %62 = tpu.matmul %61, %2, %cst_54 {dimension_numbers = #tpu.dot_dimension_numbers<[1], [0], [0], [1], [0, 0, 1, 1], [], []>} : vector<64x256xbf16>, vector<256x4xbf16>, vector<64x4xf32> -> vector<64x4xf32>
    %63 = arith.truncf %62 : vector<64x4xf32> to vector<64x4xbf16>
    %c7_55 = arith.constant 7 : index
    %c0_56 = arith.constant 0 : index
    %c0_57 = arith.constant 0 : index
    %64 = vector.load %arg3[%c7_55, %c0_56, %c0_57] : memref<9x4x32xbf16, #tpu.memory_space<vmem>>, vector<1x4x32xbf16>
    %65 = vector.shape_cast %64 : vector<1x4x32xbf16> to vector<4x32xbf16>
    %cst_58 = arith.constant dense<0.000000e+00> : vector<64x32xf32>
    %66 = tpu.matmul %63, %65, %cst_58 {dimension_numbers = #tpu.dot_dimension_numbers<[1], [0], [0], [1], [0, 0, 1, 1], [], []>} : vector<64x4xbf16>, vector<4x32xbf16>, vector<64x32xf32> -> vector<64x32xf32>
    %67 = arith.addf %59, %66 : vector<64x32xf32>
    %c8 = arith.constant 8 : index
    %c0_59 = arith.constant 0 : index
    %c0_60 = arith.constant 0 : index
    %68 = vector.load %arg2[%c8, %c0_59, %c0_60] : memref<9x64x256xbf16, #tpu.memory_space<vmem>>, vector<1x64x256xbf16>
    %69 = vector.shape_cast %68 : vector<1x64x256xbf16> to vector<64x256xbf16>
    %cst_61 = arith.constant dense<0.000000e+00> : vector<64x4xf32>
    %70 = tpu.matmul %69, %2, %cst_61 {dimension_numbers = #tpu.dot_dimension_numbers<[1], [0], [0], [1], [0, 0, 1, 1], [], []>} : vector<64x256xbf16>, vector<256x4xbf16>, vector<64x4xf32> -> vector<64x4xf32>
    %71 = arith.truncf %70 : vector<64x4xf32> to vector<64x4xbf16>
    %c8_62 = arith.constant 8 : index
    %c0_63 = arith.constant 0 : index
    %c0_64 = arith.constant 0 : index
    %72 = vector.load %arg3[%c8_62, %c0_63, %c0_64] : memref<9x4x32xbf16, #tpu.memory_space<vmem>>, vector<1x4x32xbf16>
    %73 = vector.shape_cast %72 : vector<1x4x32xbf16> to vector<4x32xbf16>
    %cst_65 = arith.constant dense<0.000000e+00> : vector<64x32xf32>
    %74 = tpu.matmul %71, %73, %cst_65 {dimension_numbers = #tpu.dot_dimension_numbers<[1], [0], [0], [1], [0, 0, 1, 1], [], []>} : vector<64x4xbf16>, vector<4x32xbf16>, vector<64x32xf32> -> vector<64x32xf32>
    %75 = arith.addf %67, %74 : vector<64x32xf32>
    %c0_66 = arith.constant 0 : index
    %c0_67 = arith.constant 0 : index
    %76 = vector.load %arg4[%c0_66, %c0_67] : memref<1x32xf32, #tpu.memory_space<vmem>>, vector<1x32xf32>
    %77 = vector.broadcast %76 : vector<1x32xf32> to vector<64x32xf32>
    %78 = arith.addf %75, %77 : vector<64x32xf32>
    %cst_68 = arith.constant 0.000000e+00 : f32
    %79 = vector.broadcast %cst_68 : f32 to vector<64x32xf32>
    %80 = arith.maximumf %78, %79 : vector<64x32xf32>
    %81 = arith.truncf %80 : vector<64x32xf32> to vector<64x32xbf16>
    %cst_69 = arith.constant 0.000000e+00 : f32
    %82 = vector.broadcast %cst_69 : f32 to vector<16x64xf32>
    %c0_70 = arith.constant 0 : index
    %c0_71 = arith.constant 0 : index
    %c0_72 = arith.constant 0 : index
    %83 = vector.load %arg5[%c0_70, %c0_71, %c0_72] : memref<9x16x64xbf16, #tpu.memory_space<vmem>>, vector<1x16x64xbf16>
    %84 = vector.shape_cast %83 : vector<1x16x64xbf16> to vector<16x64xbf16>
    %cst_73 = arith.constant dense<0.000000e+00> : vector<16x32xf32>
    %85 = tpu.matmul %84, %81, %cst_73 {dimension_numbers = #tpu.dot_dimension_numbers<[1], [0], [0], [1], [0, 0, 1, 1], [], []>} : vector<16x64xbf16>, vector<64x32xbf16>, vector<16x32xf32> -> vector<16x32xf32>
    %86 = arith.truncf %85 : vector<16x32xf32> to vector<16x32xbf16>
    %c0_74 = arith.constant 0 : index
    %c0_75 = arith.constant 0 : index
    %c0_76 = arith.constant 0 : index
    %87 = vector.load %arg6[%c0_74, %c0_75, %c0_76] : memref<9x32x64xbf16, #tpu.memory_space<vmem>>, vector<1x32x64xbf16>
    %88 = vector.shape_cast %87 : vector<1x32x64xbf16> to vector<32x64xbf16>
    %cst_77 = arith.constant dense<0.000000e+00> : vector<16x64xf32>
    %89 = tpu.matmul %86, %88, %cst_77 {dimension_numbers = #tpu.dot_dimension_numbers<[1], [0], [0], [1], [0, 0, 1, 1], [], []>} : vector<16x32xbf16>, vector<32x64xbf16>, vector<16x64xf32> -> vector<16x64xf32>
    %90 = arith.addf %82, %89 : vector<16x64xf32>
    %c1_78 = arith.constant 1 : index
    %c0_79 = arith.constant 0 : index
    %c0_80 = arith.constant 0 : index
    %91 = vector.load %arg5[%c1_78, %c0_79, %c0_80] : memref<9x16x64xbf16, #tpu.memory_space<vmem>>, vector<1x16x64xbf16>
    %92 = vector.shape_cast %91 : vector<1x16x64xbf16> to vector<16x64xbf16>
    %cst_81 = arith.constant dense<0.000000e+00> : vector<16x32xf32>
    %93 = tpu.matmul %92, %81, %cst_81 {dimension_numbers = #tpu.dot_dimension_numbers<[1], [0], [0], [1], [0, 0, 1, 1], [], []>} : vector<16x64xbf16>, vector<64x32xbf16>, vector<16x32xf32> -> vector<16x32xf32>
    %94 = arith.truncf %93 : vector<16x32xf32> to vector<16x32xbf16>
    %c1_82 = arith.constant 1 : index
    %c0_83 = arith.constant 0 : index
    %c0_84 = arith.constant 0 : index
    %95 = vector.load %arg6[%c1_82, %c0_83, %c0_84] : memref<9x32x64xbf16, #tpu.memory_space<vmem>>, vector<1x32x64xbf16>
    %96 = vector.shape_cast %95 : vector<1x32x64xbf16> to vector<32x64xbf16>
    %cst_85 = arith.constant dense<0.000000e+00> : vector<16x64xf32>
    %97 = tpu.matmul %94, %96, %cst_85 {dimension_numbers = #tpu.dot_dimension_numbers<[1], [0], [0], [1], [0, 0, 1, 1], [], []>} : vector<16x32xbf16>, vector<32x64xbf16>, vector<16x64xf32> -> vector<16x64xf32>
    %98 = arith.addf %90, %97 : vector<16x64xf32>
    %c2_86 = arith.constant 2 : index
    %c0_87 = arith.constant 0 : index
    %c0_88 = arith.constant 0 : index
    %99 = vector.load %arg5[%c2_86, %c0_87, %c0_88] : memref<9x16x64xbf16, #tpu.memory_space<vmem>>, vector<1x16x64xbf16>
    %100 = vector.shape_cast %99 : vector<1x16x64xbf16> to vector<16x64xbf16>
    %cst_89 = arith.constant dense<0.000000e+00> : vector<16x32xf32>
    %101 = tpu.matmul %100, %81, %cst_89 {dimension_numbers = #tpu.dot_dimension_numbers<[1], [0], [0], [1], [0, 0, 1, 1], [], []>} : vector<16x64xbf16>, vector<64x32xbf16>, vector<16x32xf32> -> vector<16x32xf32>
    %102 = arith.truncf %101 : vector<16x32xf32> to vector<16x32xbf16>
    %c2_90 = arith.constant 2 : index
    %c0_91 = arith.constant 0 : index
    %c0_92 = arith.constant 0 : index
    %103 = vector.load %arg6[%c2_90, %c0_91, %c0_92] : memref<9x32x64xbf16, #tpu.memory_space<vmem>>, vector<1x32x64xbf16>
    %104 = vector.shape_cast %103 : vector<1x32x64xbf16> to vector<32x64xbf16>
    %cst_93 = arith.constant dense<0.000000e+00> : vector<16x64xf32>
    %105 = tpu.matmul %102, %104, %cst_93 {dimension_numbers = #tpu.dot_dimension_numbers<[1], [0], [0], [1], [0, 0, 1, 1], [], []>} : vector<16x32xbf16>, vector<32x64xbf16>, vector<16x64xf32> -> vector<16x64xf32>
    %106 = arith.addf %98, %105 : vector<16x64xf32>
    %c3_94 = arith.constant 3 : index
    %c0_95 = arith.constant 0 : index
    %c0_96 = arith.constant 0 : index
    %107 = vector.load %arg5[%c3_94, %c0_95, %c0_96] : memref<9x16x64xbf16, #tpu.memory_space<vmem>>, vector<1x16x64xbf16>
    %108 = vector.shape_cast %107 : vector<1x16x64xbf16> to vector<16x64xbf16>
    %cst_97 = arith.constant dense<0.000000e+00> : vector<16x32xf32>
    %109 = tpu.matmul %108, %81, %cst_97 {dimension_numbers = #tpu.dot_dimension_numbers<[1], [0], [0], [1], [0, 0, 1, 1], [], []>} : vector<16x64xbf16>, vector<64x32xbf16>, vector<16x32xf32> -> vector<16x32xf32>
    %110 = arith.truncf %109 : vector<16x32xf32> to vector<16x32xbf16>
    %c3_98 = arith.constant 3 : index
    %c0_99 = arith.constant 0 : index
    %c0_100 = arith.constant 0 : index
    %111 = vector.load %arg6[%c3_98, %c0_99, %c0_100] : memref<9x32x64xbf16, #tpu.memory_space<vmem>>, vector<1x32x64xbf16>
    %112 = vector.shape_cast %111 : vector<1x32x64xbf16> to vector<32x64xbf16>
    %cst_101 = arith.constant dense<0.000000e+00> : vector<16x64xf32>
    %113 = tpu.matmul %110, %112, %cst_101 {dimension_numbers = #tpu.dot_dimension_numbers<[1], [0], [0], [1], [0, 0, 1, 1], [], []>} : vector<16x32xbf16>, vector<32x64xbf16>, vector<16x64xf32> -> vector<16x64xf32>
    %114 = arith.addf %106, %113 : vector<16x64xf32>
    %c4_102 = arith.constant 4 : index
    %c0_103 = arith.constant 0 : index
    %c0_104 = arith.constant 0 : index
    %115 = vector.load %arg5[%c4_102, %c0_103, %c0_104] : memref<9x16x64xbf16, #tpu.memory_space<vmem>>, vector<1x16x64xbf16>
    %116 = vector.shape_cast %115 : vector<1x16x64xbf16> to vector<16x64xbf16>
    %cst_105 = arith.constant dense<0.000000e+00> : vector<16x32xf32>
    %117 = tpu.matmul %116, %81, %cst_105 {dimension_numbers = #tpu.dot_dimension_numbers<[1], [0], [0], [1], [0, 0, 1, 1], [], []>} : vector<16x64xbf16>, vector<64x32xbf16>, vector<16x32xf32> -> vector<16x32xf32>
    %118 = arith.truncf %117 : vector<16x32xf32> to vector<16x32xbf16>
    %c4_106 = arith.constant 4 : index
    %c0_107 = arith.constant 0 : index
    %c0_108 = arith.constant 0 : index
    %119 = vector.load %arg6[%c4_106, %c0_107, %c0_108] : memref<9x32x64xbf16, #tpu.memory_space<vmem>>, vector<1x32x64xbf16>
    %120 = vector.shape_cast %119 : vector<1x32x64xbf16> to vector<32x64xbf16>
    %cst_109 = arith.constant dense<0.000000e+00> : vector<16x64xf32>
    %121 = tpu.matmul %118, %120, %cst_109 {dimension_numbers = #tpu.dot_dimension_numbers<[1], [0], [0], [1], [0, 0, 1, 1], [], []>} : vector<16x32xbf16>, vector<32x64xbf16>, vector<16x64xf32> -> vector<16x64xf32>
    %122 = arith.addf %114, %121 : vector<16x64xf32>
    %c5_110 = arith.constant 5 : index
    %c0_111 = arith.constant 0 : index
    %c0_112 = arith.constant 0 : index
    %123 = vector.load %arg5[%c5_110, %c0_111, %c0_112] : memref<9x16x64xbf16, #tpu.memory_space<vmem>>, vector<1x16x64xbf16>
    %124 = vector.shape_cast %123 : vector<1x16x64xbf16> to vector<16x64xbf16>
    %cst_113 = arith.constant dense<0.000000e+00> : vector<16x32xf32>
    %125 = tpu.matmul %124, %81, %cst_113 {dimension_numbers = #tpu.dot_dimension_numbers<[1], [0], [0], [1], [0, 0, 1, 1], [], []>} : vector<16x64xbf16>, vector<64x32xbf16>, vector<16x32xf32> -> vector<16x32xf32>
    %126 = arith.truncf %125 : vector<16x32xf32> to vector<16x32xbf16>
    %c5_114 = arith.constant 5 : index
    %c0_115 = arith.constant 0 : index
    %c0_116 = arith.constant 0 : index
    %127 = vector.load %arg6[%c5_114, %c0_115, %c0_116] : memref<9x32x64xbf16, #tpu.memory_space<vmem>>, vector<1x32x64xbf16>
    %128 = vector.shape_cast %127 : vector<1x32x64xbf16> to vector<32x64xbf16>
    %cst_117 = arith.constant dense<0.000000e+00> : vector<16x64xf32>
    %129 = tpu.matmul %126, %128, %cst_117 {dimension_numbers = #tpu.dot_dimension_numbers<[1], [0], [0], [1], [0, 0, 1, 1], [], []>} : vector<16x32xbf16>, vector<32x64xbf16>, vector<16x64xf32> -> vector<16x64xf32>
    %130 = arith.addf %122, %129 : vector<16x64xf32>
    %c6_118 = arith.constant 6 : index
    %c0_119 = arith.constant 0 : index
    %c0_120 = arith.constant 0 : index
    %131 = vector.load %arg5[%c6_118, %c0_119, %c0_120] : memref<9x16x64xbf16, #tpu.memory_space<vmem>>, vector<1x16x64xbf16>
    %132 = vector.shape_cast %131 : vector<1x16x64xbf16> to vector<16x64xbf16>
    %cst_121 = arith.constant dense<0.000000e+00> : vector<16x32xf32>
    %133 = tpu.matmul %132, %81, %cst_121 {dimension_numbers = #tpu.dot_dimension_numbers<[1], [0], [0], [1], [0, 0, 1, 1], [], []>} : vector<16x64xbf16>, vector<64x32xbf16>, vector<16x32xf32> -> vector<16x32xf32>
    %134 = arith.truncf %133 : vector<16x32xf32> to vector<16x32xbf16>
    %c6_122 = arith.constant 6 : index
    %c0_123 = arith.constant 0 : index
    %c0_124 = arith.constant 0 : index
    %135 = vector.load %arg6[%c6_122, %c0_123, %c0_124] : memref<9x32x64xbf16, #tpu.memory_space<vmem>>, vector<1x32x64xbf16>
    %136 = vector.shape_cast %135 : vector<1x32x64xbf16> to vector<32x64xbf16>
    %cst_125 = arith.constant dense<0.000000e+00> : vector<16x64xf32>
    %137 = tpu.matmul %134, %136, %cst_125 {dimension_numbers = #tpu.dot_dimension_numbers<[1], [0], [0], [1], [0, 0, 1, 1], [], []>} : vector<16x32xbf16>, vector<32x64xbf16>, vector<16x64xf32> -> vector<16x64xf32>
    %138 = arith.addf %130, %137 : vector<16x64xf32>
    %c7_126 = arith.constant 7 : index
    %c0_127 = arith.constant 0 : index
    %c0_128 = arith.constant 0 : index
    %139 = vector.load %arg5[%c7_126, %c0_127, %c0_128] : memref<9x16x64xbf16, #tpu.memory_space<vmem>>, vector<1x16x64xbf16>
    %140 = vector.shape_cast %139 : vector<1x16x64xbf16> to vector<16x64xbf16>
    %cst_129 = arith.constant dense<0.000000e+00> : vector<16x32xf32>
    %141 = tpu.matmul %140, %81, %cst_129 {dimension_numbers = #tpu.dot_dimension_numbers<[1], [0], [0], [1], [0, 0, 1, 1], [], []>} : vector<16x64xbf16>, vector<64x32xbf16>, vector<16x32xf32> -> vector<16x32xf32>
    %142 = arith.truncf %141 : vector<16x32xf32> to vector<16x32xbf16>
    %c7_130 = arith.constant 7 : index
    %c0_131 = arith.constant 0 : index
    %c0_132 = arith.constant 0 : index
    %143 = vector.load %arg6[%c7_130, %c0_131, %c0_132] : memref<9x32x64xbf16, #tpu.memory_space<vmem>>, vector<1x32x64xbf16>
    %144 = vector.shape_cast %143 : vector<1x32x64xbf16> to vector<32x64xbf16>
    %cst_133 = arith.constant dense<0.000000e+00> : vector<16x64xf32>
    %145 = tpu.matmul %142, %144, %cst_133 {dimension_numbers = #tpu.dot_dimension_numbers<[1], [0], [0], [1], [0, 0, 1, 1], [], []>} : vector<16x32xbf16>, vector<32x64xbf16>, vector<16x64xf32> -> vector<16x64xf32>
    %146 = arith.addf %138, %145 : vector<16x64xf32>
    %c8_134 = arith.constant 8 : index
    %c0_135 = arith.constant 0 : index
    %c0_136 = arith.constant 0 : index
    %147 = vector.load %arg5[%c8_134, %c0_135, %c0_136] : memref<9x16x64xbf16, #tpu.memory_space<vmem>>, vector<1x16x64xbf16>
    %148 = vector.shape_cast %147 : vector<1x16x64xbf16> to vector<16x64xbf16>
    %cst_137 = arith.constant dense<0.000000e+00> : vector<16x32xf32>
    %149 = tpu.matmul %148, %81, %cst_137 {dimension_numbers = #tpu.dot_dimension_numbers<[1], [0], [0], [1], [0, 0, 1, 1], [], []>} : vector<16x64xbf16>, vector<64x32xbf16>, vector<16x32xf32> -> vector<16x32xf32>
    %150 = arith.truncf %149 : vector<16x32xf32> to vector<16x32xbf16>
    %c8_138 = arith.constant 8 : index
    %c0_139 = arith.constant 0 : index
    %c0_140 = arith.constant 0 : index
    %151 = vector.load %arg6[%c8_138, %c0_139, %c0_140] : memref<9x32x64xbf16, #tpu.memory_space<vmem>>, vector<1x32x64xbf16>
    %152 = vector.shape_cast %151 : vector<1x32x64xbf16> to vector<32x64xbf16>
    %cst_141 = arith.constant dense<0.000000e+00> : vector<16x64xf32>
    %153 = tpu.matmul %150, %152, %cst_141 {dimension_numbers = #tpu.dot_dimension_numbers<[1], [0], [0], [1], [0, 0, 1, 1], [], []>} : vector<16x32xbf16>, vector<32x64xbf16>, vector<16x64xf32> -> vector<16x64xf32>
    %154 = arith.addf %146, %153 : vector<16x64xf32>
    %c0_142 = arith.constant 0 : index
    %c0_143 = arith.constant 0 : index
    %155 = vector.load %arg7[%c0_142, %c0_143] : memref<1x64xf32, #tpu.memory_space<vmem>>, vector<1x64xf32>
    %156 = vector.broadcast %155 : vector<1x64xf32> to vector<16x64xf32>
    %157 = arith.addf %154, %156 : vector<16x64xf32>
    %cst_144 = arith.constant 0.000000e+00 : f32
    %158 = vector.broadcast %cst_144 : f32 to vector<16x64xf32>
    %159 = arith.maximumf %157, %158 : vector<16x64xf32>
    %160 = arith.truncf %159 : vector<16x64xf32> to vector<16x64xbf16>
    %cst_145 = arith.constant 0.000000e+00 : f32
    %161 = vector.broadcast %cst_145 : f32 to vector<4x128xf32>
    %c0_146 = arith.constant 0 : index
    %c0_147 = arith.constant 0 : index
    %c0_148 = arith.constant 0 : index
    %162 = vector.load %arg8[%c0_146, %c0_147, %c0_148] : memref<9x4x16xbf16, #tpu.memory_space<vmem>>, vector<1x4x16xbf16>
    %163 = vector.shape_cast %162 : vector<1x4x16xbf16> to vector<4x16xbf16>
    %cst_149 = arith.constant dense<0.000000e+00> : vector<4x64xf32>
    %164 = tpu.matmul %163, %160, %cst_149 {dimension_numbers = #tpu.dot_dimension_numbers<[1], [0], [0], [1], [0, 0, 1, 1], [], []>} : vector<4x16xbf16>, vector<16x64xbf16>, vector<4x64xf32> -> vector<4x64xf32>
    %165 = arith.truncf %164 : vector<4x64xf32> to vector<4x64xbf16>
    %c0_150 = arith.constant 0 : index
    %c0_151 = arith.constant 0 : index
    %c0_152 = arith.constant 0 : index
    %166 = vector.load %arg9[%c0_150, %c0_151, %c0_152] : memref<9x64x128xbf16, #tpu.memory_space<vmem>>, vector<1x64x128xbf16>
    %167 = vector.shape_cast %166 : vector<1x64x128xbf16> to vector<64x128xbf16>
    %cst_153 = arith.constant dense<0.000000e+00> : vector<4x128xf32>
    %168 = tpu.matmul %165, %167, %cst_153 {dimension_numbers = #tpu.dot_dimension_numbers<[1], [0], [0], [1], [0, 0, 1, 1], [], []>} : vector<4x64xbf16>, vector<64x128xbf16>, vector<4x128xf32> -> vector<4x128xf32>
    %169 = arith.addf %161, %168 : vector<4x128xf32>
    %c1_154 = arith.constant 1 : index
    %c0_155 = arith.constant 0 : index
    %c0_156 = arith.constant 0 : index
    %170 = vector.load %arg8[%c1_154, %c0_155, %c0_156] : memref<9x4x16xbf16, #tpu.memory_space<vmem>>, vector<1x4x16xbf16>
    %171 = vector.shape_cast %170 : vector<1x4x16xbf16> to vector<4x16xbf16>
    %cst_157 = arith.constant dense<0.000000e+00> : vector<4x64xf32>
    %172 = tpu.matmul %171, %160, %cst_157 {dimension_numbers = #tpu.dot_dimension_numbers<[1], [0], [0], [1], [0, 0, 1, 1], [], []>} : vector<4x16xbf16>, vector<16x64xbf16>, vector<4x64xf32> -> vector<4x64xf32>
    %173 = arith.truncf %172 : vector<4x64xf32> to vector<4x64xbf16>
    %c1_158 = arith.constant 1 : index
    %c0_159 = arith.constant 0 : index
    %c0_160 = arith.constant 0 : index
    %174 = vector.load %arg9[%c1_158, %c0_159, %c0_160] : memref<9x64x128xbf16, #tpu.memory_space<vmem>>, vector<1x64x128xbf16>
    %175 = vector.shape_cast %174 : vector<1x64x128xbf16> to vector<64x128xbf16>
    %cst_161 = arith.constant dense<0.000000e+00> : vector<4x128xf32>
    %176 = tpu.matmul %173, %175, %cst_161 {dimension_numbers = #tpu.dot_dimension_numbers<[1], [0], [0], [1], [0, 0, 1, 1], [], []>} : vector<4x64xbf16>, vector<64x128xbf16>, vector<4x128xf32> -> vector<4x128xf32>
    %177 = arith.addf %169, %176 : vector<4x128xf32>
    %c2_162 = arith.constant 2 : index
    %c0_163 = arith.constant 0 : index
    %c0_164 = arith.constant 0 : index
    %178 = vector.load %arg8[%c2_162, %c0_163, %c0_164] : memref<9x4x16xbf16, #tpu.memory_space<vmem>>, vector<1x4x16xbf16>
    %179 = vector.shape_cast %178 : vector<1x4x16xbf16> to vector<4x16xbf16>
    %cst_165 = arith.constant dense<0.000000e+00> : vector<4x64xf32>
    %180 = tpu.matmul %179, %160, %cst_165 {dimension_numbers = #tpu.dot_dimension_numbers<[1], [0], [0], [1], [0, 0, 1, 1], [], []>} : vector<4x16xbf16>, vector<16x64xbf16>, vector<4x64xf32> -> vector<4x64xf32>
    %181 = arith.truncf %180 : vector<4x64xf32> to vector<4x64xbf16>
    %c2_166 = arith.constant 2 : index
    %c0_167 = arith.constant 0 : index
    %c0_168 = arith.constant 0 : index
    %182 = vector.load %arg9[%c2_166, %c0_167, %c0_168] : memref<9x64x128xbf16, #tpu.memory_space<vmem>>, vector<1x64x128xbf16>
    %183 = vector.shape_cast %182 : vector<1x64x128xbf16> to vector<64x128xbf16>
    %cst_169 = arith.constant dense<0.000000e+00> : vector<4x128xf32>
    %184 = tpu.matmul %181, %183, %cst_169 {dimension_numbers = #tpu.dot_dimension_numbers<[1], [0], [0], [1], [0, 0, 1, 1], [], []>} : vector<4x64xbf16>, vector<64x128xbf16>, vector<4x128xf32> -> vector<4x128xf32>
    %185 = arith.addf %177, %184 : vector<4x128xf32>
    %c3_170 = arith.constant 3 : index
    %c0_171 = arith.constant 0 : index
    %c0_172 = arith.constant 0 : index
    %186 = vector.load %arg8[%c3_170, %c0_171, %c0_172] : memref<9x4x16xbf16, #tpu.memory_space<vmem>>, vector<1x4x16xbf16>
    %187 = vector.shape_cast %186 : vector<1x4x16xbf16> to vector<4x16xbf16>
    %cst_173 = arith.constant dense<0.000000e+00> : vector<4x64xf32>
    %188 = tpu.matmul %187, %160, %cst_173 {dimension_numbers = #tpu.dot_dimension_numbers<[1], [0], [0], [1], [0, 0, 1, 1], [], []>} : vector<4x16xbf16>, vector<16x64xbf16>, vector<4x64xf32> -> vector<4x64xf32>
    %189 = arith.truncf %188 : vector<4x64xf32> to vector<4x64xbf16>
    %c3_174 = arith.constant 3 : index
    %c0_175 = arith.constant 0 : index
    %c0_176 = arith.constant 0 : index
    %190 = vector.load %arg9[%c3_174, %c0_175, %c0_176] : memref<9x64x128xbf16, #tpu.memory_space<vmem>>, vector<1x64x128xbf16>
    %191 = vector.shape_cast %190 : vector<1x64x128xbf16> to vector<64x128xbf16>
    %cst_177 = arith.constant dense<0.000000e+00> : vector<4x128xf32>
    %192 = tpu.matmul %189, %191, %cst_177 {dimension_numbers = #tpu.dot_dimension_numbers<[1], [0], [0], [1], [0, 0, 1, 1], [], []>} : vector<4x64xbf16>, vector<64x128xbf16>, vector<4x128xf32> -> vector<4x128xf32>
    %193 = arith.addf %185, %192 : vector<4x128xf32>
    %c4_178 = arith.constant 4 : index
    %c0_179 = arith.constant 0 : index
    %c0_180 = arith.constant 0 : index
    %194 = vector.load %arg8[%c4_178, %c0_179, %c0_180] : memref<9x4x16xbf16, #tpu.memory_space<vmem>>, vector<1x4x16xbf16>
    %195 = vector.shape_cast %194 : vector<1x4x16xbf16> to vector<4x16xbf16>
    %cst_181 = arith.constant dense<0.000000e+00> : vector<4x64xf32>
    %196 = tpu.matmul %195, %160, %cst_181 {dimension_numbers = #tpu.dot_dimension_numbers<[1], [0], [0], [1], [0, 0, 1, 1], [], []>} : vector<4x16xbf16>, vector<16x64xbf16>, vector<4x64xf32> -> vector<4x64xf32>
    %197 = arith.truncf %196 : vector<4x64xf32> to vector<4x64xbf16>
    %c4_182 = arith.constant 4 : index
    %c0_183 = arith.constant 0 : index
    %c0_184 = arith.constant 0 : index
    %198 = vector.load %arg9[%c4_182, %c0_183, %c0_184] : memref<9x64x128xbf16, #tpu.memory_space<vmem>>, vector<1x64x128xbf16>
    %199 = vector.shape_cast %198 : vector<1x64x128xbf16> to vector<64x128xbf16>
    %cst_185 = arith.constant dense<0.000000e+00> : vector<4x128xf32>
    %200 = tpu.matmul %197, %199, %cst_185 {dimension_numbers = #tpu.dot_dimension_numbers<[1], [0], [0], [1], [0, 0, 1, 1], [], []>} : vector<4x64xbf16>, vector<64x128xbf16>, vector<4x128xf32> -> vector<4x128xf32>
    %201 = arith.addf %193, %200 : vector<4x128xf32>
    %c5_186 = arith.constant 5 : index
    %c0_187 = arith.constant 0 : index
    %c0_188 = arith.constant 0 : index
    %202 = vector.load %arg8[%c5_186, %c0_187, %c0_188] : memref<9x4x16xbf16, #tpu.memory_space<vmem>>, vector<1x4x16xbf16>
    %203 = vector.shape_cast %202 : vector<1x4x16xbf16> to vector<4x16xbf16>
    %cst_189 = arith.constant dense<0.000000e+00> : vector<4x64xf32>
    %204 = tpu.matmul %203, %160, %cst_189 {dimension_numbers = #tpu.dot_dimension_numbers<[1], [0], [0], [1], [0, 0, 1, 1], [], []>} : vector<4x16xbf16>, vector<16x64xbf16>, vector<4x64xf32> -> vector<4x64xf32>
    %205 = arith.truncf %204 : vector<4x64xf32> to vector<4x64xbf16>
    %c5_190 = arith.constant 5 : index
    %c0_191 = arith.constant 0 : index
    %c0_192 = arith.constant 0 : index
    %206 = vector.load %arg9[%c5_190, %c0_191, %c0_192] : memref<9x64x128xbf16, #tpu.memory_space<vmem>>, vector<1x64x128xbf16>
    %207 = vector.shape_cast %206 : vector<1x64x128xbf16> to vector<64x128xbf16>
    %cst_193 = arith.constant dense<0.000000e+00> : vector<4x128xf32>
    %208 = tpu.matmul %205, %207, %cst_193 {dimension_numbers = #tpu.dot_dimension_numbers<[1], [0], [0], [1], [0, 0, 1, 1], [], []>} : vector<4x64xbf16>, vector<64x128xbf16>, vector<4x128xf32> -> vector<4x128xf32>
    %209 = arith.addf %201, %208 : vector<4x128xf32>
    %c6_194 = arith.constant 6 : index
    %c0_195 = arith.constant 0 : index
    %c0_196 = arith.constant 0 : index
    %210 = vector.load %arg8[%c6_194, %c0_195, %c0_196] : memref<9x4x16xbf16, #tpu.memory_space<vmem>>, vector<1x4x16xbf16>
    %211 = vector.shape_cast %210 : vector<1x4x16xbf16> to vector<4x16xbf16>
    %cst_197 = arith.constant dense<0.000000e+00> : vector<4x64xf32>
    %212 = tpu.matmul %211, %160, %cst_197 {dimension_numbers = #tpu.dot_dimension_numbers<[1], [0], [0], [1], [0, 0, 1, 1], [], []>} : vector<4x16xbf16>, vector<16x64xbf16>, vector<4x64xf32> -> vector<4x64xf32>
    %213 = arith.truncf %212 : vector<4x64xf32> to vector<4x64xbf16>
    %c6_198 = arith.constant 6 : index
    %c0_199 = arith.constant 0 : index
    %c0_200 = arith.constant 0 : index
    %214 = vector.load %arg9[%c6_198, %c0_199, %c0_200] : memref<9x64x128xbf16, #tpu.memory_space<vmem>>, vector<1x64x128xbf16>
    %215 = vector.shape_cast %214 : vector<1x64x128xbf16> to vector<64x128xbf16>
    %cst_201 = arith.constant dense<0.000000e+00> : vector<4x128xf32>
    %216 = tpu.matmul %213, %215, %cst_201 {dimension_numbers = #tpu.dot_dimension_numbers<[1], [0], [0], [1], [0, 0, 1, 1], [], []>} : vector<4x64xbf16>, vector<64x128xbf16>, vector<4x128xf32> -> vector<4x128xf32>
    %217 = arith.addf %209, %216 : vector<4x128xf32>
    %c7_202 = arith.constant 7 : index
    %c0_203 = arith.constant 0 : index
    %c0_204 = arith.constant 0 : index
    %218 = vector.load %arg8[%c7_202, %c0_203, %c0_204] : memref<9x4x16xbf16, #tpu.memory_space<vmem>>, vector<1x4x16xbf16>
    %219 = vector.shape_cast %218 : vector<1x4x16xbf16> to vector<4x16xbf16>
    %cst_205 = arith.constant dense<0.000000e+00> : vector<4x64xf32>
    %220 = tpu.matmul %219, %160, %cst_205 {dimension_numbers = #tpu.dot_dimension_numbers<[1], [0], [0], [1], [0, 0, 1, 1], [], []>} : vector<4x16xbf16>, vector<16x64xbf16>, vector<4x64xf32> -> vector<4x64xf32>
    %221 = arith.truncf %220 : vector<4x64xf32> to vector<4x64xbf16>
    %c7_206 = arith.constant 7 : index
    %c0_207 = arith.constant 0 : index
    %c0_208 = arith.constant 0 : index
    %222 = vector.load %arg9[%c7_206, %c0_207, %c0_208] : memref<9x64x128xbf16, #tpu.memory_space<vmem>>, vector<1x64x128xbf16>
    %223 = vector.shape_cast %222 : vector<1x64x128xbf16> to vector<64x128xbf16>
    %cst_209 = arith.constant dense<0.000000e+00> : vector<4x128xf32>
    %224 = tpu.matmul %221, %223, %cst_209 {dimension_numbers = #tpu.dot_dimension_numbers<[1], [0], [0], [1], [0, 0, 1, 1], [], []>} : vector<4x64xbf16>, vector<64x128xbf16>, vector<4x128xf32> -> vector<4x128xf32>
    %225 = arith.addf %217, %224 : vector<4x128xf32>
    %c8_210 = arith.constant 8 : index
    %c0_211 = arith.constant 0 : index
    %c0_212 = arith.constant 0 : index
    %226 = vector.load %arg8[%c8_210, %c0_211, %c0_212] : memref<9x4x16xbf16, #tpu.memory_space<vmem>>, vector<1x4x16xbf16>
    %227 = vector.shape_cast %226 : vector<1x4x16xbf16> to vector<4x16xbf16>
    %cst_213 = arith.constant dense<0.000000e+00> : vector<4x64xf32>
    %228 = tpu.matmul %227, %160, %cst_213 {dimension_numbers = #tpu.dot_dimension_numbers<[1], [0], [0], [1], [0, 0, 1, 1], [], []>} : vector<4x16xbf16>, vector<16x64xbf16>, vector<4x64xf32> -> vector<4x64xf32>
    %229 = arith.truncf %228 : vector<4x64xf32> to vector<4x64xbf16>
    %c8_214 = arith.constant 8 : index
    %c0_215 = arith.constant 0 : index
    %c0_216 = arith.constant 0 : index
    %230 = vector.load %arg9[%c8_214, %c0_215, %c0_216] : memref<9x64x128xbf16, #tpu.memory_space<vmem>>, vector<1x64x128xbf16>
    %231 = vector.shape_cast %230 : vector<1x64x128xbf16> to vector<64x128xbf16>
    %cst_217 = arith.constant dense<0.000000e+00> : vector<4x128xf32>
    %232 = tpu.matmul %229, %231, %cst_217 {dimension_numbers = #tpu.dot_dimension_numbers<[1], [0], [0], [1], [0, 0, 1, 1], [], []>} : vector<4x64xbf16>, vector<64x128xbf16>, vector<4x128xf32> -> vector<4x128xf32>
    %233 = arith.addf %225, %232 : vector<4x128xf32>
    %c0_218 = arith.constant 0 : index
    %c0_219 = arith.constant 0 : index
    %234 = vector.load %arg10[%c0_218, %c0_219] : memref<1x128xf32, #tpu.memory_space<vmem>>, vector<1x128xf32>
    %235 = vector.broadcast %234 : vector<1x128xf32> to vector<4x128xf32>
    %236 = arith.addf %233, %235 : vector<4x128xf32>
    %cst_220 = arith.constant 0.000000e+00 : f32
    %237 = vector.broadcast %cst_220 : f32 to vector<4x128xf32>
    %238 = arith.maximumf %236, %237 : vector<4x128xf32>
    %239 = arith.truncf %238 : vector<4x128xf32> to vector<4x128xbf16>
    %cst_221 = arith.constant 0.000000e+00 : f32
    %240 = vector.broadcast %cst_221 : f32 to vector<1x256xf32>
    %c4_222 = arith.constant 4 : index
    %c0_223 = arith.constant 0 : index
    %c0_224 = arith.constant 0 : index
    %241 = vector.load %arg11[%c4_222, %c0_223, %c0_224] : memref<9x1x4xbf16, #tpu.memory_space<vmem>>, vector<1x1x4xbf16>
    %242 = vector.shape_cast %241 : vector<1x1x4xbf16> to vector<1x4xbf16>
    %cst_225 = arith.constant dense<0.000000e+00> : vector<1x128xf32>
    %243 = tpu.matmul %242, %239, %cst_225 {dimension_numbers = #tpu.dot_dimension_numbers<[1], [0], [0], [1], [0, 0, 1, 1], [], []>} : vector<1x4xbf16>, vector<4x128xbf16>, vector<1x128xf32> -> vector<1x128xf32>
    %244 = arith.truncf %243 : vector<1x128xf32> to vector<1x128xbf16>
    %c4_226 = arith.constant 4 : index
    %c0_227 = arith.constant 0 : index
    %c0_228 = arith.constant 0 : index
    %245 = vector.load %arg12[%c4_226, %c0_227, %c0_228] : memref<9x128x256xbf16, #tpu.memory_space<vmem>>, vector<1x128x256xbf16>
    %246 = vector.shape_cast %245 : vector<1x128x256xbf16> to vector<128x256xbf16>
    %cst_229 = arith.constant dense<0.000000e+00> : vector<1x256xf32>
    %247 = tpu.matmul %244, %246, %cst_229 {dimension_numbers = #tpu.dot_dimension_numbers<[1], [0], [0], [1], [0, 0, 1, 1], [], []>} : vector<1x128xbf16>, vector<128x256xbf16>, vector<1x256xf32> -> vector<1x256xf32>
    %248 = arith.addf %240, %247 : vector<1x256xf32>
    %c5_230 = arith.constant 5 : index
    %c0_231 = arith.constant 0 : index
    %c0_232 = arith.constant 0 : index
    %249 = vector.load %arg11[%c5_230, %c0_231, %c0_232] : memref<9x1x4xbf16, #tpu.memory_space<vmem>>, vector<1x1x4xbf16>
    %250 = vector.shape_cast %249 : vector<1x1x4xbf16> to vector<1x4xbf16>
    %cst_233 = arith.constant dense<0.000000e+00> : vector<1x128xf32>
    %251 = tpu.matmul %250, %239, %cst_233 {dimension_numbers = #tpu.dot_dimension_numbers<[1], [0], [0], [1], [0, 0, 1, 1], [], []>} : vector<1x4xbf16>, vector<4x128xbf16>, vector<1x128xf32> -> vector<1x128xf32>
    %252 = arith.truncf %251 : vector<1x128xf32> to vector<1x128xbf16>
    %c5_234 = arith.constant 5 : index
    %c0_235 = arith.constant 0 : index
    %c0_236 = arith.constant 0 : index
    %253 = vector.load %arg12[%c5_234, %c0_235, %c0_236] : memref<9x128x256xbf16, #tpu.memory_space<vmem>>, vector<1x128x256xbf16>
    %254 = vector.shape_cast %253 : vector<1x128x256xbf16> to vector<128x256xbf16>
    %cst_237 = arith.constant dense<0.000000e+00> : vector<1x256xf32>
    %255 = tpu.matmul %252, %254, %cst_237 {dimension_numbers = #tpu.dot_dimension_numbers<[1], [0], [0], [1], [0, 0, 1, 1], [], []>} : vector<1x128xbf16>, vector<128x256xbf16>, vector<1x256xf32> -> vector<1x256xf32>
    %256 = arith.addf %248, %255 : vector<1x256xf32>
    %c7_238 = arith.constant 7 : index
    %c0_239 = arith.constant 0 : index
    %c0_240 = arith.constant 0 : index
    %257 = vector.load %arg11[%c7_238, %c0_239, %c0_240] : memref<9x1x4xbf16, #tpu.memory_space<vmem>>, vector<1x1x4xbf16>
    %258 = vector.shape_cast %257 : vector<1x1x4xbf16> to vector<1x4xbf16>
    %cst_241 = arith.constant dense<0.000000e+00> : vector<1x128xf32>
    %259 = tpu.matmul %258, %239, %cst_241 {dimension_numbers = #tpu.dot_dimension_numbers<[1], [0], [0], [1], [0, 0, 1, 1], [], []>} : vector<1x4xbf16>, vector<4x128xbf16>, vector<1x128xf32> -> vector<1x128xf32>
    %260 = arith.truncf %259 : vector<1x128xf32> to vector<1x128xbf16>
    %c7_242 = arith.constant 7 : index
    %c0_243 = arith.constant 0 : index
    %c0_244 = arith.constant 0 : index
    %261 = vector.load %arg12[%c7_242, %c0_243, %c0_244] : memref<9x128x256xbf16, #tpu.memory_space<vmem>>, vector<1x128x256xbf16>
    %262 = vector.shape_cast %261 : vector<1x128x256xbf16> to vector<128x256xbf16>
    %cst_245 = arith.constant dense<0.000000e+00> : vector<1x256xf32>
    %263 = tpu.matmul %260, %262, %cst_245 {dimension_numbers = #tpu.dot_dimension_numbers<[1], [0], [0], [1], [0, 0, 1, 1], [], []>} : vector<1x128xbf16>, vector<128x256xbf16>, vector<1x256xf32> -> vector<1x256xf32>
    %264 = arith.addf %256, %263 : vector<1x256xf32>
    %c8_246 = arith.constant 8 : index
    %c0_247 = arith.constant 0 : index
    %c0_248 = arith.constant 0 : index
    %265 = vector.load %arg11[%c8_246, %c0_247, %c0_248] : memref<9x1x4xbf16, #tpu.memory_space<vmem>>, vector<1x1x4xbf16>
    %266 = vector.shape_cast %265 : vector<1x1x4xbf16> to vector<1x4xbf16>
    %cst_249 = arith.constant dense<0.000000e+00> : vector<1x128xf32>
    %267 = tpu.matmul %266, %239, %cst_249 {dimension_numbers = #tpu.dot_dimension_numbers<[1], [0], [0], [1], [0, 0, 1, 1], [], []>} : vector<1x4xbf16>, vector<4x128xbf16>, vector<1x128xf32> -> vector<1x128xf32>
    %268 = arith.truncf %267 : vector<1x128xf32> to vector<1x128xbf16>
    %c8_250 = arith.constant 8 : index
    %c0_251 = arith.constant 0 : index
    %c0_252 = arith.constant 0 : index
    %269 = vector.load %arg12[%c8_250, %c0_251, %c0_252] : memref<9x128x256xbf16, #tpu.memory_space<vmem>>, vector<1x128x256xbf16>
    %270 = vector.shape_cast %269 : vector<1x128x256xbf16> to vector<128x256xbf16>
    %cst_253 = arith.constant dense<0.000000e+00> : vector<1x256xf32>
    %271 = tpu.matmul %268, %270, %cst_253 {dimension_numbers = #tpu.dot_dimension_numbers<[1], [0], [0], [1], [0, 0, 1, 1], [], []>} : vector<1x128xbf16>, vector<128x256xbf16>, vector<1x256xf32> -> vector<1x256xf32>
    %272 = arith.addf %264, %271 : vector<1x256xf32>
    %c0_254 = arith.constant 0 : index
    %c0_255 = arith.constant 0 : index
    %273 = vector.load %arg13[%c0_254, %c0_255] : memref<1x256xf32, #tpu.memory_space<vmem>>, vector<1x256xf32>
    %274 = arith.addf %272, %273 : vector<1x256xf32>
    %cst_256 = arith.constant 0.000000e+00 : f32
    %275 = vector.broadcast %cst_256 : f32 to vector<1x256xf32>
    %276 = arith.maximumf %274, %275 : vector<1x256xf32>
    %277 = arith.truncf %276 : vector<1x256xf32> to vector<1x256xbf16>
    %c0_257 = arith.constant 0 : index
    %c0_258 = arith.constant 0 : index
    %278 = vector.load %arg15[%c0_257, %c0_258] : memref<1x64xf32, #tpu.memory_space<vmem>>, vector<1x64xf32>
    %c0_259 = arith.constant 0 : index
    %c0_260 = arith.constant 0 : index
    %c0_261 = arith.constant 0 : index
    %279 = vector.load %arg14[%c0_259, %c0_260, %c0_261] : memref<1x256x64xbf16, #tpu.memory_space<vmem>>, vector<1x256x64xbf16>
    %280 = vector.shape_cast %279 : vector<1x256x64xbf16> to vector<256x64xbf16>
    %cst_262 = arith.constant dense<0.000000e+00> : vector<1x64xf32>
    %281 = tpu.matmul %277, %280, %cst_262 {dimension_numbers = #tpu.dot_dimension_numbers<[1], [0], [0], [1], [0, 0, 1, 1], [], []>} : vector<1x256xbf16>, vector<256x64xbf16>, vector<1x64xf32> -> vector<1x64xf32>
    %282 = arith.addf %278, %281 : vector<1x64xf32>
    %c0_263 = arith.constant 0 : index
    %c0_264 = arith.constant 0 : index
    %c0_265 = arith.constant 0 : index
    %283 = vector.load %arg16[%c0_263, %c0_264, %c0_265] : memref<1x1x64xf32, #tpu.memory_space<vmem>>, vector<1x1x64xf32>
    %284 = vector.shape_cast %283 : vector<1x1x64xf32> to vector<1x64xf32>
    %285 = vector.shape_cast %282 : vector<1x64xf32> to vector<1x1x64xf32>
    tpu.vector_store %arg16[%c0_263, %c0_264, %c0_265], %285 {strides = array<i32>} : memref<1x1x64xf32, #tpu.memory_space<vmem>>, vector<1x1x64xf32>,
    return
  }
  func.func @transform_0(%arg0: i32) -> (i32, i32, i32) {
    %c0_i32 = arith.constant 0 : i32
    %c0_i32_0 = arith.constant 0 : i32
    %c0_i32_1 = arith.constant 0 : i32
    return %arg0, %c0_i32, %c0_i32_0 : i32, i32, i32
  }
  func.func @transform_1(%arg0: i32) -> (i32, i32, i32) {
    %c0_i32 = arith.constant 0 : i32
    %c0_i32_0 = arith.constant 0 : i32
    %c0_i32_1 = arith.constant 0 : i32
    %c0_i32_2 = arith.constant 0 : i32
    return %c0_i32, %c0_i32_0, %c0_i32_1 : i32, i32, i32
  }
  func.func @transform_2(%arg0: i32) -> (i32, i32, i32) {
    %c0_i32 = arith.constant 0 : i32
    %c0_i32_0 = arith.constant 0 : i32
    %c0_i32_1 = arith.constant 0 : i32
    %c0_i32_2 = arith.constant 0 : i32
    return %c0_i32, %c0_i32_0, %c0_i32_1 : i32, i32, i32
  }
  func.func @transform_3(%arg0: i32) -> (i32, i32) {
    %c0_i32 = arith.constant 0 : i32
    %c0_i32_0 = arith.constant 0 : i32
    %c0_i32_1 = arith.constant 0 : i32
    return %c0_i32, %c0_i32_0 : i32, i32
  }
  func.func @transform_4(%arg0: i32) -> (i32, i32, i32) {
    %c0_i32 = arith.constant 0 : i32
    %c0_i32_0 = arith.constant 0 : i32
    %c0_i32_1 = arith.constant 0 : i32
    %c0_i32_2 = arith.constant 0 : i32
    return %c0_i32, %c0_i32_0, %c0_i32_1 : i32, i32, i32
  }
  func.func @transform_5(%arg0: i32) -> (i32, i32, i32) {
    %c0_i32 = arith.constant 0 : i32
    %c0_i32_0 = arith.constant 0 : i32
    %c0_i32_1 = arith.constant 0 : i32
    %c0_i32_2 = arith.constant 0 : i32
    return %c0_i32, %c0_i32_0, %c0_i32_1 : i32, i32, i32
  }
  func.func @transform_6(%arg0: i32) -> (i32, i32) {
    %c0_i32 = arith.constant 0 : i32
    %c0_i32_0 = arith.constant 0 : i32
    %c0_i32_1 = arith.constant 0 : i32
    return %c0_i32, %c0_i32_0 : i32, i32
  }
  func.func @transform_7(%arg0: i32) -> (i32, i32, i32) {
    %c0_i32 = arith.constant 0 : i32
    %c0_i32_0 = arith.constant 0 : i32
    %c0_i32_1 = arith.constant 0 : i32
    %c0_i32_2 = arith.constant 0 : i32
    return %c0_i32, %c0_i32_0, %c0_i32_1 : i32, i32, i32
  }
  func.func @transform_8(%arg0: i32) -> (i32, i32, i32) {
    %c0_i32 = arith.constant 0 : i32
    %c0_i32_0 = arith.constant 0 : i32
    %c0_i32_1 = arith.constant 0 : i32
    %c0_i32_2 = arith.constant 0 : i32
    return %c0_i32, %c0_i32_0, %c0_i32_1 : i32, i32, i32
  }
  func.func @transform_9(%arg0: i32) -> (i32, i32) {
    %c0_i32 = arith.constant 0 : i32
    %c0_i32_0 = arith.constant 0 : i32
    %c0_i32_1 = arith.constant 0 : i32
    return %c0_i32, %c0_i32_0 : i32, i32
  }
  func.func @transform_10(%arg0: i32) -> (i32, i32, i32) {
    %c0_i32 = arith.constant 0 : i32
    %c0_i32_0 = arith.constant 0 : i32
    %c0_i32_1 = arith.constant 0 : i32
    %c0_i32_2 = arith.constant 0 : i32
    return %c0_i32, %c0_i32_0, %c0_i32_1 : i32, i32, i32
  }
  func.func @transform_11(%arg0: i32) -> (i32, i32, i32) {
    %c0_i32 = arith.constant 0 : i32
    %c0_i32_0 = arith.constant 0 : i32
    %c0_i32_1 = arith.constant 0 : i32
    %c0_i32_2 = arith.constant 0 : i32
    return %c0_i32, %c0_i32_0, %c0_i32_1 : i32, i32, i32
  }
  func.func @transform_12(%arg0: i32) -> (i32, i32) {
    %c0_i32 = arith.constant 0 : i32
    %c0_i32_0 = arith.constant 0 : i32
    %c0_i32_1 = arith.constant 0 : i32
    return %c0_i32, %c0_i32_0 : i32, i32
  }
  func.func @transform_13(%arg0: i32) -> (i32, i32, i32) {
    %c0_i32 = arith.constant 0 : i32
    %c0_i32_0 = arith.constant 0 : i32
    %c0_i32_1 = arith.constant 0 : i32
    %c0_i32_2 = arith.constant 0 : i32
    return %c0_i32, %c0_i32_0, %c0_i32_1 : i32, i32, i32
  }
  func.func @transform_14(%arg0: i32) -> (i32, i32) {
    %c0_i32 = arith.constant 0 : i32
    %c0_i32_0 = arith.constant 0 : i32
    %c0_i32_1 = arith.constant 0 : i32
    return %c0_i32, %c0_i32_0 : i32, i32
  }
  func.func @transform_15(%arg0: i32) -> (i32, i32, i32) {
    %c0_i32 = arith.constant 0 : i32
    %c0_i32_0 = arith.constant 0 : i32
    %c0_i32_1 = arith.constant 0 : i32
    return %arg0, %c0_i32, %c0_i32_0 : i32, i32, i32
  }
}

</mosaic_0001>

<bundles_post_ra>
// kernel: encoder_forward.1
= control target key start
LH: loop header
LB: loop body
LE: loop exit
PB: predicated region body
PF: predicated region fallthrough
CT: control target
= control target key end

     0   :  { %s7553_s18 = smov 0   ;;  %s8963_s0 = inlined_call_operand.vmem [shape: f32[2,256,4], index: 0, kind: input, shape index: {}]   ;;  %s8964_s1 = inlined_call_operand.vmem [shape: bf16[9,64,256], index: 1, kind: input, shape index: {}]   ;;  %s8965_s2 = inlined_call_operand.vmem [shape: bf16[9,4,32], index: 2, kind: input, shape index: {}]   ;;  %s8966_s3 = inlined_call_operand.vmem [shape: f32[1,32], index: 3, kind: input, shape index: {}]   ;;  %s8967_s4 = inlined_call_operand.vmem [shape: bf16[9,16,64], index: 4, kind: input, shape index: {}]   ;;  %s8968_s5 = inlined_call_operand.vmem [shape: bf16[9,32,64], index: 5, kind: input, shape index: {}]   ;;  %s8969_s6 = inlined_call_operand.vmem [shape: f32[1,64], index: 6, kind: input, shape index: {}]   ;;  %s8970_s7 = inlined_call_operand.vmem [shape: bf16[9,4,16], index: 7, kind: input, shape index: {}]   ;;  %s8971_s8 = inlined_call_operand.vmem [shape: bf16[9,64,128], index: 8, kind: input, shape index: {}]   ;;  %s8972_s9 = inlined_call_operand.vmem [shape: f32[1,128], index: 9, kind: input, shape index: {}]   ;;  %s8973_s10 = inlined_call_operand.vmem [shape: bf16[9,1,4], index: 10, kind: input, shape index: {}]   ;;  %s8974_s11 = inlined_call_operand.vmem [shape: bf16[9,128,256], index: 11, kind: input, shape index: {}]   ;;  %s8975_s12 = inlined_call_operand.vmem [shape: f32[1,256], index: 12, kind: input, shape index: {}]   ;;  %s8976_s13 = inlined_call_operand.vmem [shape: bf16[1,256,64], index: 13, kind: input, shape index: {}]   ;;  %s8977_s14 = inlined_call_operand.vmem [shape: f32[1,64], index: 14, kind: input, shape index: {}]   ;;  %s8978_s15 = inlined_call_operand.vmem [shape: f32[2,1,64], index: 15, kind: output, shape index: {}]  }
   0x1 LB: > { %s5569_s19 = sadd.s32 4294967295, %s7468_s18   ;;  %p5573_p0 = scmp.ge.s32.totalorder %s7468_s18, 1  ;;  %s7468_s18 = sphi %s7553_s18, %s25_s18  }
   0x2   : > { %p437_p1 = scmp.lt.s32.totalorder %s7468_s18, 3 }
   0x4   : > { %p438_p2 = pnand %p5573_p0, %p437_p1 }
   0x5   : > { %p483_p3 = scmp.lt.s32.totalorder (!%p438_p2), %s5569_s19, 1 }
   0x6   : > { %441 = sbr.rel (%p438_p2) target bundleno = 5506 (0x1582), region = 80 }
   0xb   : > { %v7181_v0 = vld [vmem:[%s8964_s1 + $0x4] ss:$8 sps:$4 sm:$0xff]   ;;  %s8980_s19 = smov (!%p483_p3, %s5569_s19), 1  ;;  %v5600_v50 = vld [vmem:[%s8965_s2 + $0x2] sm:$0x3]  ;;  %vm791_vm0 = vcmask 1041408  }
   0xc   : > { %v7184_v1 = vld [vmem:[%s8964_s1 + $0x44] ss:$8 sps:$4 sm:$0xff]   ;;  %620 = vmatprep.mubr.bf16.mxu0 %v7181_v0  ;;  %s6132_s24 = sshll.u32 %s8980_s19, 8  ;;  %v7179_v51 = vld [vmem:[%s8964_s1] ss:$8 sps:$4 sm:$0xff]   ;;  %v793_v55 = vsel %vm791_vm0, %v5600_v50, 0  ;;  %s490_s29 = scalar_lea.vmem %s8978_s15, %s8980_s19 }
   0xd   : > { %739 = vmatprep.mubr.bf16.mxu1 %v7184_v1  ;;  %s7573_s27 = scalar_lea.vmem %s8963_s0, %s6132_s24  ;;  %v7182_v52 = vld [vmem:[%s8964_s1 + $0x40] ss:$8 sps:$4 sm:$0xff]   ;;  %v7185_v53 = vld [vmem:[%s8964_s1 + $0x14] ss:$8 sps:$4 sm:$0xff]   ;;  %v7189_v56 = vld [vmem:[%s8964_s1 + $0x10] ss:$8 sps:$4 sm:$0xff]  }
   0xe   : > { %v522_v2 = vld [vmem:[%s7573_s27 + $0xf0] sm:$0xff]  ;;  %v523_v3 = vld [vmem:[%s7573_s27 + $0xf8] sm:$0xff]  ;;  %v520_v7 = vld [vmem:[%s7573_s27 + $0xe0] sm:$0xff]  ;;  %vm778_vm1 = vcmask 31744   ;;  %vm7471_vm2 = vmmov 0   ;;  %vm2430_vm3 = vcmask 523264  }
   0xf   : > { %v506_v4 = vld [vmem:[%s7573_s27 + $0x70] sm:$0xff]  ;;  %v7578_v5 = vpack.c.bf16 %v523_v3, %v522_v2  ;;  %v507_v6 = vld [vmem:[%s7573_s27 + $0x78] sm:$0xff]  ;;  %v521_v8 = vld [vmem:[%s7573_s27 + $0xe8] sm:$0xff]  ;;  %vm2550_vm4 = vcmask 261120   ;;  %vm3476_vm5 = vcmask 130048   ;;  %vm5520_vm6 = vcmask 516096  }
  0x10   : > { %v7583_v9 = vpack.c.bf16 %v507_v6, %v506_v4  ;;  %v7585_v10 = vpack.c.bf16 %v521_v8, %v520_v7  ;;  %v504_v11 = vld [vmem:[%s7573_s27 + $0x60] sm:$0xff]  ;;  %v505_v12 = vld [vmem:[%s7573_s27 + $0x68] sm:$0xff]  ;;  %v518_v13 = vld [vmem:[%s7573_s27 + $0xd0] sm:$0xff] }
  0x11   : > { %6133 = vmatprep.subr.bf16.mxu0 %v7578_v5  ;;  %6173 = vmatprep.subr.bf16.mxu1 %v7578_v5  ;;  %v519_v14 = vld [vmem:[%s7573_s27 + $0xd8] sm:$0xff]  ;;  %v7595_v15 = vpack.c.bf16 %v505_v12, %v504_v11  ;;  %v502_v17 = vld [vmem:[%s7573_s27 + $0x50] sm:$0xff]  ;;  %v516_v19 = vld [vmem:[%s7573_s27 + $0xc0] sm:$0xff] }
  0x12   : > { %6134 = vmatpush3.bf16.msra.mxu0 %v7583_v9  ;;  %6174 = vmatpush3.bf16.msra.mxu1 %v7583_v9  ;;  %v7599_v16 = vpack.c.bf16 %v519_v14, %v518_v13  ;;  %v503_v18 = vld [vmem:[%s7573_s27 + $0x58] sm:$0xff]  ;;  %v517_v20 = vld [vmem:[%s7573_s27 + $0xc8] sm:$0xff]  ;;  %v500_v23 = vld [vmem:[%s7573_s27 + $0x40] sm:$0xff] }
  0x13   : > { %6135 = vmatprep.subr.bf16.mxu0 %v7585_v10  ;;  %6175 = vmatprep.subr.bf16.mxu1 %v7585_v10  ;;  %v7607_v21 = vpack.c.bf16 %v503_v18, %v502_v17  ;;  %v7611_v22 = vpack.c.bf16 %v517_v20, %v516_v19  ;;  %v501_v24 = vld [vmem:[%s7573_s27 + $0x48] sm:$0xff]  ;;  %v514_v25 = vld [vmem:[%s7573_s27 + $0xb0] sm:$0xff]  ;;  %v515_v26 = vld [vmem:[%s7573_s27 + $0xb8] sm:$0xff] }
  0x14   : > { %v7619_v27 = vpack.c.bf16 %v501_v24, %v500_v23  ;;  %v498_v28 = vld [vmem:[%s7573_s27 + $0x30] sm:$0xff]  ;;  %v7624_v29 = vpack.c.bf16 %v515_v26, %v514_v25  ;;  %v499_v30 = vld [vmem:[%s7573_s27 + $0x38] sm:$0xff]  ;;  %v512_v31 = vld [vmem:[%s7573_s27 + $0xa0] sm:$0xff] }
  0x15   : > { %v513_v32 = vld [vmem:[%s7573_s27 + $0xa8] sm:$0xff]  ;;  %v496_v33 = vld [vmem:[%s7573_s27 + $0x20] sm:$0xff]  ;;  %v7633_v35 = vpack.c.bf16 %v499_v30, %v498_v28  ;;  %v510_v36 = vld [vmem:[%s7573_s27 + $0x90] sm:$0xff] }
  0x16   : > { %6136 = vmatpush3.bf16.msra.mxu0 %v7595_v15  ;;  %6176 = vmatpush3.bf16.msra.mxu1 %v7595_v15  ;;  %v497_v34 = vld [vmem:[%s7573_s27 + $0x28] sm:$0xff]  ;;  %v511_v37 = vld [vmem:[%s7573_s27 + $0x98] sm:$0xff]  ;;  %v7639_v38 = vpack.c.bf16 %v513_v32, %v512_v31  ;;  %v494_v39 = vld [vmem:[%s7573_s27 + $0x10] sm:$0xff] }
  0x17   : > { %6137 = vmatprep.subr.bf16.mxu0 %v7599_v16  ;;  %6177 = vmatprep.subr.bf16.mxu1 %v7599_v16  ;;  %v495_v40 = vld [vmem:[%s7573_s27 + $0x18] sm:$0xff]  ;;  %v7645_v41 = vpack.c.bf16 %v497_v34, %v496_v33  ;;  %v508_v42 = vld [vmem:[%s7573_s27 + $0x80] sm:$0xff]  ;;  %v509_v43 = vld [vmem:[%s7573_s27 + $0x88] sm:$0xff]  ;;  %v7651_v44 = vpack.c.bf16 %v511_v37, %v510_v36 }
  0x18   : > { %v492_v45 = vld [vmem:[%s7573_s27] sm:$0xff]  ;;  %v493_v46 = vld [vmem:[%s7573_s27 + $0x8] sm:$0xff]  ;;  %v7657_v47 = vpack.c.bf16 %v495_v40, %v494_v39  ;;  %v7661_v48 = vpack.c.bf16 %v509_v43, %v508_v42  ;;  %v7187_v54 = vld [vmem:[%s8964_s1 + $0x54] ss:$8 sps:$4 sm:$0xff]  }
  0x19   : > { %v7665_v49 = vpack.c.bf16 %v493_v46, %v492_v45  ;;  %v7190_v57 = vld [vmem:[%s8964_s1 + $0x50] ss:$8 sps:$4 sm:$0xff]   ;;  %v7191_v58 = vld [vmem:[%s8964_s1 + $0x24] ss:$8 sps:$4 sm:$0xff]   ;;  %v7195_v60 = vld [vmem:[%s8964_s1 + $0x20] ss:$8 sps:$4 sm:$0xff]  }
  0x1a   : > { %6138 = vmatpush3.bf16.msra.mxu0 %v7607_v21  ;;  %6178 = vmatpush3.bf16.msra.mxu1 %v7607_v21  ;;  %v7193_v59 = vld [vmem:[%s8964_s1 + $0x64] ss:$8 sps:$4 sm:$0xff]   ;;  %v7196_v61 = vld [vmem:[%s8964_s1 + $0x60] ss:$8 sps:$4 sm:$0xff]   ;;  %v7197_v62 = vld [vmem:[%s8964_s1 + $0x34] ss:$8 sps:$4 sm:$0xff]  }
  0x1b   : > { %6139 = vmatprep.subr.bf16.mxu0 %v7611_v22  ;;  %6179 = vmatprep.subr.bf16.mxu1 %v7611_v22  ;;  %v7199_v63 = vld [vmem:[%s8964_s1 + $0x74] ss:$8 sps:$4 sm:$0xff]   ;;  %v7201_v0 = vld [vmem:[%s8964_s1 + $0x30] ss:$8 sps:$4 sm:$0xff]   ;;  %v657_v2 = vld [vmem:[%s8965_s2] sm:$0x3] }
  0x1c   : > { %v7202_v1 = vld [vmem:[%s8964_s1 + $0x70] ss:$8 sps:$4 sm:$0xff]   ;;  %v873_v3 = vsel %vm791_vm0, %v657_v2, 0 }
  0x1e   : > { %6140 = vmatpush3.bf16.msra.mxu0 %v7619_v27  ;;  %6180 = vmatpush3.bf16.msra.mxu1 %v7619_v27 }
  0x1f   : > { %6141 = vmatprep.subr.bf16.mxu0 %v7624_v29  ;;  %6181 = vmatprep.subr.bf16.mxu1 %v7624_v29 }
  0x22   : > { %6142 = vmatpush3.bf16.msra.mxu0 %v7633_v35  ;;  %6182 = vmatpush3.bf16.msra.mxu1 %v7633_v35 }
  0x23   : > { %6143 = vmatprep.subr.bf16.mxu0 %v7639_v38  ;;  %6183 = vmatprep.subr.bf16.mxu1 %v7639_v38 }
  0x26   : > { %6144 = vmatpush3.bf16.msra.mxu0 %v7645_v41  ;;  %6184 = vmatpush3.bf16.msra.mxu1 %v7645_v41 }
  0x27   : > { %6145 = vmatprep.subr.bf16.mxu0 %v7651_v44  ;;  %6185 = vmatprep.subr.bf16.mxu1 %v7651_v44 }
  0x2a   : > { %6146 = vmatpush3.bf16.msra.mxu0 %v7657_v47  ;;  %6186 = vmatpush3.bf16.msra.mxu1 %v7657_v47 }
  0x2b   : > { %6147 = vmatprep.subr.bf16.mxu0 %v7661_v48  ;;  %6187 = vmatprep.subr.bf16.mxu1 %v7661_v48 }
  0x2e   : > { %6148 = vmatpush3.bf16.msra.mxu0 %v7665_v49  ;;  %6188 = vmatpush3.bf16.msra.mxu1 %v7665_v49 }
  0x2f   : > { %7159 = vmatprep.subr.msk.bf16.mxu0 %vm791_vm0, %v5600_v50  ;;  %7160 = vmatprep.subr.msk.bf16.mxu1 %vm791_vm0, %v657_v2 }
  0x31   : > { %621 = vmatmul.mubr.bf16.vlgmr.msra.gmra.mxu0 %v7179_v51  ;;  %740 = vmatmul.mubr.bf16.vlgmr.msra.gmra.mxu1 %v7182_v52 }
  0x32   : > { %628 = vmatprep.mubr.bf16.mxu0 %v7185_v53  ;;  %747 = vmatprep.mubr.bf16.mxu1 %v7187_v54 }
  0x33   : > { %6704 = vmatpush3.bf16.msra.mxu0 %v793_v55  ;;  %6714 = vmatpush3.bf16.msra.mxu1 %v873_v3 }
  0x34   : > { %6223 = vmatprep.subr.bf16.mxu0 %v7578_v5 }
  0x39   : > { %629 = vmatmul.mubr.bf16.gmra.mxu0 %v7189_v56  ;;  %748 = vmatmul.mubr.bf16.gmra.mxu1 %v7190_v57 }
  0x3a   : > { %636 = vmatprep.mubr.bf16.mxu0 %v7191_v58  ;;  %755 = vmatprep.mubr.bf16.mxu1 %v7193_v59 }
  0x41   : > { %637 = vmatmul.mubr.bf16.gmra.mxu0 %v7195_v60  ;;  %756 = vmatmul.mubr.bf16.gmra.mxu1 %v7196_v61 }
  0x42   : > { %644 = vmatprep.mubr.bf16.mxu0 %v7197_v62  ;;  %763 = vmatprep.mubr.bf16.mxu1 %v7199_v63 }
  0x49   : > { %645 = vmatmul.mubr.bf16.gmra.mxu0 %v7201_v0  ;;  %764 = vmatmul.mubr.bf16.gmra.mxu1 %v7202_v1 }
  0xf1   : > { %v6149_v4 = vpop.f32.mrf.mxu0  ;;  %v6189_v6 = vpop.f32.mrf.mxu1 }
  0xf3   : > { %v6150_v7 = vpop.f32.mrf.mxu0  ;;  %v6190_v8 = vpop.f32.mrf.mxu1 }
  0xf4   : > { %v6151_v13 = vadd.f32 %v6150_v7, %v6149_v4  ;;  %v6191_v18 = vadd.f32 %v6190_v8, %v6189_v6 }
  0xf5   : > { %v6152_v11 = vpop.f32.mrf.mxu0  ;;  %v6192_v12 = vpop.f32.mrf.mxu1 }
  0xf7   : > { %v6153_v14 = vpop.f32.mrf.mxu0  ;;  %v6193_v17 = vpop.f32.mrf.mxu1 }
  0xf8   : > { %v6154_v19 = vadd.f32 %v6153_v14, %v6152_v11  ;;  %v6194_v20 = vadd.f32 %v6193_v17, %v6192_v12 }
  0xf9   : > { %v6155_v23 = vpop.f32.mrf.mxu0  ;;  %v6195_v24 = vpop.f32.mrf.mxu1 }
  0xfa   : > { %v653_v25 = vpack.c.bf16 %v6154_v19, %v6151_v13  ;;  %v772_v26 = vpack.c.bf16 %v6194_v20, %v6191_v18  ;;  %v7205_v13 = vld [vmem:[%s8964_s1 + $0x84] ss:$8 sps:$4 sm:$0xff]   ;;  %v7203_v18 = vld [vmem:[%s8964_s1 + $0x80] ss:$8 sps:$4 sm:$0xff]   ;;  %v7206_v19 = vld [vmem:[%s8964_s1 + $0x94] ss:$8 sps:$4 sm:$0xff]  }
  0xfb   : > { %v6156_v28 = vpop.f32.mrf.mxu0  ;;  %v6196_v30 = vpop.f32.mrf.mxu1  ;;  %v7208_v20 = vld [vmem:[%s8964_s1 + $0x90] ss:$8 sps:$4 sm:$0xff]  }
  0xfc   : > { %6705 = vmatprep.mubr.msk.bf16.mxu0 %vm778_vm1, %v772_v26  ;;  %6715 = vmatprep.mubr.msk.bf16.mxu1 %vm778_vm1, %v653_v25  ;;  %v6157_v33 = vadd.f32 %v6156_v28, %v6155_v23  ;;  %v6197_v37 = vadd.f32 %v6196_v30, %v6195_v24  ;;  %v7209_v23 = vld [vmem:[%s8964_s1 + $0xa4] ss:$8 sps:$4 sm:$0xff]   ;;  %v7211_v24 = vld [vmem:[%s8964_s1 + $0xa0] ss:$8 sps:$4 sm:$0xff]   ;;  %v7212_v25 = vld [vmem:[%s8964_s1 + $0xb4] ss:$8 sps:$4 sm:$0xff]  }
  0xfd   : > { %v6158_v31 = vpop.f32.mrf.mxu0  ;;  %v6198_v32 = vpop.f32.mrf.mxu1  ;;  %v7214_v26 = vld [vmem:[%s8964_s1 + $0xb0] ss:$8 sps:$4 sm:$0xff]   ;;  %v5625_v28 = vld [vmem:[%s8965_s2 + $0x4] sm:$0x3] }
  0xfe   : > { %7161 = vmatprep.subr.msk.bf16.mxu1 %vm791_vm0, %v5625_v28  ;;  %v1073_v30 = vsel %vm791_vm0, %v5625_v28, 0 }
  0xff   : > { %v6159_v34 = vpop.f32.mrf.mxu0  ;;  %v6199_v36 = vpop.f32.mrf.mxu1 }
 0x100   : > { %v6160_v39 = vadd.f32 %v6159_v34, %v6158_v31  ;;  %v6200_v40 = vadd.f32 %v6199_v36, %v6198_v32 }
 0x101   : > { %v6161_v42 = vpop.f32.mrf.mxu0  ;;  %v6201_v43 = vpop.f32.mrf.mxu1 }
 0x102   : > { %v654_v45 = vpack.c.bf16 %v6160_v39, %v6157_v33  ;;  %v773_v46 = vpack.c.bf16 %v6200_v40, %v6197_v37 }
 0x103   : > { %v6162_v50 = vpop.f32.mrf.mxu0  ;;  %v6202_v51 = vpop.f32.mrf.mxu1 }
 0x104   : > { %6706 = vmatmul.mubr.msk.bf16.vlgmr.msra.gmra.mxu0 %vm778_vm1, %v773_v46  ;;  %6716 = vmatmul.mubr.msk.bf16.vlgmr.msra.gmra.mxu1 %vm778_vm1, %v654_v45  ;;  %v6163_v54 = vadd.f32 %v6162_v50, %v6161_v42  ;;  %v6203_v55 = vadd.f32 %v6202_v51, %v6201_v43 }
 0x105   : > { %6224 = vmatpush3.bf16.msra.mxu0 %v7583_v9  ;;  %v6164_v52 = vpop.f32.mrf.mxu0  ;;  %v6204_v53 = vpop.f32.mrf.mxu1  ;;  %6724 = vmatpush3.bf16.msra.mxu1 %v1073_v30 }
 0x106   : > { %6225 = vmatprep.subr.bf16.mxu0 %v7585_v10  ;;  %6268 = vmatprep.subr.bf16.mxu1 %v7578_v5 }
 0x107   : > { %v6165_v56 = vpop.f32.mrf.mxu0  ;;  %v6205_v57 = vpop.f32.mrf.mxu1 }
 0x108   : > { %v6166_v58 = vadd.f32 %v6165_v56, %v6164_v52  ;;  %v6206_v59 = vadd.f32 %v6205_v57, %v6204_v53 }
 0x109   : > { %6226 = vmatpush3.bf16.msra.mxu0 %v7595_v15  ;;  %v6167_v60 = vpop.f32.mrf.mxu0  ;;  %v6207_v61 = vpop.f32.mrf.mxu1 }
 0x10a   : > { %v655_v62 = vpack.c.bf16 %v6166_v58, %v6163_v54  ;;  %v774_v63 = vpack.c.bf16 %v6206_v59, %v6203_v55  ;;  %6227 = vmatprep.subr.bf16.mxu0 %v7599_v16 }
 0x10b   : > { %v6168_v0 = vpop.f32.mrf.mxu0  ;;  %v6208_v1 = vpop.f32.mrf.mxu1 }
 0x10c   : > { %6709 = vmatprep.mubr.msk.bf16.mxu0 %vm778_vm1, %v774_v63  ;;  %6719 = vmatprep.mubr.msk.bf16.mxu1 %vm778_vm1, %v655_v62  ;;  %v6169_v4 = vadd.f32 %v6168_v0, %v6167_v60  ;;  %v6209_v6 = vadd.f32 %v6208_v1, %v6207_v61 }
 0x10d   : > { %6228 = vmatpush3.bf16.msra.mxu0 %v7607_v21  ;;  %v6170_v2 = vpop.f32.mrf.mxu0  ;;  %v6210_v3 = vpop.f32.mrf.mxu1 }
 0x10e   : > { %6229 = vmatprep.subr.bf16.mxu0 %v7611_v22 }
 0x10f   : > { %v6171_v7 = vpop.f32.mrf.mxu0  ;;  %v6211_v8 = vpop.f32.mrf.mxu1 }
 0x110   : > { %v6172_v11 = vadd.f32 %v6171_v7, %v6170_v2  ;;  %v6212_v12 = vadd.f32 %v6211_v8, %v6210_v3 }
 0x111   : > { %6230 = vmatpush3.bf16.msra.mxu0 %v7619_v27 }
 0x112   : > { %v656_v14 = vpack.c.bf16 %v6172_v11, %v6169_v4  ;;  %v775_v17 = vpack.c.bf16 %v6212_v12, %v6209_v6  ;;  %6231 = vmatprep.subr.bf16.mxu0 %v7624_v29 }
 0x114   : > { %6710 = vmatmul.mubr.msk.bf16.gmra.mxu0 %vm778_vm1, %v775_v17  ;;  %6720 = vmatmul.mubr.msk.bf16.gmra.mxu1 %vm778_vm1, %v656_v14 }
 0x115   : > { %6232 = vmatpush3.bf16.msra.mxu0 %v7633_v35  ;;  %1021 = vmatprep.mubr.bf16.mxu0 %v7205_v13 }
 0x116   : > { %6233 = vmatprep.subr.bf16.mxu0 %v7639_v38 }
 0x119   : > { %6234 = vmatpush3.bf16.msra.mxu0 %v7645_v41 }
 0x11a   : > { %6235 = vmatprep.subr.bf16.mxu0 %v7651_v44 }
 0x11d   : > { %6236 = vmatpush3.bf16.msra.mxu0 %v7657_v47 }
 0x11e   : > { %6237 = vmatprep.subr.bf16.mxu0 %v7661_v48 }
 0x121   : > { %6238 = vmatpush3.bf16.msra.mxu0 %v7665_v49 }
 0x124   : > { %1022 = vmatmul.mubr.bf16.vlgmr.msra.gmra.mxu0 %v7203_v18 }
 0x125   : > { %1029 = vmatprep.mubr.bf16.mxu0 %v7206_v19 }
 0x12c   : > { %1030 = vmatmul.mubr.bf16.gmra.mxu0 %v7208_v20 }
 0x12d   : > { %1037 = vmatprep.mubr.bf16.mxu0 %v7209_v23 }
 0x134   : > { %1038 = vmatmul.mubr.bf16.gmra.mxu0 %v7211_v24 }
 0x135   : > { %1045 = vmatprep.mubr.bf16.mxu0 %v7212_v25 }
 0x13c   : > { %1046 = vmatmul.mubr.bf16.gmra.mxu0 %v7214_v26 }
 0x1c4   : > { %v6707_v31 = vpop.f32.mrf.mxu0  ;;  %v6717_v32 = vpop.f32.mrf.mxu1 }
 0x1c5   : > { %v7777_v33 = vadd.f32 %v6717_v32, %v6707_v31  ;;  %v7217_v31 = vld [vmem:[%s8964_s1 + $0xc4] ss:$8 sps:$4 sm:$0xff]  }
 0x1c6   : > { %v829_v34 = vpop.f32.mrf.mxu0  ;;  %v909_v36 = vpop.f32.mrf.mxu1 }
 0x1c7   : > { %v7779_v37 = vadd.f32 %v909_v36, %v829_v34  ;;  %v7215_v34 = vld [vmem:[%s8964_s1 + $0xc0] ss:$8 sps:$4 sm:$0xff]   ;;  %v7218_v36 = vld [vmem:[%s8964_s1 + $0xd4] ss:$8 sps:$4 sm:$0xff]  }
 0x1c8   : > { %v6708_v39 = vpop.f32.mrf.mxu0  ;;  %v6718_v40 = vpop.f32.mrf.mxu1 }
 0x1c9   : > { %v7781_v42 = vadd.f32 %v6718_v40, %v6708_v39  ;;  %v7220_v39 = vld [vmem:[%s8964_s1 + $0xd0] ss:$8 sps:$4 sm:$0xff]   ;;  %v7221_v40 = vld [vmem:[%s8964_s1 + $0xe4] ss:$8 sps:$4 sm:$0xff]  }
 0x1ca   : > { %v7783_v43 = vpop.f32.mrf.mxu0  ;;  %v7785_v45 = vpop.f32.mrf.mxu1 }
 0x1d4   : > { %v6711_v46 = vpop.f32.mrf.mxu0  ;;  %v6721_v50 = vpop.f32.mrf.mxu1 }
 0x1d5   : > { %v7787_v51 = vadd.f32 %v6721_v50, %v6711_v46  ;;  %v7223_v46 = vld [vmem:[%s8964_s1 + $0xe0] ss:$8 sps:$4 sm:$0xff]   ;;  %v7224_v50 = vld [vmem:[%s8964_s1 + $0xf4] ss:$8 sps:$4 sm:$0xff]  }
 0x1d6   : > { %v845_v52 = vpop.f32.mrf.mxu0  ;;  %v925_v53 = vpop.f32.mrf.mxu1 }
 0x1d7   : > { %v7789_v54 = vadd.f32 %v925_v53, %v845_v52  ;;  %v7226_v52 = vld [vmem:[%s8964_s1 + $0xf0] ss:$8 sps:$4 sm:$0xff]   ;;  %v7229_v53 = vld [vmem:[%s8964_s1 + $0x104] ss:$8 sps:$4 sm:$0xff]  }
 0x1d8   : > { %v6712_v55 = vpop.f32.mrf.mxu0  ;;  %v6722_v56 = vpop.f32.mrf.mxu1 }
 0x1d9   : > { %v7791_v57 = vadd.f32 %v6722_v56, %v6712_v55  ;;  %v7227_v55 = vld [vmem:[%s8964_s1 + $0x100] ss:$8 sps:$4 sm:$0xff]   ;;  %v7230_v56 = vld [vmem:[%s8964_s1 + $0x114] ss:$8 sps:$4 sm:$0xff]  }
 0x1da   : > { %v7793_v58 = vpop.f32.mrf.mxu0 }
 0x1e4   : > { %v6239_v59 = vpop.f32.mrf.mxu0 }
 0x1e6   : > { %v6240_v60 = vpop.f32.mrf.mxu0 }
 0x1e7   : > { %v6241_v63 = vadd.f32 %v6240_v60, %v6239_v59  ;;  %v7232_v59 = vld [vmem:[%s8964_s1 + $0x110] ss:$8 sps:$4 sm:$0xff]   ;;  %v7233_v60 = vld [vmem:[%s8964_s1 + $0x124] ss:$8 sps:$4 sm:$0xff]  }
 0x1e8   : > { %v6242_v61 = vpop.f32.mrf.mxu0 }
 0x1ea   : > { %v6243_v62 = vpop.f32.mrf.mxu0 }
 0x1eb   : > { %v6244_v0 = vadd.f32 %v6243_v62, %v6242_v61  ;;  %v7235_v61 = vld [vmem:[%s8964_s1 + $0x120] ss:$8 sps:$4 sm:$0xff]   ;;  %v7236_v62 = vld [vmem:[%s8964_s1 + $0x134] ss:$8 sps:$4 sm:$0xff]  }
 0x1ec   : > { %v6245_v1 = vpop.f32.mrf.mxu0 }
 0x1ed   : > { %v1054_v2 = vpack.c.bf16 %v6244_v0, %v6241_v63  ;;  %v7238_v63 = vld [vmem:[%s8964_s1 + $0x130] ss:$8 sps:$4 sm:$0xff]   ;;  %v5646_v0 = vld [vmem:[%s8965_s2 + $0x6] sm:$0x3] }
 0x1ee   : > { %v6246_v3 = vpop.f32.mrf.mxu0  ;;  %7162 = vmatprep.subr.msk.bf16.mxu0 %vm791_vm0, %v5646_v0 }
 0x1ef   : > { %6725 = vmatprep.mubr.msk.bf16.mxu1 %vm778_vm1, %v1054_v2  ;;  %v6247_v7 = vadd.f32 %v6246_v3, %v6245_v1  ;;  %v1281_v1 = vsel %vm791_vm0, %v5646_v0, 0  ;;  %v5667_v2 = vld [vmem:[%s8965_s2 + $0x8] sm:$0x3]  ;;  %v7887_v3 = vpop.f32.mrf.mxu1 }
 0x1f0   : > { %v6248_v4 = vpop.f32.mrf.mxu0  ;;  %6734 = vmatpush3.bf16.msra.mxu0 %v1281_v1 }
 0x1f1   : > { %7163 = vmatprep.subr.msk.bf16.mxu0 %vm791_vm0, %v5667_v2 }
 0x1f2   : > { %v6249_v6 = vpop.f32.mrf.mxu0 }
 0x1f3   : > { %v6250_v8 = vadd.f32 %v6249_v6, %v6248_v4 }
 0x1f4   : > { %v6251_v11 = vpop.f32.mrf.mxu0 }
 0x1f5   : > { %v1055_v12 = vpack.c.bf16 %v6250_v8, %v6247_v7 }
 0x1f6   : > { %v6252_v13 = vpop.f32.mrf.mxu0 }
 0x1f7   : > { %6726 = vmatmul.mubr.msk.bf16.vlgmr.msra.gmra.mxu1 %vm778_vm1, %v1055_v12  ;;  %v6253_v17 = vadd.f32 %v6252_v13, %v6251_v11 }
 0x1f8   : > { %6269 = vmatpush3.bf16.msra.mxu1 %v7583_v9  ;;  %v6254_v14 = vpop.f32.mrf.mxu0 }
 0x1f9   : > { %6270 = vmatprep.subr.bf16.mxu1 %v7585_v10 }
 0x1fa   : > { %v6255_v18 = vpop.f32.mrf.mxu0 }
 0x1fb   : > { %v6256_v19 = vadd.f32 %v6255_v18, %v6254_v14 }
 0x1fc   : > { %6271 = vmatpush3.bf16.msra.mxu1 %v7595_v15  ;;  %v6257_v20 = vpop.f32.mrf.mxu0 }
 0x1fd   : > { %v1056_v23 = vpack.c.bf16 %v6256_v19, %v6253_v17  ;;  %6272 = vmatprep.subr.bf16.mxu1 %v7599_v16 }
 0x1fe   : > { %v6258_v24 = vpop.f32.mrf.mxu0 }
 0x1ff   : > { %6729 = vmatprep.mubr.msk.bf16.mxu1 %vm778_vm1, %v1056_v23  ;;  %v6259_v26 = vadd.f32 %v6258_v24, %v6257_v20 }
 0x200   : > { %6273 = vmatpush3.bf16.msra.mxu1 %v7607_v21  ;;  %v6260_v25 = vpop.f32.mrf.mxu0 }
 0x201   : > { %6274 = vmatprep.subr.bf16.mxu1 %v7611_v22 }
 0x202   : > { %v6261_v28 = vpop.f32.mrf.mxu0 }
 0x203   : > { %v6262_v30 = vadd.f32 %v6261_v28, %v6260_v25 }
 0x204   : > { %6275 = vmatpush3.bf16.msra.mxu1 %v7619_v27 }
 0x205   : > { %v1057_v32 = vpack.c.bf16 %v6262_v30, %v6259_v26  ;;  %6276 = vmatprep.subr.bf16.mxu1 %v7624_v29 }
 0x207   : > { %6730 = vmatmul.mubr.msk.bf16.gmra.mxu1 %vm778_vm1, %v1057_v32 }
 0x208   : > { %6277 = vmatpush3.bf16.msra.mxu1 %v7633_v35  ;;  %1229 = vmatprep.mubr.bf16.mxu1 %v7217_v31 }
 0x209   : > { %6278 = vmatprep.subr.bf16.mxu1 %v7639_v38 }
 0x20c   : > { %6279 = vmatpush3.bf16.msra.mxu1 %v7645_v41 }
 0x20d   : > { %6280 = vmatprep.subr.bf16.mxu1 %v7651_v44 }
 0x210   : > { %6281 = vmatpush3.bf16.msra.mxu1 %v7657_v47 }
 0x211   : > { %6282 = vmatprep.subr.bf16.mxu1 %v7661_v48 }
 0x214   : > { %6283 = vmatpush3.bf16.msra.mxu1 %v7665_v49 }
 0x215   : > { %6313 = vmatprep.subr.bf16.mxu1 %v7578_v5 }
 0x217   : > { %1230 = vmatmul.mubr.bf16.vlgmr.msra.gmra.mxu1 %v7215_v34 }
 0x218   : > { %6314 = vmatpush3.bf16.msra.mxu1 %v7583_v9  ;;  %1237 = vmatprep.mubr.bf16.mxu1 %v7218_v36 }
 0x219   : > { %6315 = vmatprep.subr.bf16.mxu1 %v7585_v10 }
 0x21c   : > { %6316 = vmatpush3.bf16.msra.mxu1 %v7595_v15 }
 0x21d   : > { %6317 = vmatprep.subr.bf16.mxu1 %v7599_v16 }
 0x21f   : > { %1238 = vmatmul.mubr.bf16.gmra.mxu1 %v7220_v39 }
 0x220   : > { %6318 = vmatpush3.bf16.msra.mxu1 %v7607_v21  ;;  %1245 = vmatprep.mubr.bf16.mxu1 %v7221_v40  ;;  %v1489_v40 = vsel %vm791_vm0, %v5667_v2, 0 }
 0x221   : > { %6319 = vmatprep.subr.bf16.mxu1 %v7611_v22 }
 0x224   : > { %6320 = vmatpush3.bf16.msra.mxu1 %v7619_v27 }
 0x225   : > { %6321 = vmatprep.subr.bf16.mxu1 %v7624_v29 }
 0x227   : > { %1246 = vmatmul.mubr.bf16.gmra.mxu1 %v7223_v46 }
 0x228   : > { %6322 = vmatpush3.bf16.msra.mxu1 %v7633_v35  ;;  %1253 = vmatprep.mubr.bf16.mxu1 %v7224_v50 }
 0x229   : > { %6323 = vmatprep.subr.bf16.mxu1 %v7639_v38 }
 0x22c   : > { %6324 = vmatpush3.bf16.msra.mxu1 %v7645_v41 }
 0x22d   : > { %6325 = vmatprep.subr.bf16.mxu1 %v7651_v44 }
 0x22f   : > { %1254 = vmatmul.mubr.bf16.gmra.mxu1 %v7226_v52 }
 0x230   : > { %6326 = vmatpush3.bf16.msra.mxu1 %v7657_v47  ;;  %1437 = vmatprep.mubr.bf16.mxu1 %v7229_v53 }
 0x231   : > { %6327 = vmatprep.subr.bf16.mxu1 %v7661_v48 }
 0x234   : > { %6328 = vmatpush3.bf16.msra.mxu1 %v7665_v49 }
 0x237   : > { %1438 = vmatmul.mubr.bf16.vlgmr.msra.gmra.mxu1 %v7227_v55 }
 0x238   : > { %1445 = vmatprep.mubr.bf16.mxu1 %v7230_v56 }
 0x23f   : > { %1446 = vmatmul.mubr.bf16.gmra.mxu1 %v7232_v59 }
 0x240   : > { %1453 = vmatprep.mubr.bf16.mxu1 %v7233_v60 }
 0x247   : > { %1454 = vmatmul.mubr.bf16.gmra.mxu1 %v7235_v61 }
 0x248   : > { %1461 = vmatprep.mubr.bf16.mxu1 %v7236_v62 }
 0x24f   : > { %1462 = vmatmul.mubr.bf16.gmra.mxu1 %v7238_v63 }
 0x2b7   : > { %v6727_v4 = vpop.f32.mrf.mxu1 }
 0x2b8   : > { %v7890_v6 = vadd.f32 %v6727_v4, %v7777_v33 }
 0x2b9   : > { %v1109_v7 = vpop.f32.mrf.mxu1 }
 0x2ba   : > { %v7893_v8 = vadd.f32 %v1109_v7, %v7779_v37 }
 0x2bb   : > { %v6728_v11 = vpop.f32.mrf.mxu1 }
 0x2bc   : > { %v7896_v12 = vadd.f32 %v6728_v11, %v7781_v42 }
 0x2bd   : > { %v7898_v13 = vpop.f32.mrf.mxu1 }
 0x2c7   : > { %v6731_v14 = vpop.f32.mrf.mxu1 }
 0x2c8   : > { %v7901_v17 = vadd.f32 %v6731_v14, %v7787_v51 }
 0x2c9   : > { %v1125_v18 = vpop.f32.mrf.mxu1 }
 0x2ca   : > { %v7904_v19 = vadd.f32 %v1125_v18, %v7789_v54 }
 0x2cb   : > { %v6732_v33 = vpop.f32.mrf.mxu1 }
 0x2cc   : > { %v7907_v20 = vadd.f32 %v6732_v33, %v7791_v57 }
 0x2cd   : > { %v7909_v37 = vpop.f32.mrf.mxu1 }
 0x2d7   : > { %v6284_v23 = vpop.f32.mrf.mxu1 }
 0x2d9   : > { %v6285_v24 = vpop.f32.mrf.mxu1 }
 0x2da   : > { %v6286_v26 = vadd.f32 %v6285_v24, %v6284_v23 }
 0x2db   : > { %v6287_v42 = vpop.f32.mrf.mxu1 }
 0x2dd   : > { %v6288_v25 = vpop.f32.mrf.mxu1 }
 0x2de   : > { %v6289_v28 = vadd.f32 %v6288_v25, %v6287_v42 }
 0x2df   : > { %v6290_v30 = vpop.f32.mrf.mxu1 }
 0x2e0   : > { %v1262_v31 = vpack.c.bf16 %v6289_v28, %v6286_v26 }
 0x2e1   : > { %v6291_v51 = vpop.f32.mrf.mxu1 }
 0x2e2   : > { %6735 = vmatprep.mubr.msk.bf16.mxu0 %vm778_vm1, %v1262_v31  ;;  %v6292_v34 = vadd.f32 %v6291_v51, %v6290_v30 }
 0x2e3   : > { %v6293_v32 = vpop.f32.mrf.mxu1 }
 0x2e5   : > { %v6294_v54 = vpop.f32.mrf.mxu1 }
 0x2e6   : > { %v6295_v36 = vadd.f32 %v6294_v54, %v6293_v32 }
 0x2e7   : > { %v6296_v39 = vpop.f32.mrf.mxu1 }
 0x2e8   : > { %v1263_v57 = vpack.c.bf16 %v6295_v36, %v6292_v34 }
 0x2e9   : > { %v6297_v46 = vpop.f32.mrf.mxu1 }
 0x2ea   : > { %6736 = vmatmul.mubr.msk.bf16.vlgmr.msra.gmra.mxu0 %vm778_vm1, %v1263_v57  ;;  %v6298_v53 = vadd.f32 %v6297_v46, %v6296_v39 }
 0x2eb   : > { %v6299_v50 = vpop.f32.mrf.mxu1  ;;  %6744 = vmatpush3.bf16.msra.mxu0 %v1489_v40 }
 0x2ec   : > { %6358 = vmatprep.subr.bf16.mxu0 %v7578_v5 }
 0x2ed   : > { %v6300_v52 = vpop.f32.mrf.mxu1 }
 0x2ee   : > { %v6301_v55 = vadd.f32 %v6300_v52, %v6299_v50 }
 0x2ef   : > { %v6302_v56 = vpop.f32.mrf.mxu1 }
 0x2f0   : > { %v1264_v59 = vpack.c.bf16 %v6301_v55, %v6298_v53  ;;  %v7241_v55 = vld [vmem:[%s8964_s1 + $0x144] ss:$8 sps:$4 sm:$0xff]  }
 0x2f1   : > { %v6303_v60 = vpop.f32.mrf.mxu1 }
 0x2f2   : > { %6739 = vmatprep.mubr.msk.bf16.mxu0 %vm778_vm1, %v1264_v59  ;;  %v6304_v63 = vadd.f32 %v6303_v60, %v6302_v56  ;;  %v7239_v59 = vld [vmem:[%s8964_s1 + $0x140] ss:$8 sps:$4 sm:$0xff]   ;;  %v7242_v60 = vld [vmem:[%s8964_s1 + $0x154] ss:$8 sps:$4 sm:$0xff]  }
 0x2f3   : > { %v6305_v61 = vpop.f32.mrf.mxu1 }
 0x2f5   : > { %v6306_v62 = vpop.f32.mrf.mxu1 }
 0x2f6   : > { %v6307_v0 = vadd.f32 %v6306_v62, %v6305_v61  ;;  %v7244_v61 = vld [vmem:[%s8964_s1 + $0x150] ss:$8 sps:$4 sm:$0xff]   ;;  %v7245_v62 = vld [vmem:[%s8964_s1 + $0x164] ss:$8 sps:$4 sm:$0xff]  }
 0x2f7   : > { %v6329_v1 = vpop.f32.mrf.mxu1 }
 0x2f8   : > { %v1265_v2 = vpack.c.bf16 %v6307_v0, %v6304_v63  ;;  %v7247_v63 = vld [vmem:[%s8964_s1 + $0x160] ss:$8 sps:$4 sm:$0xff]   ;;  %v7248_v0 = vld [vmem:[%s8964_s1 + $0x174] ss:$8 sps:$4 sm:$0xff]  }
 0x2f9   : > { %v6330_v4 = vpop.f32.mrf.mxu1 }
 0x2fa   : > { %6740 = vmatmul.mubr.msk.bf16.gmra.mxu0 %vm778_vm1, %v1265_v2  ;;  %v6331_v14 = vadd.f32 %v6330_v4, %v6329_v1  ;;  %v7250_v1 = vld [vmem:[%s8964_s1 + $0x170] ss:$8 sps:$4 sm:$0xff]   ;;  %v7253_v2 = vld [vmem:[%s8964_s1 + $0x184] ss:$8 sps:$4 sm:$0xff]   ;;  %v7251_v4 = vld [vmem:[%s8964_s1 + $0x180] ss:$8 sps:$4 sm:$0xff]  }
 0x2fb   : > { %v6332_v7 = vpop.f32.mrf.mxu1 }
 0x2fd   : > { %v6333_v11 = vpop.f32.mrf.mxu1 }
 0x2fe   : > { %v6334_v18 = vadd.f32 %v6333_v11, %v6332_v7  ;;  %v7254_v7 = vld [vmem:[%s8964_s1 + $0x194] ss:$8 sps:$4 sm:$0xff]   ;;  %v7256_v11 = vld [vmem:[%s8964_s1 + $0x190] ss:$8 sps:$4 sm:$0xff]  }
 0x2ff   : > { %v6335_v33 = vpop.f32.mrf.mxu1 }
 0x300   : > { %v1470_v23 = vpack.c.bf16 %v6334_v18, %v6331_v14  ;;  %v7257_v14 = vld [vmem:[%s8964_s1 + $0x1a4] ss:$8 sps:$4 sm:$0xff]   ;;  %v7259_v18 = vld [vmem:[%s8964_s1 + $0x1a0] ss:$8 sps:$4 sm:$0xff]  }
 0x301   : > { %v6336_v24 = vpop.f32.mrf.mxu1 }
 0x302   : > { %6745 = vmatprep.mubr.msk.bf16.mxu0 %vm778_vm1, %v1470_v23  ;;  %v6337_v26 = vadd.f32 %v6336_v24, %v6335_v33  ;;  %v7260_v33 = vld [vmem:[%s8964_s1 + $0x1b4] ss:$8 sps:$4 sm:$0xff]   ;;  %v7262_v23 = vld [vmem:[%s8964_s1 + $0x1b0] ss:$8 sps:$4 sm:$0xff]   ;;  %v5688_v24 = vld [vmem:[%s8965_s2 + $0xa] sm:$0x3] }
 0x303   : > { %v6338_v42 = vpop.f32.mrf.mxu1  ;;  %7164 = vmatprep.subr.msk.bf16.mxu1 %vm791_vm0, %v5688_v24 }
 0x305   : > { %v6339_v25 = vpop.f32.mrf.mxu1 }
 0x306   : > { %v6340_v28 = vadd.f32 %v6339_v25, %v6338_v42  ;;  %v1697_v42 = vsel %vm791_vm0, %v5688_v24, 0  ;;  %v5709_v25 = vld [vmem:[%s8965_s2 + $0xc] sm:$0x3] }
 0x307   : > { %v6341_v30 = vpop.f32.mrf.mxu1  ;;  %6754 = vmatpush3.bf16.msra.mxu1 %v1697_v42 }
 0x308   : > { %v1471_v31 = vpack.c.bf16 %v6340_v28, %v6337_v26  ;;  %7165 = vmatprep.subr.msk.bf16.mxu1 %vm791_vm0, %v5709_v25 }
 0x309   : > { %v6342_v51 = vpop.f32.mrf.mxu1 }
 0x30a   : > { %6746 = vmatmul.mubr.msk.bf16.vlgmr.msra.gmra.mxu0 %vm778_vm1, %v1471_v31  ;;  %v6343_v54 = vadd.f32 %v6342_v51, %v6341_v30 }
 0x30b   : > { %6359 = vmatpush3.bf16.msra.mxu0 %v7583_v9  ;;  %v6344_v32 = vpop.f32.mrf.mxu1 }
 0x30c   : > { %6360 = vmatprep.subr.bf16.mxu0 %v7585_v10 }
 0x30d   : > { %v6345_v34 = vpop.f32.mrf.mxu1 }
 0x30e   : > { %v6346_v36 = vadd.f32 %v6345_v34, %v6344_v32 }
 0x30f   : > { %6361 = vmatpush3.bf16.msra.mxu0 %v7595_v15  ;;  %v6347_v39 = vpop.f32.mrf.mxu1 }
 0x310   : > { %v1472_v57 = vpack.c.bf16 %v6346_v36, %v6343_v54  ;;  %6362 = vmatprep.subr.bf16.mxu0 %v7599_v16 }
 0x311   : > { %v6348_v40 = vpop.f32.mrf.mxu1 }
 0x312   : > { %6749 = vmatprep.mubr.msk.bf16.mxu0 %vm778_vm1, %v1472_v57  ;;  %v6349_v50 = vadd.f32 %v6348_v40, %v6347_v39 }
 0x313   : > { %6363 = vmatpush3.bf16.msra.mxu0 %v7607_v21  ;;  %v6350_v46 = vpop.f32.mrf.mxu1 }
 0x314   : > { %6364 = vmatprep.subr.bf16.mxu0 %v7611_v22 }
 0x315   : > { %v6351_v52 = vpop.f32.mrf.mxu1 }
 0x316   : > { %v6352_v53 = vadd.f32 %v6351_v52, %v6350_v46 }
 0x317   : > { %6365 = vmatpush3.bf16.msra.mxu0 %v7619_v27 }
 0x318   : > { %v1473_v56 = vpack.c.bf16 %v6352_v53, %v6349_v50  ;;  %6366 = vmatprep.subr.bf16.mxu0 %v7624_v29 }
 0x31a   : > { %6750 = vmatmul.mubr.msk.bf16.gmra.mxu0 %vm778_vm1, %v1473_v56 }
 0x31b   : > { %6367 = vmatpush3.bf16.msra.mxu0 %v7633_v35  ;;  %1645 = vmatprep.mubr.bf16.mxu0 %v7241_v55 }
 0x31c   : > { %6368 = vmatprep.subr.bf16.mxu0 %v7639_v38 }
 0x31f   : > { %6369 = vmatpush3.bf16.msra.mxu0 %v7645_v41 }
 0x320   : > { %6370 = vmatprep.subr.bf16.mxu0 %v7651_v44 }
 0x323   : > { %6371 = vmatpush3.bf16.msra.mxu0 %v7657_v47 }
 0x324   : > { %6372 = vmatprep.subr.bf16.mxu0 %v7661_v48 }
 0x327   : > { %6373 = vmatpush3.bf16.msra.mxu0 %v7665_v49 }
 0x328   : > { %6403 = vmatprep.subr.bf16.mxu0 %v7578_v5 }
 0x32a   : > { %1646 = vmatmul.mubr.bf16.vlgmr.msra.gmra.mxu0 %v7239_v59 }
 0x32b   : > { %6404 = vmatpush3.bf16.msra.mxu0 %v7583_v9  ;;  %1653 = vmatprep.mubr.bf16.mxu0 %v7242_v60 }
 0x32c   : > { %6405 = vmatprep.subr.bf16.mxu0 %v7585_v10 }
 0x32f   : > { %6406 = vmatpush3.bf16.msra.mxu0 %v7595_v15 }
 0x330   : > { %6407 = vmatprep.subr.bf16.mxu0 %v7599_v16 }
 0x332   : > { %1654 = vmatmul.mubr.bf16.gmra.mxu0 %v7244_v61 }
 0x333   : > { %6408 = vmatpush3.bf16.msra.mxu0 %v7607_v21  ;;  %1661 = vmatprep.mubr.bf16.mxu0 %v7245_v62 }
 0x334   : > { %6409 = vmatprep.subr.bf16.mxu0 %v7611_v22 }
 0x337   : > { %6410 = vmatpush3.bf16.msra.mxu0 %v7619_v27 }
 0x338   : > { %6411 = vmatprep.subr.bf16.mxu0 %v7624_v29 }
 0x33a   : > { %1662 = vmatmul.mubr.bf16.gmra.mxu0 %v7247_v63 }
 0x33b   : > { %6412 = vmatpush3.bf16.msra.mxu0 %v7633_v35  ;;  %1669 = vmatprep.mubr.bf16.mxu0 %v7248_v0 }
 0x33c   : > { %6413 = vmatprep.subr.bf16.mxu0 %v7639_v38 }
 0x33f   : > { %6414 = vmatpush3.bf16.msra.mxu0 %v7645_v41 }
 0x340   : > { %6415 = vmatprep.subr.bf16.mxu0 %v7651_v44 }
 0x342   : > { %1670 = vmatmul.mubr.bf16.gmra.mxu0 %v7250_v1 }
 0x343   : > { %6416 = vmatpush3.bf16.msra.mxu0 %v7657_v47  ;;  %1853 = vmatprep.mubr.bf16.mxu0 %v7253_v2 }
 0x344   : > { %6417 = vmatprep.subr.bf16.mxu0 %v7661_v48 }
 0x347   : > { %6418 = vmatpush3.bf16.msra.mxu0 %v7665_v49 }
 0x34a   : > { %1854 = vmatmul.mubr.bf16.vlgmr.msra.gmra.mxu0 %v7251_v4 }
 0x34b   : > { %1861 = vmatprep.mubr.bf16.mxu0 %v7254_v7 }
 0x352   : > { %1862 = vmatmul.mubr.bf16.gmra.mxu0 %v7256_v11 }
 0x353   : > { %1869 = vmatprep.mubr.bf16.mxu0 %v7257_v14 }
 0x35a   : > { %1870 = vmatmul.mubr.bf16.gmra.mxu0 %v7259_v18 }
 0x35b   : > { %1877 = vmatprep.mubr.bf16.mxu0 %v7260_v33 }
 0x362   : > { %1878 = vmatmul.mubr.bf16.gmra.mxu0 %v7262_v23 }
 0x3aa   : > { %v6737_v26 = vpop.f32.mrf.mxu0 }
 0x3ab   : > { %v1350_v28 = vadd.f32 %v6737_v26, %v7890_v6 }
 0x3ac   : > { %v1317_v30 = vpop.f32.mrf.mxu0 }
 0x3ad   : > { %v1348_v31 = vadd.f32 %v1317_v30, %v7893_v8  ;;  %v1905_v30 = vsel %vm791_vm0, %v5709_v25, 0 }
 0x3ae   : > { %v6738_v51 = vpop.f32.mrf.mxu0 }
 0x3af   : > { %v1351_v32 = vadd.f32 %v6738_v51, %v7896_v12 }
 0x3b0   : > { %v8012_v54 = vpop.f32.mrf.mxu0 }
 0x3ba   : > { %v6741_v34 = vpop.f32.mrf.mxu0 }
 0x3bb   : > { %v1354_v36 = vadd.f32 %v6741_v34, %v7901_v17 }
 0x3bc   : > { %v1333_v39 = vpop.f32.mrf.mxu0 }
 0x3bd   : > { %v1352_v57 = vadd.f32 %v1333_v39, %v7904_v19 }
 0x3be   : > { %v6742_v40 = vpop.f32.mrf.mxu0 }
 0x3bf   : > { %v1355_v46 = vadd.f32 %v6742_v40, %v7907_v20 }
 0x3c0   : > { %v8017_v50 = vpop.f32.mrf.mxu0 }
 0x3ca   : > { %v6747_v6 = vpop.f32.mrf.mxu0 }
 0x3cb   : > { %v8019_v52 = vadd.f32 %v6747_v6, %v1350_v28 }
 0x3cc   : > { %v1525_v8 = vpop.f32.mrf.mxu0 }
 0x3cd   : > { %v8021_v53 = vadd.f32 %v1525_v8, %v1348_v31 }
 0x3ce   : > { %v6748_v12 = vpop.f32.mrf.mxu0 }
 0x3cf   : > { %v8023_v55 = vadd.f32 %v6748_v12, %v1351_v32 }
 0x3d0   : > { %v8025_v56 = vpop.f32.mrf.mxu0 }
 0x3da   : > { %v6751_v17 = vpop.f32.mrf.mxu0 }
 0x3db   : > { %v8027_v59 = vadd.f32 %v6751_v17, %v1354_v36 }
 0x3dc   : > { %v1541_v19 = vpop.f32.mrf.mxu0 }
 0x3dd   : > { %v8029_v60 = vadd.f32 %v1541_v19, %v1352_v57 }
 0x3de   : > { %v6752_v20 = vpop.f32.mrf.mxu0 }
 0x3df   : > { %v8031_v61 = vadd.f32 %v6752_v20, %v1355_v46 }
 0x3e0   : > { %v8033_v62 = vpop.f32.mrf.mxu0 }
 0x3ea   : > { %v6374_v63 = vpop.f32.mrf.mxu0 }
 0x3ec   : > { %v6375_v0 = vpop.f32.mrf.mxu0 }
 0x3ed   : > { %v6376_v4 = vadd.f32 %v6375_v0, %v6374_v63 }
 0x3ee   : > { %v6377_v1 = vpop.f32.mrf.mxu0 }
 0x3f0   : > { %v6378_v2 = vpop.f32.mrf.mxu0 }
 0x3f1   : > { %v6379_v7 = vadd.f32 %v6378_v2, %v6377_v1 }
 0x3f2   : > { %v6380_v11 = vpop.f32.mrf.mxu0 }
 0x3f3   : > { %v1678_v14 = vpack.c.bf16 %v6379_v7, %v6376_v4 }
 0x3f4   : > { %v6381_v18 = vpop.f32.mrf.mxu0 }
 0x3f5   : > { %6755 = vmatprep.mubr.msk.bf16.mxu1 %vm778_vm1, %v1678_v14  ;;  %v6382_v24 = vadd.f32 %v6381_v18, %v6380_v11 }
 0x3f6   : > { %v6383_v33 = vpop.f32.mrf.mxu0 }
 0x3f8   : > { %v6384_v23 = vpop.f32.mrf.mxu0 }
 0x3f9   : > { %v6385_v42 = vadd.f32 %v6384_v23, %v6383_v33 }
 0x3fa   : > { %v6386_v26 = vpop.f32.mrf.mxu0 }
 0x3fb   : > { %v1679_v28 = vpack.c.bf16 %v6385_v42, %v6382_v24 }
 0x3fc   : > { %v6387_v31 = vpop.f32.mrf.mxu0 }
 0x3fd   : > { %6756 = vmatmul.mubr.msk.bf16.vlgmr.msra.gmra.mxu1 %vm778_vm1, %v1679_v28  ;;  %v6388_v34 = vadd.f32 %v6387_v31, %v6386_v26 }
 0x3fe   : > { %v6389_v51 = vpop.f32.mrf.mxu0  ;;  %6764 = vmatpush3.bf16.msra.mxu1 %v1905_v30 }
 0x3ff   : > { %6448 = vmatprep.subr.bf16.mxu1 %v7578_v5 }
 0x400   : > { %v6390_v32 = vpop.f32.mrf.mxu0 }
 0x401   : > { %v6391_v36 = vadd.f32 %v6390_v32, %v6389_v51 }
 0x402   : > { %v6392_v39 = vpop.f32.mrf.mxu0 }
 0x403   : > { %v1680_v57 = vpack.c.bf16 %v6391_v36, %v6388_v34 }
 0x404   : > { %v6393_v40 = vpop.f32.mrf.mxu0 }
 0x405   : > { %6759 = vmatprep.mubr.msk.bf16.mxu1 %vm778_vm1, %v1680_v57  ;;  %v6394_v8 = vadd.f32 %v6393_v40, %v6392_v39 }
 0x406   : > { %v6395_v46 = vpop.f32.mrf.mxu0 }
 0x408   : > { %v6396_v6 = vpop.f32.mrf.mxu0 }
 0x409   : > { %v6397_v12 = vadd.f32 %v6396_v6, %v6395_v46  ;;  %v7265_v46 = vld [vmem:[%s8964_s1 + $0x1c4] ss:$8 sps:$4 sm:$0xff]  }
 0x40a   : > { %v6419_v25 = vpop.f32.mrf.mxu0 }
 0x40b   : > { %v1681_v17 = vpack.c.bf16 %v6397_v12, %v6394_v8  ;;  %v7263_v8 = vld [vmem:[%s8964_s1 + $0x1c0] ss:$8 sps:$4 sm:$0xff]   ;;  %v7266_v12 = vld [vmem:[%s8964_s1 + $0x1d4] ss:$8 sps:$4 sm:$0xff]  }
 0x40c   : > { %v6420_v19 = vpop.f32.mrf.mxu0 }
 0x40d   : > { %6760 = vmatmul.mubr.msk.bf16.gmra.mxu1 %vm778_vm1, %v1681_v17  ;;  %v6421_v0 = vadd.f32 %v6420_v19, %v6419_v25  ;;  %v7268_v25 = vld [vmem:[%s8964_s1 + $0x1d0] ss:$8 sps:$4 sm:$0xff]   ;;  %v7269_v17 = vld [vmem:[%s8964_s1 + $0x1e4] ss:$8 sps:$4 sm:$0xff]  }
 0x40e   : > { %v6422_v20 = vpop.f32.mrf.mxu0 }
 0x410   : > { %v6423_v63 = vpop.f32.mrf.mxu0 }
 0x411   : > { %v6424_v1 = vadd.f32 %v6423_v63, %v6422_v20 }
 0x412   : > { %v6425_v2 = vpop.f32.mrf.mxu0 }
 0x413   : > { %v1886_v4 = vpack.c.bf16 %v6424_v1, %v6421_v0 }
 0x414   : > { %v6426_v7 = vpop.f32.mrf.mxu0 }
 0x415   : > { %6765 = vmatprep.mubr.msk.bf16.mxu1 %vm778_vm1, %v1886_v4  ;;  %v6427_v18 = vadd.f32 %v6426_v7, %v6425_v2 }
 0x416   : > { %v6428_v11 = vpop.f32.mrf.mxu0 }
 0x418   : > { %v6429_v14 = vpop.f32.mrf.mxu0 }
 0x419   : > { %v6430_v33 = vadd.f32 %v6429_v14, %v6428_v11 }
 0x41a   : > { %v6431_v23 = vpop.f32.mrf.mxu0 }
 0x41b   : > { %v1887_v24 = vpack.c.bf16 %v6430_v33, %v6427_v18 }
 0x41c   : > { %v6432_v42 = vpop.f32.mrf.mxu0 }
 0x41d   : > { %6766 = vmatmul.mubr.msk.bf16.vlgmr.msra.gmra.mxu1 %vm778_vm1, %v1887_v24  ;;  %v6433_v28 = vadd.f32 %v6432_v42, %v6431_v23 }
 0x41e   : > { %6449 = vmatpush3.bf16.msra.mxu1 %v7583_v9  ;;  %v6434_v26 = vpop.f32.mrf.mxu0 }
 0x41f   : > { %6450 = vmatprep.subr.bf16.mxu1 %v7585_v10 }
 0x420   : > { %v6435_v30 = vpop.f32.mrf.mxu0 }
 0x421   : > { %v6436_v31 = vadd.f32 %v6435_v30, %v6434_v26 }
 0x422   : > { %6451 = vmatpush3.bf16.msra.mxu1 %v7595_v15  ;;  %v6437_v51 = vpop.f32.mrf.mxu0 }
 0x423   : > { %v1888_v32 = vpack.c.bf16 %v6436_v31, %v6433_v28  ;;  %6452 = vmatprep.subr.bf16.mxu1 %v7599_v16 }
 0x424   : > { %v6438_v34 = vpop.f32.mrf.mxu0 }
 0x425   : > { %6769 = vmatprep.mubr.msk.bf16.mxu1 %vm778_vm1, %v1888_v32  ;;  %v6439_v39 = vadd.f32 %v6438_v34, %v6437_v51 }
 0x426   : > { %6453 = vmatpush3.bf16.msra.mxu1 %v7607_v21  ;;  %v6440_v36 = vpop.f32.mrf.mxu0 }
 0x427   : > { %6454 = vmatprep.subr.bf16.mxu1 %v7611_v22 }
 0x428   : > { %v6441_v57 = vpop.f32.mrf.mxu0 }
 0x429   : > { %v6442_v40 = vadd.f32 %v6441_v57, %v6440_v36 }
 0x42a   : > { %6455 = vmatpush3.bf16.msra.mxu1 %v7619_v27 }
 0x42b   : > { %v1889_v6 = vpack.c.bf16 %v6442_v40, %v6439_v39  ;;  %6456 = vmatprep.subr.bf16.mxu1 %v7624_v29 }
 0x42d   : > { %6770 = vmatmul.mubr.msk.bf16.gmra.mxu1 %vm778_vm1, %v1889_v6 }
 0x42e   : > { %6457 = vmatpush3.bf16.msra.mxu1 %v7633_v35  ;;  %2061 = vmatprep.mubr.bf16.mxu1 %v7265_v46 }
 0x42f   : > { %6458 = vmatprep.subr.bf16.mxu1 %v7639_v38 }
 0x432   : > { %6459 = vmatpush3.bf16.msra.mxu1 %v7645_v41 }
 0x433   : > { %6460 = vmatprep.subr.bf16.mxu1 %v7651_v44 }
 0x436   : > { %6461 = vmatpush3.bf16.msra.mxu1 %v7657_v47 }
 0x437   : > { %6462 = vmatprep.subr.bf16.mxu1 %v7661_v48 }
 0x43a   : > { %6463 = vmatpush3.bf16.msra.mxu1 %v7665_v49 }
 0x43b   : > { %6493 = vmatprep.subr.bf16.mxu1 %v7578_v5  ;;  %v7271_v5 = vld [vmem:[%s8964_s1 + $0x1e0] ss:$8 sps:$4 sm:$0xff]  }
 0x43d   : > { %2062 = vmatmul.mubr.bf16.vlgmr.msra.gmra.mxu1 %v7263_v8 }
 0x43e   : > { %6494 = vmatpush3.bf16.msra.mxu1 %v7583_v9  ;;  %2069 = vmatprep.mubr.bf16.mxu1 %v7266_v12  ;;  %v7272_v9 = vld [vmem:[%s8964_s1 + $0x1f4] ss:$8 sps:$4 sm:$0xff]  }
 0x43f   : > { %6495 = vmatprep.subr.bf16.mxu1 %v7585_v10  ;;  %v7274_v10 = vld [vmem:[%s8964_s1 + $0x1f0] ss:$8 sps:$4 sm:$0xff]  }
 0x442   : > { %6496 = vmatpush3.bf16.msra.mxu1 %v7595_v15  ;;  %v7277_v15 = vld [vmem:[%s8964_s1 + $0x204] ss:$8 sps:$4 sm:$0xff]  }
 0x443   : > { %6497 = vmatprep.subr.bf16.mxu1 %v7599_v16  ;;  %v7275_v16 = vld [vmem:[%s8964_s1 + $0x200] ss:$8 sps:$4 sm:$0xff]  }
 0x445   : > { %2070 = vmatmul.mubr.bf16.gmra.mxu1 %v7268_v25 }
 0x446   : > { %6498 = vmatpush3.bf16.msra.mxu1 %v7607_v21  ;;  %2077 = vmatprep.mubr.bf16.mxu1 %v7269_v17  ;;  %v7278_v21 = vld [vmem:[%s8964_s1 + $0x214] ss:$8 sps:$4 sm:$0xff]  }
 0x447   : > { %6499 = vmatprep.subr.bf16.mxu1 %v7611_v22  ;;  %v7280_v22 = vld [vmem:[%s8964_s1 + $0x210] ss:$8 sps:$4 sm:$0xff]  }
 0x44a   : > { %6500 = vmatpush3.bf16.msra.mxu1 %v7619_v27  ;;  %v7281_v27 = vld [vmem:[%s8964_s1 + $0x224] ss:$8 sps:$4 sm:$0xff]  }
 0x44b   : > { %6501 = vmatprep.subr.bf16.mxu1 %v7624_v29  ;;  %v7283_v29 = vld [vmem:[%s8964_s1 + $0x220] ss:$8 sps:$4 sm:$0xff]  }
 0x44d   : > { %2078 = vmatmul.mubr.bf16.gmra.mxu1 %v7271_v5 }
 0x44e   : > { %6502 = vmatpush3.bf16.msra.mxu1 %v7633_v35  ;;  %2085 = vmatprep.mubr.bf16.mxu1 %v7272_v9  ;;  %v7284_v35 = vld [vmem:[%s8964_s1 + $0x234] ss:$8 sps:$4 sm:$0xff]  }
 0x44f   : > { %6503 = vmatprep.subr.bf16.mxu1 %v7639_v38  ;;  %v7286_v38 = vld [vmem:[%s8964_s1 + $0x230] ss:$8 sps:$4 sm:$0xff]  }
 0x452   : > { %6504 = vmatpush3.bf16.msra.mxu1 %v7645_v41  ;;  %v5730_v41 = vld [vmem:[%s8965_s2 + $0xe] sm:$0x3] }
 0x453   : > { %6505 = vmatprep.subr.bf16.mxu1 %v7651_v44  ;;  %7166 = vmatprep.subr.msk.bf16.mxu0 %vm791_vm0, %v5730_v41  ;;  %v2113_v44 = vsel %vm791_vm0, %v5730_v41, 0 }
 0x454   : > { %6774 = vmatpush3.bf16.msra.mxu0 %v2113_v44 }
 0x455   : > { %2086 = vmatmul.mubr.bf16.gmra.mxu1 %v7274_v10 }
 0x456   : > { %6506 = vmatpush3.bf16.msra.mxu1 %v7657_v47  ;;  %2269 = vmatprep.mubr.bf16.mxu1 %v7277_v15  ;;  %v5751_v47 = vld [vmem:[%s8965_s2 + $0x10] sm:$0x3] }
 0x457   : > { %6507 = vmatprep.subr.bf16.mxu1 %v7661_v48  ;;  %7167 = vmatprep.subr.msk.bf16.mxu0 %vm791_vm0, %v5751_v47  ;;  %v2321_v15 = vsel %vm791_vm0, %v5751_v47, 0 }
 0x45a   : > { %6508 = vmatpush3.bf16.msra.mxu1 %v7665_v49 }
 0x45d   : > { %2270 = vmatmul.mubr.bf16.vlgmr.msra.gmra.mxu1 %v7275_v16 }
 0x45e   : > { %2277 = vmatprep.mubr.bf16.mxu1 %v7278_v21 }
 0x465   : > { %2278 = vmatmul.mubr.bf16.gmra.mxu1 %v7280_v22 }
 0x466   : > { %2285 = vmatprep.mubr.bf16.mxu1 %v7281_v27 }
 0x46d   : > { %2286 = vmatmul.mubr.bf16.gmra.mxu1 %v7283_v29 }
 0x46e   : > { %2293 = vmatprep.mubr.bf16.mxu1 %v7284_v35 }
 0x475   : > { %2294 = vmatmul.mubr.bf16.gmra.mxu1 %v7286_v38 }
 0x4bd   : > { %v6757_v48 = vpop.f32.mrf.mxu1 }
 0x4be   : > { %v1766_v49 = vadd.f32 %v6757_v48, %v8019_v52 }
 0x4bf   : > { %v1733_v19 = vpop.f32.mrf.mxu1 }
 0x4c0   : > { %v1764_v20 = vadd.f32 %v1733_v19, %v8021_v53 }
 0x4c1   : > { %v6758_v63 = vpop.f32.mrf.mxu1 }
 0x4c2   : > { %v1767_v0 = vadd.f32 %v6758_v63, %v8023_v55 }
 0x4c3   : > { %v8136_v1 = vpop.f32.mrf.mxu1 }
 0x4cd   : > { %v6761_v2 = vpop.f32.mrf.mxu1 }
 0x4ce   : > { %v1770_v4 = vadd.f32 %v6761_v2, %v8027_v59 }
 0x4cf   : > { %v1749_v7 = vpop.f32.mrf.mxu1 }
 0x4d0   : > { %v1768_v11 = vadd.f32 %v1749_v7, %v8029_v60 }
 0x4d1   : > { %v6762_v14 = vpop.f32.mrf.mxu1 }
 0x4d2   : > { %v1771_v18 = vadd.f32 %v6762_v14, %v8031_v61 }
 0x4d3   : > { %v8141_v33 = vpop.f32.mrf.mxu1 }
 0x4dd   : > { %v6767_v52 = vpop.f32.mrf.mxu1 }
 0x4de   : > { %v8143_v23 = vadd.f32 %v6767_v52, %v1766_v49 }
 0x4df   : > { %v1941_v53 = vpop.f32.mrf.mxu1 }
 0x4e0   : > { %v8145_v24 = vadd.f32 %v1941_v53, %v1764_v20 }
 0x4e1   : > { %v6768_v55 = vpop.f32.mrf.mxu1 }
 0x4e2   : > { %v8147_v42 = vadd.f32 %v6768_v55, %v1767_v0 }
 0x4e3   : > { %v8149_v26 = vpop.f32.mrf.mxu1 }
 0x4ed   : > { %v6771_v59 = vpop.f32.mrf.mxu1 }
 0x4ee   : > { %v8151_v28 = vadd.f32 %v6771_v59, %v1770_v4 }
 0x4ef   : > { %v1957_v60 = vpop.f32.mrf.mxu1 }
 0x4f0   : > { %v8153_v30 = vadd.f32 %v1957_v60, %v1768_v11 }
 0x4f1   : > { %v6772_v61 = vpop.f32.mrf.mxu1 }
 0x4f2   : > { %v8155_v31 = vadd.f32 %v6772_v61, %v1771_v18 }
 0x4f3   : > { %v8157_v51 = vpop.f32.mrf.mxu1 }
 0x4fd   : > { %v6464_v32 = vpop.f32.mrf.mxu1 }
 0x4ff   : > { %v6465_v34 = vpop.f32.mrf.mxu1 }
 0x500   : > { %v6466_v57 = vadd.f32 %v6465_v34, %v6464_v32 }
 0x501   : > { %v6467_v36 = vpop.f32.mrf.mxu1 }
 0x503   : > { %v6468_v39 = vpop.f32.mrf.mxu1 }
 0x504   : > { %v6469_v40 = vadd.f32 %v6468_v39, %v6467_v36 }
 0x505   : > { %v6470_v46 = vpop.f32.mrf.mxu1 }
 0x506   : > { %v2094_v6 = vpack.c.bf16 %v6469_v40, %v6466_v57 }
 0x507   : > { %v6471_v8 = vpop.f32.mrf.mxu1 }
 0x508   : > { %6775 = vmatprep.mubr.msk.bf16.mxu0 %vm778_vm1, %v2094_v6  ;;  %v6472_v17 = vadd.f32 %v6471_v8, %v6470_v46 }
 0x509   : > { %v6473_v12 = vpop.f32.mrf.mxu1 }
 0x50b   : > { %v6474_v25 = vpop.f32.mrf.mxu1 }
 0x50c   : > { %v6475_v5 = vadd.f32 %v6474_v25, %v6473_v12 }
 0x50d   : > { %v6476_v9 = vpop.f32.mrf.mxu1 }
 0x50e   : > { %v2095_v10 = vpack.c.bf16 %v6475_v5, %v6472_v17 }
 0x50f   : > { %v6477_v16 = vpop.f32.mrf.mxu1 }
 0x510   : > { %6776 = vmatmul.mubr.msk.bf16.vlgmr.msra.gmra.mxu0 %vm778_vm1, %v2095_v10  ;;  %v6478_v27 = vadd.f32 %v6477_v16, %v6476_v9  ;;  %v7470_v9 = vmov 0.0  }
 0x511   : > { %v6479_v21 = vpop.f32.mrf.mxu1  ;;  %6784 = vmatpush3.bf16.msra.mxu0 %v2321_v15  ;;  %6793 = vmatprep.subr.bf16.mxu1 %v7470_v9 }
 0x512   : > { %6805 = vmatprep.subr.bf16.mxu0 %v7470_v9  ;;  %6801 = vmatprep.mubr.msk.bf16.mxu1 %vm7471_vm2, %v7470_v9 }
 0x513   : > { %v6480_v22 = vpop.f32.mrf.mxu1 }
 0x514   : > { %v6481_v29 = vadd.f32 %v6480_v22, %v6479_v21 }
 0x515   : > { %v6482_v35 = vpop.f32.mrf.mxu1 }
 0x516   : > { %v2096_v38 = vpack.c.bf16 %v6481_v29, %v6478_v27 }
 0x517   : > { %v6483_v41 = vpop.f32.mrf.mxu1 }
 0x518   : > { %6779 = vmatprep.mubr.msk.bf16.mxu0 %vm778_vm1, %v2096_v38  ;;  %v6484_v49 = vadd.f32 %v6483_v41, %v6482_v35 }
 0x519   : > { %v6485_v44 = vpop.f32.mrf.mxu1 }
 0x51b   : > { %v6486_v48 = vpop.f32.mrf.mxu1 }
 0x51c   : > { %v6487_v19 = vadd.f32 %v6486_v48, %v6485_v44  ;;  %v5756_v48 = vld [vmem:[%s8966_s3] ss:$0 sm:$0xff] }
 0x51d   : > { %v6509_v20 = vpop.f32.mrf.mxu1 }
 0x51e   : > { %v2097_v63 = vpack.c.bf16 %v6487_v19, %v6484_v49 }
 0x51f   : > { %v6510_v47 = vpop.f32.mrf.mxu1 }
 0x520   : > { %6780 = vmatmul.mubr.msk.bf16.gmra.mxu0 %vm778_vm1, %v2097_v63  ;;  %v6511_v4 = vadd.f32 %v6510_v47, %v6509_v20 }
 0x521   : > { %v6512_v0 = vpop.f32.mrf.mxu1 }
 0x523   : > { %v6513_v2 = vpop.f32.mrf.mxu1 }
 0x524   : > { %v6514_v7 = vadd.f32 %v6513_v2, %v6512_v0  ;;  %v929_v2 = vadd.f32 %v7887_v3, %v7793_v58 }
 0x525   : > { %v6515_v11 = vpop.f32.mrf.mxu1 }
 0x526   : > { %v2302_v14 = vpack.c.bf16 %v6514_v7, %v6511_v4 }
 0x527   : > { %v6516_v18 = vpop.f32.mrf.mxu1 }
 0x528   : > { %6785 = vmatprep.mubr.msk.bf16.mxu0 %vm778_vm1, %v2302_v14  ;;  %v6517_v55 = vadd.f32 %v6516_v18, %v6515_v11  ;;  %v913_v14 = vadd.f32 %v7785_v45, %v7783_v43 }
 0x529   : > { %v6518_v52 = vpop.f32.mrf.mxu1 }
 0x52b   : > { %v6519_v53 = vpop.f32.mrf.mxu1 }
 0x52c   : > { %v6520_v59 = vadd.f32 %v6519_v53, %v6518_v52 }
 0x52d   : > { %v6521_v60 = vpop.f32.mrf.mxu1 }
 0x52e   : > { %v2303_v61 = vpack.c.bf16 %v6520_v59, %v6517_v55 }
 0x52f   : > { %v6522_v32 = vpop.f32.mrf.mxu1 }
 0x530   : > { %6786 = vmatmul.mubr.msk.bf16.vlgmr.msra.gmra.mxu0 %vm778_vm1, %v2303_v61  ;;  %v6523_v39 = vadd.f32 %v6522_v32, %v6521_v60 }
 0x531   : > { %v6524_v34 = vpop.f32.mrf.mxu1 }
 0x533   : > { %v6525_v36 = vpop.f32.mrf.mxu1 }
 0x534   : > { %v6526_v57 = vadd.f32 %v6525_v36, %v6524_v34 }
 0x535   : > { %v6527_v40 = vpop.f32.mrf.mxu1 }
 0x536   : > { %v2304_v46 = vpack.c.bf16 %v6526_v57, %v6523_v39 }
 0x537   : > { %v6528_v6 = vpop.f32.mrf.mxu1 }
 0x538   : > { %6789 = vmatprep.mubr.msk.bf16.mxu0 %vm778_vm1, %v2304_v46  ;;  %v6529_v25 = vadd.f32 %v6528_v6, %v6527_v40 }
 0x539   : > { %v6530_v8 = vpop.f32.mrf.mxu1 }
 0x53b   : > { %v6531_v12 = vpop.f32.mrf.mxu1 }
 0x53c   : > { %v6532_v17 = vadd.f32 %v6531_v12, %v6530_v8 }
 0x53e   : > { %v2305_v5 = vpack.c.bf16 %v6532_v17, %v6529_v25 }
 0x540   : > { %6790 = vmatmul.mubr.msk.bf16.gmra.mxu0 %vm778_vm1, %v2305_v5 }
 0x541   : > { %6813 = vmatprep.mubr.msk.bf16.mxu0 %vm7471_vm2, %v7470_v9 }
 0x5d0   : > { %v6777_v10 = vpop.f32.mrf.mxu0 }
 0x5d1   : > { %v2182_v38 = vadd.f32 %v6777_v10, %v8143_v23  ;;  %v1145_v23 = vadd.f32 %v7909_v37, %v929_v2  ;;  %v7293_v2 = vld [vmem:[%s8967_s4 + $0x10] sm:$0xff]  }
 0x5d2   : > { %v2149_v15 = vpop.f32.mrf.mxu0 }
 0x5d3   : > { %v1353_v18 = vadd.f32 %v8017_v50, %v1145_v23 }
 0x5d4   : > { %v6778_v16 = vpop.f32.mrf.mxu0 }
 0x5d5   : > { %v2183_v19 = vadd.f32 %v6778_v16, %v8147_v42  ;;  %v1141_v42 = vadd.f32 %v7898_v13, %v913_v14  ;;  %v1561_v53 = vadd.f32 %v8033_v62, %v1353_v18  ;;  %v7287_v16 = vld [vmem:[%s8967_s4] sm:$0xff]  }
 0x5d6   : > { %v2152_v21 = vpop.f32.mrf.mxu0 }
 0x5d7   : > { %v1349_v58 = vadd.f32 %v8012_v54, %v1141_v42  ;;  %v1769_v59 = vadd.f32 %v8141_v33, %v1561_v53 }
 0x5d9   : > { %v1557_v60 = vadd.f32 %v8025_v56, %v1349_v58  ;;  %v1977_v43 = vadd.f32 %v8157_v51, %v1769_v59 }
 0x5db   : > { %v1765_v50 = vadd.f32 %v8136_v1, %v1557_v60 }
 0x5dd   : > { %v1973_v36 = vadd.f32 %v8149_v26, %v1765_v50  ;;  %v7297_v50 = vld [vmem:[%s8968_s5 + $0x38] sm:$0xff]  }
 0x5df   : > { %v2181_v56 = vadd.f32 %v2152_v21, %v1973_v36  ;;  %v7288_v21 = vld [vmem:[%s8967_s4 + $0x8] sm:$0xff]  }
 0x5e0   : > { %v6781_v22 = vpop.f32.mrf.mxu0 }
 0x5e1   : > { %v2186_v55 = vadd.f32 %v6781_v22, %v8151_v28  ;;  %v7289_v22 = vld [vmem:[%s8968_s5 + $0x18] sm:$0xff]  }
 0x5e2   : > { %v2165_v27 = vpop.f32.mrf.mxu0 }
 0x5e3   : > { %v2184_v45 = vadd.f32 %v2165_v27, %v8153_v30  ;;  %v2180_v30 = vadd.f32 %v2149_v15, %v8145_v24  ;;  %v7290_v27 = vld [vmem:[%s8968_s5 + $0x8] sm:$0xff]  }
 0x5e4   : > { %v6782_v29 = vpop.f32.mrf.mxu0 }
 0x5e5   : > { %v2187_v13 = vadd.f32 %v6782_v29, %v8155_v31  ;;  %v7291_v29 = vld [vmem:[%s8968_s5 + $0x10] sm:$0xff]  }
 0x5e6   : > { %v2168_v35 = vpop.f32.mrf.mxu0 }
 0x5e7   : > { %v2185_v32 = vadd.f32 %v2168_v35, %v1977_v43  ;;  %v7292_v35 = vld [vmem:[%s8968_s5] sm:$0xff]  }
 0x5f0   : > { %v6787_v41 = vpop.f32.mrf.mxu0 }
 0x5f1   : > { %v2390_v44 = vadd.f32 %v6787_v41, %v2182_v38 }
 0x5f2   : > { %v2357_v49 = vpop.f32.mrf.mxu0 }
 0x5f3   : > { %v2405_v63 = vadd.f32 %v5756_v48, %v2390_v44  ;;  %v2388_v12 = vadd.f32 %v2357_v49, %v2180_v30  ;;  %v7301_v30 = vld [vmem:[%s8968_s5 + $0x40] sm:$0xff]  }
 0x5f4   : > { %v6788_v20 = vpop.f32.mrf.mxu0 }
 0x5f5   : > { %v2391_v47 = vadd.f32 %v6788_v20, %v2183_v19  ;;  %v2413_v4 = vmax.f32 %v2405_v63, 0.0  ;;  %v2403_v5 = vadd.f32 %v5756_v48, %v2388_v12 }
 0x5f6   : > { %v2360_v52 = vpop.f32.mrf.mxu0 }
 0x5f7   : > { %v2406_v0 = vadd.f32 %v5756_v48, %v2391_v47  ;;  %v2389_v31 = vadd.f32 %v2360_v52, %v2181_v56  ;;  %v2411_v10 = vmax.f32 %v2403_v5, 0.0 }
 0x5f9   : > { %v2414_v7 = vmax.f32 %v2406_v0, 0.0  ;;  %v2404_v26 = vadd.f32 %v5756_v48, %v2389_v31 }
 0x5fb   : > { %v8182_v11 = vpack.c.bf16 %v2414_v7, %v2413_v4  ;;  %v2412_v24 = vmax.f32 %v2404_v26, 0.0  ;;  %v7294_v4 = vld [vmem:[%s8968_s5 + $0x28] sm:$0xff]   ;;  %v7295_v7 = vld [vmem:[%s8968_s5 + $0x20] sm:$0xff]  }
 0x5fd   : > { %v8215_v15 = vpack.c.bf16 %v2412_v24, %v2411_v10 }
 0x600   : > { %v6791_v3 = vpop.f32.mrf.mxu0 }
 0x601   : > { %v2394_v37 = vadd.f32 %v6791_v3, %v2186_v55 }
 0x602   : > { %v2373_v61 = vpop.f32.mrf.mxu0 }
 0x603   : > { %v2409_v28 = vadd.f32 %v5756_v48, %v2394_v37  ;;  %v2392_v34 = vadd.f32 %v2373_v61, %v2184_v45 }
 0x604   : > { %v6792_v62 = vpop.f32.mrf.mxu0 }
 0x605   : > { %v2395_v54 = vadd.f32 %v6792_v62, %v2187_v13  ;;  %v2417_v40 = vmax.f32 %v2409_v28, 0.0  ;;  %v2407_v46 = vadd.f32 %v5756_v48, %v2392_v34  ;;  %v7296_v13 = vld [vmem:[%s8967_s4 + $0x18] sm:$0xff]   ;;  %v7298_v62 = vld [vmem:[%s8968_s5 + $0x30] sm:$0xff]  }
 0x606   : > { %v2376_v33 = vpop.f32.mrf.mxu0 }
 0x607   : > { %v2410_v39 = vadd.f32 %v5756_v48, %v2395_v54  ;;  %v2393_v57 = vadd.f32 %v2376_v33, %v2185_v32  ;;  %v2415_v25 = vmax.f32 %v2407_v46, 0.0 }
 0x609   : > { %v2418_v51 = vmax.f32 %v2410_v39, 0.0  ;;  %v2408_v6 = vadd.f32 %v5756_v48, %v2393_v57 }
 0x60b   : > { %v8199_v8 = vpack.c.bf16 %v2418_v51, %v2417_v40  ;;  %v2416_v1 = vmax.f32 %v2408_v6, 0.0  ;;  %v7299_v51 = vld [vmem:[%s8967_s4 + $0x20] sm:$0xff]   ;;  %v7300_v6 = vld [vmem:[%s8968_s5 + $0x48] sm:$0xff]  }
 0x60d   : > { %6794 = vmatpush3.bf16.msra.mxu1 %v8199_v8  ;;  %6806 = vmatpush3.bf16.msra.mxu0 %v8199_v8  ;;  %v8205_v17 = vpack.c.bf16 %v2416_v1, %v2415_v25 }
 0x60e   : > { %6795 = vmatprep.subr.bf16.mxu1 %v7470_v9  ;;  %6807 = vmatprep.subr.bf16.mxu0 %v7470_v9 }
 0x611   : > { %6796 = vmatpush3.bf16.msra.mxu1 %v8205_v17  ;;  %6808 = vmatpush3.bf16.msra.mxu0 %v8205_v17 }
 0x612   : > { %6797 = vmatprep.subr.bf16.mxu1 %v7470_v9  ;;  %6809 = vmatprep.subr.bf16.mxu0 %v7470_v9 }
 0x615   : > { %6798 = vmatpush3.bf16.msra.mxu1 %v8182_v11  ;;  %6810 = vmatpush3.bf16.msra.mxu0 %v8182_v11 }
 0x616   : > { %6799 = vmatprep.subr.bf16.mxu1 %v7470_v9  ;;  %6811 = vmatprep.subr.bf16.mxu0 %v7470_v9 }
 0x619   : > { %6800 = vmatpush3.bf16.msra.mxu1 %v8215_v15  ;;  %6812 = vmatpush3.bf16.msra.mxu0 %v8215_v15 }
 0x61a   : > { %6817 = vmatprep.subr.bf16.mxu1 %v7470_v9  ;;  %6825 = vmatprep.subr.bf16.mxu0 %v7470_v9 }
 0x61c   : > { %6802 = vmatmul.mubr.msk.bf16.vlgmr.msra.gmra.mxu1 %vm2430_vm3, %v7287_v16  ;;  %6814 = vmatmul.mubr.msk.bf16.vlgmr.msra.gmra.mxu0 %vm2430_vm3, %v7288_v21 }
 0x61d   : > { %6818 = vmatpush3.bf16.msra.mxu1 %v7289_v22  ;;  %6821 = vmatprep.mubr.msk.bf16.mxu1 %vm7471_vm2, %v7470_v9 }
 0x61e   : > { %6819 = vmatprep.subr.bf16.mxu1 %v7470_v9  ;;  %6829 = vmatprep.mubr.msk.bf16.mxu0 %vm7471_vm2, %v7470_v9 }
 0x61f   : > { %6826 = vmatpush3.bf16.msra.mxu0 %v7290_v27  ;;  %v7302_v27 = vld [vmem:[%s8967_s4 + $0x28] sm:$0xff]  }
 0x620   : > { %6827 = vmatprep.subr.bf16.mxu0 %v7470_v9 }
 0x621   : > { %6820 = vmatpush3.bf16.msra.mxu1 %v7291_v29  ;;  %v7303_v29 = vld [vmem:[%s8968_s5 + $0x58] sm:$0xff]  }
 0x622   : > { %6833 = vmatprep.subr.bf16.mxu1 %v7470_v9 }
 0x623   : > { %6828 = vmatpush3.bf16.msra.mxu0 %v7292_v35  ;;  %v7304_v35 = vld [vmem:[%s8968_s5 + $0x50] sm:$0xff]  }
 0x624   : > { %6845 = vmatprep.subr.bf16.mxu0 %v7470_v9 }
 0x6dc   : > { %v2468_v38 = vpop.f32.mrf.mxu1  ;;  %v2525_v41 = vpop.f32.mrf.mxu0 }
 0x6de   : > { %v6803_v44 = vpop.f32.mrf.mxu1  ;;  %v6815_v48 = vpop.f32.mrf.mxu0 }
 0x6e0   : > { %v2471_v49 = vpop.f32.mrf.mxu1  ;;  %v2528_v19 = vpop.f32.mrf.mxu0 }
 0x6e1   : > { %v2475_v20 = vpack.c.bf16 %v2471_v49, %v2468_v38  ;;  %v2532_v63 = vpack.c.bf16 %v2528_v19, %v2525_v41 }
 0x6e2   : > { %v6816_v47 = vpop.f32.mrf.mxu0  ;;  %v6804_v0 = vpop.f32.mrf.mxu1 }
 0x6e3   : > { %6822 = vmatmul.mubr.msk.bf16.vlgmr.msra.gmra.mxu1 %vm2550_vm4, %v2532_v63  ;;  %6830 = vmatmul.mubr.msk.bf16.vlgmr.msra.gmra.mxu0 %vm2550_vm4, %v2475_v20 }
 0x6e4   : > { %6834 = vmatpush3.bf16.msra.mxu1 %v8199_v8  ;;  %6841 = vmatprep.mubr.msk.bf16.mxu1 %vm7471_vm2, %v7470_v9 }
 0x6e5   : > { %6835 = vmatprep.subr.bf16.mxu1 %v7470_v9  ;;  %6849 = vmatprep.mubr.msk.bf16.mxu0 %vm7471_vm2, %v7470_v9 }
 0x6e6   : > { %6846 = vmatpush3.bf16.msra.mxu0 %v7294_v4  ;;  %v7305_v4 = vld [vmem:[%s8967_s4 + $0x30] sm:$0xff]  }
 0x6e7   : > { %6847 = vmatprep.subr.bf16.mxu0 %v7470_v9 }
 0x6e8   : > { %6836 = vmatpush3.bf16.msra.mxu1 %v8205_v17 }
 0x6e9   : > { %6837 = vmatprep.subr.bf16.mxu1 %v7470_v9 }
 0x6ea   : > { %6848 = vmatpush3.bf16.msra.mxu0 %v7295_v7  ;;  %v7306_v7 = vld [vmem:[%s8968_s5 + $0x68] sm:$0xff]  }
 0x6eb   : > { %6853 = vmatprep.subr.bf16.mxu0 %v7470_v9 }
 0x6ec   : > { %6838 = vmatpush3.bf16.msra.mxu1 %v8182_v11 }
 0x6ed   : > { %6839 = vmatprep.subr.bf16.mxu1 %v7470_v9 }
 0x6f0   : > { %6840 = vmatpush3.bf16.msra.mxu1 %v8215_v15 }
 0x6f1   : > { %6865 = vmatprep.subr.bf16.mxu1 %v7470_v9 }
 0x6f3   : > { %6842 = vmatmul.mubr.msk.bf16.vlgmr.msra.gmra.mxu1 %vm2430_vm3, %v7293_v2 }
 0x6f4   : > { %6869 = vmatprep.mubr.msk.bf16.mxu1 %vm7471_vm2, %v7470_v9  ;;  %6866 = vmatpush3.bf16.msra.mxu1 %v7297_v50 }
 0x6f5   : > { %6867 = vmatprep.subr.bf16.mxu1 %v7470_v9 }
 0x6f8   : > { %6868 = vmatpush3.bf16.msra.mxu1 %v7298_v62 }
 0x6f9   : > { %6873 = vmatprep.subr.bf16.mxu1 %v7470_v9 }
 0x7a3   : > { %v2588_v23 = vpop.f32.mrf.mxu1  ;;  %v2644_v14 = vpop.f32.mrf.mxu0 }
 0x7a4   : > { %v2645_v18 = vadd.f32 %v2644_v14, %v2588_v23  ;;  %v7307_v23 = vld [vmem:[%s8968_s5 + $0x60] sm:$0xff]  }
 0x7a5   : > { %v6823_v42 = vpop.f32.mrf.mxu1  ;;  %v6831_v52 = vpop.f32.mrf.mxu0 }
 0x7a7   : > { %v2591_v53 = vpop.f32.mrf.mxu1  ;;  %v2647_v55 = vpop.f32.mrf.mxu0 }
 0x7a8   : > { %v2648_v58 = vadd.f32 %v2647_v55, %v2591_v53 }
 0x7a9   : > { %v6824_v3 = vpop.f32.mrf.mxu1  ;;  %v6832_v59 = vpop.f32.mrf.mxu0 }
 0x7b3   : > { %v2696_v37 = vpop.f32.mrf.mxu1 }
 0x7b5   : > { %v6843_v60 = vpop.f32.mrf.mxu1 }
 0x7b7   : > { %v2699_v61 = vpop.f32.mrf.mxu1 }
 0x7b8   : > { %v2703_v43 = vpack.c.bf16 %v2699_v61, %v2696_v37  ;;  %v7308_v61 = vld [vmem:[%s8967_s4 + $0x38] sm:$0xff]  }
 0x7b9   : > { %v6844_v45 = vpop.f32.mrf.mxu1 }
 0x7ba   : > { %6850 = vmatmul.mubr.msk.bf16.vlgmr.msra.gmra.mxu0 %vm2550_vm4, %v2703_v43  ;;  %v7309_v43 = vld [vmem:[%s8968_s5 + $0x78] sm:$0xff]   ;;  %v7310_v45 = vld [vmem:[%s8968_s5 + $0x70] sm:$0xff]  }
 0x7bb   : > { %6854 = vmatpush3.bf16.msra.mxu0 %v8199_v8  ;;  %6861 = vmatprep.mubr.msk.bf16.mxu0 %vm7471_vm2, %v7470_v9 }
 0x7bc   : > { %6855 = vmatprep.subr.bf16.mxu0 %v7470_v9 }
 0x7bf   : > { %6856 = vmatpush3.bf16.msra.mxu0 %v8205_v17 }
 0x7c0   : > { %6857 = vmatprep.subr.bf16.mxu0 %v7470_v9 }
 0x7c3   : > { %6858 = vmatpush3.bf16.msra.mxu0 %v8182_v11 }
 0x7c4   : > { %6859 = vmatprep.subr.bf16.mxu0 %v7470_v9 }
 0x7c7   : > { %6860 = vmatpush3.bf16.msra.mxu0 %v8215_v15 }
 0x7c8   : > { %6885 = vmatprep.subr.bf16.mxu0 %v7470_v9 }
 0x7ca   : > { %6862 = vmatmul.mubr.msk.bf16.vlgmr.msra.gmra.mxu0 %vm2430_vm3, %v7296_v13 }
 0x7cb   : > { %6889 = vmatprep.mubr.msk.bf16.mxu0 %vm7471_vm2, %v7470_v9  ;;  %6886 = vmatpush3.bf16.msra.mxu0 %v7300_v6 }
 0x7cc   : > { %6887 = vmatprep.subr.bf16.mxu0 %v7470_v9 }
 0x7cf   : > { %6888 = vmatpush3.bf16.msra.mxu0 %v7301_v30 }
 0x7d0   : > { %6893 = vmatprep.subr.bf16.mxu0 %v7470_v9 }
 0x87a   : > { %v2758_v32 = vpop.f32.mrf.mxu0 }
 0x87b   : > { %v2765_v28 = vadd.f32 %v2758_v32, %v2645_v18 }
 0x87c   : > { %v6851_v34 = vpop.f32.mrf.mxu0 }
 0x87e   : > { %v2761_v54 = vpop.f32.mrf.mxu0 }
 0x87f   : > { %v2766_v36 = vadd.f32 %v2761_v54, %v2648_v58 }
 0x880   : > { %v6852_v33 = vpop.f32.mrf.mxu0 }
 0x88a   : > { %v2812_v39 = vpop.f32.mrf.mxu0 }
 0x88c   : > { %v6863_v57 = vpop.f32.mrf.mxu0 }
 0x88e   : > { %v2815_v56 = vpop.f32.mrf.mxu0 }
 0x88f   : > { %v2819_v40 = vpack.c.bf16 %v2815_v56, %v2812_v39  ;;  %v7311_v56 = vld [vmem:[%s8967_s4 + $0x40] sm:$0xff]  }
 0x890   : > { %v6864_v46 = vpop.f32.mrf.mxu0 }
 0x891   : > { %6870 = vmatmul.mubr.msk.bf16.vlgmr.msra.gmra.mxu1 %vm2550_vm4, %v2819_v40 }
 0x892   : > { %6874 = vmatpush3.bf16.msra.mxu1 %v8199_v8  ;;  %6881 = vmatprep.mubr.msk.bf16.mxu1 %vm7471_vm2, %v7470_v9 }
 0x893   : > { %6875 = vmatprep.subr.bf16.mxu1 %v7470_v9 }
 0x896   : > { %6876 = vmatpush3.bf16.msra.mxu1 %v8205_v17 }
 0x897   : > { %6877 = vmatprep.subr.bf16.mxu1 %v7470_v9 }
 0x89a   : > { %6878 = vmatpush3.bf16.msra.mxu1 %v8182_v11 }
 0x89b   : > { %6879 = vmatprep.subr.bf16.mxu1 %v7470_v9 }
 0x89e   : > { %6880 = vmatpush3.bf16.msra.mxu1 %v8215_v15 }
 0x89f   : > { %6905 = vmatprep.subr.bf16.mxu1 %v7470_v9 }
 0x8a1   : > { %6882 = vmatmul.mubr.msk.bf16.vlgmr.msra.gmra.mxu1 %vm2430_vm3, %v7299_v51 }
 0x8a2   : > { %6909 = vmatprep.mubr.msk.bf16.mxu1 %vm7471_vm2, %v7470_v9  ;;  %6906 = vmatpush3.bf16.msra.mxu1 %v7303_v29 }
 0x8a3   : > { %6907 = vmatprep.subr.bf16.mxu1 %v7470_v9 }
 0x8a6   : > { %6908 = vmatpush3.bf16.msra.mxu1 %v7304_v35 }
 0x8a7   : > { %6913 = vmatprep.subr.bf16.mxu1 %v7470_v9 }
 0x951   : > { %v2874_v31 = vpop.f32.mrf.mxu1 }
 0x952   : > { %v2881_v1 = vadd.f32 %v2874_v31, %v2765_v28 }
 0x953   : > { %v6871_v12 = vpop.f32.mrf.mxu1 }
 0x955   : > { %v2877_v25 = vpop.f32.mrf.mxu1 }
 0x956   : > { %v2882_v26 = vadd.f32 %v2877_v25, %v2766_v36 }
 0x957   : > { %v6872_v5 = vpop.f32.mrf.mxu1 }
 0x961   : > { %v2928_v24 = vpop.f32.mrf.mxu1 }
 0x963   : > { %v6883_v10 = vpop.f32.mrf.mxu1 }
 0x965   : > { %v2931_v16 = vpop.f32.mrf.mxu1 }
 0x966   : > { %v2935_v21 = vpack.c.bf16 %v2931_v16, %v2928_v24  ;;  %v5850_v24 = vld [vmem:[%s8969_s6] ss:$0 sm:$0xff] }
 0x967   : > { %v6884_v22 = vpop.f32.mrf.mxu1 }
 0x968   : > { %6890 = vmatmul.mubr.msk.bf16.vlgmr.msra.gmra.mxu0 %vm2550_vm4, %v2935_v21 }
 0x969   : > { %6894 = vmatpush3.bf16.msra.mxu0 %v8199_v8  ;;  %6901 = vmatprep.mubr.msk.bf16.mxu0 %vm7471_vm2, %v7470_v9 }
 0x96a   : > { %6895 = vmatprep.subr.bf16.mxu0 %v7470_v9 }
 0x96d   : > { %6896 = vmatpush3.bf16.msra.mxu0 %v8205_v17 }
 0x96e   : > { %6897 = vmatprep.subr.bf16.mxu0 %v7470_v9 }
 0x971   : > { %6898 = vmatpush3.bf16.msra.mxu0 %v8182_v11 }
 0x972   : > { %6899 = vmatprep.subr.bf16.mxu0 %v7470_v9 }
 0x975   : > { %6900 = vmatpush3.bf16.msra.mxu0 %v8215_v15 }
 0x976   : > { %6925 = vmatprep.subr.bf16.mxu0 %v7470_v9 }
 0x978   : > { %6902 = vmatmul.mubr.msk.bf16.vlgmr.msra.gmra.mxu0 %vm2430_vm3, %v7302_v27 }
 0x979   : > { %6929 = vmatprep.mubr.msk.bf16.mxu0 %vm7471_vm2, %v7470_v9  ;;  %6926 = vmatpush3.bf16.msra.mxu0 %v7306_v7 }
 0x97a   : > { %6927 = vmatprep.subr.bf16.mxu0 %v7470_v9 }
 0x97d   : > { %6928 = vmatpush3.bf16.msra.mxu0 %v7307_v23 }
 0x97e   : > { %6933 = vmatprep.subr.bf16.mxu0 %v7470_v9 }
 0xa28   : > { %v2990_v38 = vpop.f32.mrf.mxu0 }
 0xa29   : > { %v2997_v41 = vadd.f32 %v2990_v38, %v2881_v1 }
 0xa2a   : > { %v6891_v44 = vpop.f32.mrf.mxu0 }
 0xa2b   : > { %v3475_v44 = vld [vmem:[%s8970_s7] sm:$0x3] }
 0xa2c   : > { %v2993_v48 = vpop.f32.mrf.mxu0 }
 0xa2d   : > { %v2998_v49 = vadd.f32 %v2993_v48, %v2882_v26  ;;  %v5852_v48 = vld [vmem:[%s8970_s7 + $0x2] sm:$0x3] }
 0xa2e   : > { %v6892_v19 = vpop.f32.mrf.mxu0 }
 0xa2f   : > { %v7315_v19 = vld [vmem:[%s8971_s8 + $0x18] sm:$0xff]  }
 0xa38   : > { %v3044_v20 = vpop.f32.mrf.mxu0 }
 0xa3a   : > { %v6903_v63 = vpop.f32.mrf.mxu0 }
 0xa3b   : > { %v7317_v63 = vld [vmem:[%s8971_s8 + $0x10] sm:$0xff]  }
 0xa3c   : > { %v3047_v47 = vpop.f32.mrf.mxu0 }
 0xa3d   : > { %v3051_v0 = vpack.c.bf16 %v3047_v47, %v3044_v20  ;;  %v7316_v20 = vld [vmem:[%s8971_s8 + $0x30] sm:$0xff]   ;;  %v7318_v47 = vld [vmem:[%s8971_s8 + $0x28] sm:$0xff]  }
 0xa3e   : > { %v6904_v2 = vpop.f32.mrf.mxu0 }
 0xa3f   : > { %6910 = vmatmul.mubr.msk.bf16.vlgmr.msra.gmra.mxu1 %vm2550_vm4, %v3051_v0  ;;  %v7319_v0 = vld [vmem:[%s8971_s8 + $0x8] sm:$0xff]   ;;  %v7320_v2 = vld [vmem:[%s8971_s8 + $0x20] sm:$0xff]  }
 0xa40   : > { %6914 = vmatpush3.bf16.msra.mxu1 %v8199_v8  ;;  %6921 = vmatprep.mubr.msk.bf16.mxu1 %vm7471_vm2, %v7470_v9 }
 0xa41   : > { %6915 = vmatprep.subr.bf16.mxu1 %v7470_v9 }
 0xa44   : > { %6916 = vmatpush3.bf16.msra.mxu1 %v8205_v17 }
 0xa45   : > { %6917 = vmatprep.subr.bf16.mxu1 %v7470_v9 }
 0xa48   : > { %6918 = vmatpush3.bf16.msra.mxu1 %v8182_v11 }
 0xa49   : > { %6919 = vmatprep.subr.bf16.mxu1 %v7470_v9 }
 0xa4c   : > { %6920 = vmatpush3.bf16.msra.mxu1 %v8215_v15 }
 0xa4d   : > { %6945 = vmatprep.subr.bf16.mxu1 %v7470_v9 }
 0xa4f   : > { %6922 = vmatmul.mubr.msk.bf16.vlgmr.msra.gmra.mxu1 %vm2430_vm3, %v7305_v4  ;;  %v7321_v4 = vld [vmem:[%s8971_s8] sm:$0xff]  }
 0xa50   : > { %6949 = vmatprep.mubr.msk.bf16.mxu1 %vm7471_vm2, %v7470_v9  ;;  %6946 = vmatpush3.bf16.msra.mxu1 %v7309_v43  ;;  %v7324_v43 = vld [vmem:[%s8971_s8 + $0x48] sm:$0xff]  }
 0xa51   : > { %6947 = vmatprep.subr.bf16.mxu1 %v7470_v9 }
 0xa54   : > { %6948 = vmatpush3.bf16.msra.mxu1 %v7310_v45  ;;  %v7325_v45 = vld [vmem:[%s8971_s8 + $0x78] sm:$0xff]  }
 0xa55   : > { %6953 = vmatprep.subr.bf16.mxu1 %v7470_v9 }
 0xaff   : > { %v3106_v14 = vpop.f32.mrf.mxu1 }
 0xb00   : > { %v3113_v18 = vadd.f32 %v3106_v14, %v2997_v41 }
 0xb01   : > { %v6911_v42 = vpop.f32.mrf.mxu1 }
 0xb02   : > { %v7322_v42 = vld [vmem:[%s8971_s8 + $0x58] sm:$0xff]  }
 0xb03   : > { %v3109_v52 = vpop.f32.mrf.mxu1 }
 0xb04   : > { %v3114_v53 = vadd.f32 %v3109_v52, %v2998_v49  ;;  %v7314_v49 = vld [vmem:[%s8971_s8 + $0x38] sm:$0xff]  }
 0xb05   : > { %v6912_v55 = vpop.f32.mrf.mxu1 }
 0xb0f   : > { %v3160_v58 = vpop.f32.mrf.mxu1 }
 0xb11   : > { %v6923_v3 = vpop.f32.mrf.mxu1 }
 0xb12   : > { %v7323_v3 = vld [vmem:[%s8971_s8 + $0x50] sm:$0xff]  }
 0xb13   : > { %v3163_v59 = vpop.f32.mrf.mxu1 }
 0xb14   : > { %v3167_v37 = vpack.c.bf16 %v3163_v59, %v3160_v58 }
 0xb15   : > { %v6924_v60 = vpop.f32.mrf.mxu1 }
 0xb16   : > { %6930 = vmatmul.mubr.msk.bf16.vlgmr.msra.gmra.mxu0 %vm2550_vm4, %v3167_v37  ;;  %v5872_v60 = vld [vmem:[%s8970_s7 + $0x4] sm:$0x3] }
 0xb17   : > { %6934 = vmatpush3.bf16.msra.mxu0 %v8199_v8  ;;  %6941 = vmatprep.mubr.msk.bf16.mxu0 %vm7471_vm2, %v7470_v9 }
 0xb18   : > { %6935 = vmatprep.subr.bf16.mxu0 %v7470_v9 }
 0xb1b   : > { %6936 = vmatpush3.bf16.msra.mxu0 %v8205_v17 }
 0xb1c   : > { %6937 = vmatprep.subr.bf16.mxu0 %v7470_v9 }
 0xb1f   : > { %6938 = vmatpush3.bf16.msra.mxu0 %v8182_v11 }
 0xb20   : > { %6939 = vmatprep.subr.bf16.mxu0 %v7470_v9 }
 0xb23   : > { %6940 = vmatpush3.bf16.msra.mxu0 %v8215_v15 }
 0xb24   : > { %6965 = vmatprep.subr.bf16.mxu0 %v7470_v9 }
 0xb26   : > { %6942 = vmatmul.mubr.msk.bf16.vlgmr.msra.gmra.mxu0 %vm2430_vm3, %v7308_v61  ;;  %v5887_v61 = vld [vmem:[%s8970_s7 + $0x6] sm:$0x3] }
 0xb27   : > { %6969 = vmatprep.mubr.msk.bf16.mxu0 %vm7471_vm2, %v7470_v9 }
 0xbd6   : > { %v3222_v13 = vpop.f32.mrf.mxu0 }
 0xbd7   : > { %v3229_v50 = vadd.f32 %v3222_v13, %v3113_v18  ;;  %v7326_v13 = vld [vmem:[%s8971_s8 + $0x40] sm:$0xff]  }
 0xbd8   : > { %v6931_v62 = vpop.f32.mrf.mxu0 }
 0xbd9   : > { %v7328_v62 = vld [vmem:[%s8971_s8 + $0x68] sm:$0xff]  }
 0xbda   : > { %v3225_v32 = vpop.f32.mrf.mxu0 }
 0xbdb   : > { %v3230_v28 = vadd.f32 %v3225_v32, %v3114_v53  ;;  %v7329_v32 = vld [vmem:[%s8971_s8 + $0x60] sm:$0xff]  }
 0xbdc   : > { %v6932_v34 = vpop.f32.mrf.mxu0 }
 0xbe6   : > { %v3276_v54 = vpop.f32.mrf.mxu0 }
 0xbe8   : > { %v6943_v36 = vpop.f32.mrf.mxu0 }
 0xbea   : > { %v3279_v33 = vpop.f32.mrf.mxu0 }
 0xbeb   : > { %v3283_v39 = vpack.c.bf16 %v3279_v33, %v3276_v54 }
 0xbec   : > { %v6944_v57 = vpop.f32.mrf.mxu0 }
 0xbed   : > { %6950 = vmatmul.mubr.msk.bf16.vlgmr.msra.gmra.mxu1 %vm2550_vm4, %v3283_v39 }
 0xbee   : > { %6954 = vmatpush3.bf16.msra.mxu1 %v8199_v8  ;;  %6961 = vmatprep.mubr.msk.bf16.mxu1 %vm7471_vm2, %v7470_v9  ;;  %v7312_v8 = vld [vmem:[%s8968_s5 + $0x88] sm:$0xff]  }
 0xbef   : > { %6955 = vmatprep.subr.bf16.mxu1 %v7470_v9  ;;  %6966 = vmatpush3.bf16.msra.mxu0 %v7312_v8 }
 0xbf0   : > { %6967 = vmatprep.subr.bf16.mxu0 %v7470_v9 }
 0xbf2   : > { %6956 = vmatpush3.bf16.msra.mxu1 %v8205_v17 }
 0xbf3   : > { %6957 = vmatprep.subr.bf16.mxu1 %v7470_v9 }
 0xbf6   : > { %6958 = vmatpush3.bf16.msra.mxu1 %v8182_v11  ;;  %v7313_v11 = vld [vmem:[%s8968_s5 + $0x80] sm:$0xff]  }
 0xbf7   : > { %6959 = vmatprep.subr.bf16.mxu1 %v7470_v9  ;;  %6968 = vmatpush3.bf16.msra.mxu0 %v7313_v11 }
 0xbf8   : > { %6973 = vmatprep.subr.bf16.mxu0 %v7470_v9 }
 0xbfa   : > { %6960 = vmatpush3.bf16.msra.mxu1 %v8215_v15 }
 0xbfb   : > { %6979 = vmatprep.subr.bf16.mxu1 %v7470_v9 }
 0xbfd   : > { %6962 = vmatmul.mubr.msk.bf16.vlgmr.msra.gmra.mxu1 %vm2430_vm3, %v7311_v56 }
 0xbfe   : > { %6981 = vmatprep.mubr.msk.bf16.mxu1 %vm7471_vm2, %v7470_v9 }
 0xcad   : > { %v3338_v17 = vpop.f32.mrf.mxu1 }
 0xcae   : > { %v3345_v15 = vadd.f32 %v3338_v17, %v3229_v50  ;;  %v7327_v50 = vld [vmem:[%s8971_s8 + $0x70] sm:$0xff]  }
 0xcaf   : > { %v6951_v40 = vpop.f32.mrf.mxu1 }
 0xcb1   : > { %v3341_v46 = vpop.f32.mrf.mxu1 }
 0xcb2   : > { %v3346_v51 = vadd.f32 %v3341_v46, %v3230_v28 }
 0xcb3   : > { %v6952_v6 = vpop.f32.mrf.mxu1 }
 0xcb4   : > { %v5902_v6 = vld [vmem:[%s8970_s7 + $0x8] sm:$0x3] }
 0xcbd   : > { %v3392_v30 = vpop.f32.mrf.mxu1 }
 0xcbf   : > { %v6963_v31 = vpop.f32.mrf.mxu1 }
 0xcc0   : > { %v7330_v31 = vld [vmem:[%s8971_s8 + $0x98] sm:$0xff]  }
 0xcc1   : > { %v3395_v1 = vpop.f32.mrf.mxu1 }
 0xcc2   : > { %v3399_v12 = vpack.c.bf16 %v3395_v1, %v3392_v30 }
 0xcc3   : > { %v6964_v25 = vpop.f32.mrf.mxu1 }
 0xcc4   : > { %6970 = vmatmul.mubr.msk.bf16.vlgmr.msra.gmra.mxu0 %vm2550_vm4, %v3399_v12  ;;  %v7331_v25 = vld [vmem:[%s8971_s8 + $0x90] sm:$0xff]  }
 0xcc5   : > { %6975 = vmatprep.mubr.msk.bf16.mxu0 %vm7471_vm2, %v7470_v9 }
 0xd84   : > { %v3454_v26 = vpop.f32.mrf.mxu0 }
 0xd85   : > { %v3461_v5 = vadd.f32 %v3454_v26, %v3345_v15 }
 0xd86   : > { %v6971_v10 = vpop.f32.mrf.mxu0 }
 0xd87   : > { %v3470_v21 = vadd.f32 %v5850_v24, %v3461_v5  ;;  %v5917_v5 = vld [vmem:[%s8970_s7 + $0xa] sm:$0x3]  ;;  %v7333_v10 = vld [vmem:[%s8971_s8 + $0xb8] sm:$0xff]  }
 0xd88   : > { %v3457_v16 = vpop.f32.mrf.mxu0 }
 0xd89   : > { %v3462_v22 = vadd.f32 %v3457_v16, %v3346_v51  ;;  %v3472_v35 = vmax.f32 %v3470_v21, 0.0  ;;  %v7334_v16 = vld [vmem:[%s8971_s8 + $0x80] sm:$0xff]   ;;  %v7335_v21 = vld [vmem:[%s8971_s8 + $0xb0] sm:$0xff]  }
 0xd8a   : > { %v6972_v27 = vpop.f32.mrf.mxu0 }
 0xd8b   : > { %v3471_v29 = vadd.f32 %v5850_v24, %v3462_v22  ;;  %v7332_v24 = vld [vmem:[%s8971_s8 + $0x88] sm:$0xff]   ;;  %v7337_v27 = vld [vmem:[%s8971_s8 + $0xa0] sm:$0xff]  }
 0xd8c   : > { %v7336_v22 = vld [vmem:[%s8971_s8 + $0xa8] sm:$0xff]  }
 0xd8d   : > { %v3473_v38 = vmax.f32 %v3471_v29, 0.0 }
 0xd8f   : > { %v8433_v41 = vpack.c.bf16 %v3473_v38, %v3472_v35 }
 0xd91   : > { %6974 = vmatpush3.bf16.msra.mxu0 %v8433_v41  ;;  %6980 = vmatpush3.bf16.msra.mxu1 %v8433_v41 }
 0xd92   : > { %6985 = vmatprep.subr.bf16.mxu0 %v7470_v9  ;;  %6997 = vmatprep.subr.bf16.mxu1 %v7470_v9 }
 0xd94   : > { %6976 = vmatmul.mubr.msk.bf16.vlgmr.msra.gmra.mxu0 %vm3476_vm5, %v3475_v44  ;;  %6982 = vmatmul.mubr.msk.bf16.vlgmr.msra.gmra.mxu1 %vm3476_vm5, %v5852_v48 }
 0xd95   : > { %6986 = vmatpush3.bf16.msra.mxu0 %v7314_v49  ;;  %6998 = vmatpush3.bf16.msra.mxu1 %v7315_v19 }
 0xd96   : > { %6987 = vmatprep.subr.bf16.mxu0 %v7470_v9  ;;  %6999 = vmatprep.subr.bf16.mxu1 %v7470_v9 }
 0xd97   : > { %6993 = vmatprep.mubr.msk.bf16.mxu0 %vm7471_vm2, %v7470_v9  ;;  %7005 = vmatprep.mubr.msk.bf16.mxu1 %vm7471_vm2, %v7470_v9 }
 0xd99   : > { %6988 = vmatpush3.bf16.msra.mxu0 %v7316_v20  ;;  %7000 = vmatpush3.bf16.msra.mxu1 %v7317_v63 }
 0xd9a   : > { %6989 = vmatprep.subr.bf16.mxu0 %v7470_v9  ;;  %7001 = vmatprep.subr.bf16.mxu1 %v7470_v9 }
 0xd9d   : > { %6990 = vmatpush3.bf16.msra.mxu0 %v7318_v47  ;;  %7002 = vmatpush3.bf16.msra.mxu1 %v7319_v0 }
 0xd9e   : > { %6991 = vmatprep.subr.bf16.mxu0 %v7470_v9  ;;  %7003 = vmatprep.subr.bf16.mxu1 %v7470_v9 }
 0xda1   : > { %6992 = vmatpush3.bf16.msra.mxu0 %v7320_v2  ;;  %7004 = vmatpush3.bf16.msra.mxu1 %v7321_v4 }
 0xda2   : > { %7009 = vmatprep.subr.bf16.mxu0 %v7470_v9  ;;  %7015 = vmatprep.subr.bf16.mxu1 %v7470_v9 }
 0xe54   : > { %v3514_v7 = vpop.f32.mrf.mxu0  ;;  %v3568_v23 = vpop.f32.mrf.mxu1 }
 0xe55   : > { %v3520_v14 = vpack.c.bf16 %v3514_v7, %v3514_v7  ;;  %v3574_v18 = vpack.c.bf16 %v3568_v23, %v3568_v23 }
 0xe56   : > { %v6983_v52 = vpop.f32.mrf.mxu1  ;;  %v6977_v53 = vpop.f32.mrf.mxu0 }
 0xe57   : > { %6994 = vmatmul.mubr.msk.bf16.vlgmr.msra.gmra.mxu0 %vm2430_vm3, %v3574_v18  ;;  %7006 = vmatmul.mubr.msk.bf16.vlgmr.msra.gmra.mxu1 %vm2430_vm3, %v3520_v14  ;;  %v5932_v18 = vld [vmem:[%s8970_s7 + $0xc] sm:$0x3]  ;;  %v7338_v52 = vld [vmem:[%s8971_s8 + $0xd8] sm:$0xff]  }
 0xe58   : > { %7010 = vmatpush3.bf16.msra.mxu0 %v8433_v41  ;;  %v3571_v55 = vpop.f32.mrf.mxu1  ;;  %7011 = vmatprep.mubr.msk.bf16.mxu0 %vm7471_vm2, %v7470_v9  ;;  %v3517_v58 = vpop.f32.mrf.mxu0 }
 0xe59   : > { %7027 = vmatprep.subr.bf16.mxu0 %v7470_v9  ;;  %7016 = vmatpush3.bf16.msra.mxu1 %v7322_v42  ;;  %v7339_v58 = vld [vmem:[%s8971_s8 + $0xd0] sm:$0xff]  }
 0xe5a   : > { %v6984_v59 = vpop.f32.mrf.mxu1  ;;  %v6978_v37 = vpop.f32.mrf.mxu0  ;;  %7017 = vmatprep.subr.bf16.mxu1 %v7470_v9  ;;  %7023 = vmatprep.mubr.msk.bf16.mxu1 %vm7471_vm2, %v7470_v9 }
 0xe5b   : > { %v5947_v59 = vld [vmem:[%s8970_s7 + $0xe] sm:$0x3] }
 0xe5c   : > { %v7340_v37 = vld [vmem:[%s8971_s8 + $0xc8] sm:$0xff]  }
 0xe5d   : > { %7018 = vmatpush3.bf16.msra.mxu1 %v7323_v3 }
 0xe5e   : > { %7019 = vmatprep.subr.bf16.mxu1 %v7470_v9 }
 0xe5f   : > { %7012 = vmatmul.mubr.msk.bf16.vlgmr.msra.gmra.mxu0 %vm3476_vm5, %v5872_v60  ;;  %v7341_v60 = vld [vmem:[%s8971_s8 + $0xf8] sm:$0xff]  }
 0xe60   : > { %7028 = vmatpush3.bf16.msra.mxu0 %v8433_v41  ;;  %7029 = vmatprep.mubr.msk.bf16.mxu0 %vm7471_vm2, %v7470_v9 }
 0xe61   : > { %7033 = vmatprep.subr.bf16.mxu0 %v7470_v9  ;;  %7020 = vmatpush3.bf16.msra.mxu1 %v7324_v43  ;;  %v7343_v43 = vld [vmem:[%s8971_s8 + $0xf0] sm:$0xff]  }
 0xe62   : > { %7021 = vmatprep.subr.bf16.mxu1 %v7470_v9 }
 0xe65   : > { %7022 = vmatpush3.bf16.msra.mxu1 %v7326_v13  ;;  %v7345_v13 = vld [vmem:[%s8971_s8 + $0xe0] sm:$0xff]  }
 0xe66   : > { %7045 = vmatprep.subr.bf16.mxu1 %v7470_v9 }
 0xe67   : > { %7030 = vmatmul.mubr.msk.bf16.vlgmr.msra.gmra.mxu0 %vm3476_vm5, %v5887_v61  ;;  %v7342_v61 = vld [vmem:[%s8971_s8 + $0xc0] sm:$0xff]  }
 0xe68   : > { %7041 = vmatprep.mubr.msk.bf16.mxu0 %vm7471_vm2, %v7470_v9  ;;  %7034 = vmatpush3.bf16.msra.mxu0 %v7325_v45  ;;  %v7344_v45 = vld [vmem:[%s8971_s8 + $0xe8] sm:$0xff]  }
 0xe69   : > { %7035 = vmatprep.subr.bf16.mxu0 %v7470_v9 }
 0xe6c   : > { %7036 = vmatpush3.bf16.msra.mxu0 %v7327_v50 }
 0xe6d   : > { %7037 = vmatprep.subr.bf16.mxu0 %v7470_v9 }
 0xe70   : > { %7038 = vmatpush3.bf16.msra.mxu0 %v7328_v62 }
 0xe71   : > { %7039 = vmatprep.subr.bf16.mxu0 %v7470_v9 }
 0xe74   : > { %7040 = vmatpush3.bf16.msra.mxu0 %v7329_v32 }
 0xe75   : > { %7063 = vmatprep.subr.bf16.mxu0 %v7470_v9 }
 0xf17   : > { %v3645_v28 = vpop.f32.mrf.mxu0  ;;  %v3712_v34 = vpop.f32.mrf.mxu1 }
 0xf18   : > { %v3713_v54 = vadd.f32 %v3712_v34, %v3645_v28 }
 0xf19   : > { %v6995_v36 = vpop.f32.mrf.mxu0  ;;  %v7007_v33 = vpop.f32.mrf.mxu1 }
 0xf1b   : > { %v3648_v39 = vpop.f32.mrf.mxu0  ;;  %v3715_v57 = vpop.f32.mrf.mxu1 }
 0xf1d   : > { %v6996_v56 = vpop.f32.mrf.mxu0  ;;  %v7008_v8 = vpop.f32.mrf.mxu1 }
 0xf1f   : > { %v3757_v11 = vpop.f32.mrf.mxu0 }
 0xf20   : > { %v3763_v17 = vpack.c.bf16 %v3757_v11, %v3757_v11 }
 0xf21   : > { %v7013_v15 = vpop.f32.mrf.mxu0 }
 0xf22   : > { %7024 = vmatmul.mubr.msk.bf16.vlgmr.msra.gmra.mxu1 %vm2430_vm3, %v3763_v17 }
 0xf23   : > { %7046 = vmatpush3.bf16.msra.mxu1 %v8433_v41  ;;  %v3760_v40 = vpop.f32.mrf.mxu0  ;;  %7047 = vmatprep.mubr.msk.bf16.mxu1 %vm7471_vm2, %v7470_v9 }
 0xf24   : > { %7051 = vmatprep.subr.bf16.mxu1 %v7470_v9 }
 0xf25   : > { %v7014_v46 = vpop.f32.mrf.mxu0 }
 0xf26   : > { %v5962_v46 = vld [vmem:[%s8970_s7 + $0x10] sm:$0x3] }
 0xf27   : > { %v3880_v51 = vpop.f32.mrf.mxu0 }
 0xf28   : > { %v3886_v30 = vpack.c.bf16 %v3880_v51, %v3880_v51  ;;  %v7346_v51 = vld [vmem:[%s8971_s8 + $0x118] sm:$0xff]  }
 0xf29   : > { %v7031_v1 = vpop.f32.mrf.mxu0 }
 0xf2a   : > { %7042 = vmatmul.mubr.msk.bf16.vlgmr.msra.gmra.mxu0 %vm2430_vm3, %v3886_v30  ;;  %7048 = vmatmul.mubr.msk.bf16.vlgmr.msra.gmra.mxu1 %vm3476_vm5, %v5902_v6  ;;  %v7347_v1 = vld [vmem:[%s8971_s8 + $0x110] sm:$0xff]  }
 0xf2b   : > { %7064 = vmatpush3.bf16.msra.mxu0 %v8433_v41  ;;  %7065 = vmatprep.mubr.msk.bf16.mxu0 %vm7471_vm2, %v7470_v9  ;;  %v3883_v12 = vpop.f32.mrf.mxu0 }
 0xf2c   : > { %7052 = vmatpush3.bf16.msra.mxu1 %v7330_v31  ;;  %7069 = vmatprep.subr.bf16.mxu0 %v7470_v9  ;;  %v7348_v12 = vld [vmem:[%s8971_s8 + $0x108] sm:$0xff]  }
 0xf2d   : > { %7053 = vmatprep.subr.bf16.mxu1 %v7470_v9  ;;  %v7032_v26 = vpop.f32.mrf.mxu0  ;;  %7059 = vmatprep.mubr.msk.bf16.mxu1 %vm7471_vm2, %v7470_v9 }
 0xf30   : > { %7054 = vmatpush3.bf16.msra.mxu1 %v7331_v25  ;;  %v7349_v25 = vld [vmem:[%s8971_s8 + $0x100] sm:$0xff]  }
 0xf31   : > { %7055 = vmatprep.subr.bf16.mxu1 %v7470_v9 }
 0xf32   : > { %7066 = vmatmul.mubr.msk.bf16.vlgmr.msra.gmra.mxu0 %vm3476_vm5, %v5917_v5 }
 0xf33   : > { %7077 = vmatprep.mubr.msk.bf16.mxu0 %vm7471_vm2, %v7470_v9  ;;  %7070 = vmatpush3.bf16.msra.mxu0 %v7333_v10 }
 0xf34   : > { %7056 = vmatpush3.bf16.msra.mxu1 %v7332_v24  ;;  %7071 = vmatprep.subr.bf16.mxu0 %v7470_v9 }
 0xf35   : > { %7057 = vmatprep.subr.bf16.mxu1 %v7470_v9 }
 0xf37   : > { %7072 = vmatpush3.bf16.msra.mxu0 %v7335_v21 }
 0xf38   : > { %7058 = vmatpush3.bf16.msra.mxu1 %v7334_v16  ;;  %7073 = vmatprep.subr.bf16.mxu0 %v7470_v9 }
 0xf39   : > { %7081 = vmatprep.subr.bf16.mxu1 %v7470_v9 }
 0xf3b   : > { %7074 = vmatpush3.bf16.msra.mxu0 %v7336_v22 }
 0xf3c   : > { %7075 = vmatprep.subr.bf16.mxu0 %v7470_v9 }
 0xf3f   : > { %7076 = vmatpush3.bf16.msra.mxu0 %v7337_v27 }
 0xf40   : > { %7099 = vmatprep.subr.bf16.mxu0 %v7470_v9 }
 0xfe2   : > { %v3834_v29 = vpop.f32.mrf.mxu1 }
 0xfe3   : > { %v3840_v35 = vadd.f32 %v3834_v29, %v3713_v54 }
 0xfe4   : > { %v7025_v38 = vpop.f32.mrf.mxu1 }
 0xfe6   : > { %v3837_v44 = vpop.f32.mrf.mxu1 }
 0xfe8   : > { %v7026_v48 = vpop.f32.mrf.mxu1 }
 0xfea   : > { %v3957_v49 = vpop.f32.mrf.mxu0  ;;  %v4003_v19 = vpop.f32.mrf.mxu1 }
 0xfeb   : > { %v3963_v20 = vadd.f32 %v3957_v49, %v3840_v35  ;;  %v4009_v63 = vpack.c.bf16 %v4003_v19, %v4003_v19 }
 0xfec   : > { %v7043_v47 = vpop.f32.mrf.mxu0  ;;  %v7049_v0 = vpop.f32.mrf.mxu1 }
 0xfed   : > { %7060 = vmatmul.mubr.msk.bf16.vlgmr.msra.gmra.mxu1 %vm2430_vm3, %v4009_v63  ;;  %v7358_v63 = vld [vmem:[%s8974_s11 + $0x2f4] ss:$8 sps:$4 sm:$0xff]   ;;  %v7362_v47 = vld [vmem:[%s8974_s11 + $0x2e0] ss:$8 sps:$4 sm:$0xff]   ;;  %v7364_v0 = vld [vmem:[%s8974_s11 + $0x2e4] ss:$8 sps:$4 sm:$0xff]  }
 0xfee   : > { %7082 = vmatpush3.bf16.msra.mxu1 %v8433_v41  ;;  %v3960_v2 = vpop.f32.mrf.mxu0  ;;  %v4006_v4 = vpop.f32.mrf.mxu1  ;;  %7083 = vmatprep.mubr.msk.bf16.mxu1 %vm7471_vm2, %v7470_v9 }
 0xfef   : > { %7087 = vmatprep.subr.bf16.mxu1 %v7470_v9  ;;  %v7368_v2 = vld [vmem:[%s8974_s11 + $0x2d0] ss:$8 sps:$4 sm:$0xff]   ;;  %v7370_v4 = vld [vmem:[%s8974_s11 + $0x2d4] ss:$8 sps:$4 sm:$0xff]  }
 0xff0   : > { %v7044_v7 = vpop.f32.mrf.mxu0  ;;  %v7050_v23 = vpop.f32.mrf.mxu1 }
 0xff1   : > { %v7374_v7 = vld [vmem:[%s8974_s11 + $0x2c0] ss:$8 sps:$4 sm:$0xff]   ;;  %v7376_v23 = vld [vmem:[%s8974_s11 + $0x2c4] ss:$8 sps:$4 sm:$0xff]  }
 0xff2   : > { %v4126_v14 = vpop.f32.mrf.mxu0 }
 0xff3   : > { %v4132_v42 = vpack.c.bf16 %v4126_v14, %v4126_v14  ;;  %v7380_v14 = vld [vmem:[%s8974_s11 + $0x2b0] ss:$8 sps:$4 sm:$0xff]  }
 0xff4   : > { %v7067_v53 = vpop.f32.mrf.mxu0 }
 0xff5   : > { %7078 = vmatmul.mubr.msk.bf16.vlgmr.msra.gmra.mxu0 %vm2430_vm3, %v4132_v42  ;;  %7084 = vmatmul.mubr.msk.bf16.vlgmr.msra.gmra.mxu1 %vm3476_vm5, %v5932_v18  ;;  %v7382_v18 = vld [vmem:[%s8974_s11 + $0x2b4] ss:$8 sps:$4 sm:$0xff]   ;;  %v7386_v42 = vld [vmem:[%s8974_s11 + $0x2a0] ss:$8 sps:$4 sm:$0xff]  }
 0xff6   : > { %7100 = vmatpush3.bf16.msra.mxu0 %v8433_v41  ;;  %7101 = vmatprep.mubr.msk.bf16.mxu0 %vm7471_vm2, %v7470_v9  ;;  %v4129_v55 = vpop.f32.mrf.mxu0 }
 0xff7   : > { %7088 = vmatpush3.bf16.msra.mxu1 %v7338_v52  ;;  %7105 = vmatprep.subr.bf16.mxu0 %v7470_v9  ;;  %v7388_v52 = vld [vmem:[%s8974_s11 + $0x2a4] ss:$8 sps:$4 sm:$0xff]   ;;  %v5977_v55 = vld [vmem:[%s8972_s9] ss:$0 sm:$0xff] }
 0xff8   : > { %7089 = vmatprep.subr.bf16.mxu1 %v7470_v9  ;;  %v7068_v3 = vpop.f32.mrf.mxu0  ;;  %7095 = vmatprep.mubr.msk.bf16.mxu1 %vm7471_vm2, %v7470_v9 }
 0xffb   : > { %7090 = vmatpush3.bf16.msra.mxu1 %v7339_v58 }
 0xffc   : > { %7091 = vmatprep.subr.bf16.mxu1 %v7470_v9 }
 0xffd   : > { %7102 = vmatmul.mubr.msk.bf16.vlgmr.msra.gmra.mxu0 %vm3476_vm5, %v5947_v59 }
 0xffe   : > { %7113 = vmatprep.mubr.msk.bf16.mxu0 %vm7471_vm2, %v7470_v9  ;;  %7106 = vmatpush3.bf16.msra.mxu0 %v7341_v60 }
 0xfff   : > { %7092 = vmatpush3.bf16.msra.mxu1 %v7340_v37  ;;  %7107 = vmatprep.subr.bf16.mxu0 %v7470_v9 }
0x1000   : > { %7093 = vmatprep.subr.bf16.mxu1 %v7470_v9 }
0x1002   : > { %7108 = vmatpush3.bf16.msra.mxu0 %v7343_v43 }
0x1003   : > { %7094 = vmatpush3.bf16.msra.mxu1 %v7342_v61  ;;  %7109 = vmatprep.subr.bf16.mxu0 %v7470_v9 }
0x1004   : > { %7117 = vmatprep.subr.bf16.mxu1 %v7470_v9 }
0x1006   : > { %7110 = vmatpush3.bf16.msra.mxu0 %v7344_v45 }
0x1007   : > { %7111 = vmatprep.subr.bf16.mxu0 %v7470_v9 }
0x100a   : > { %7112 = vmatpush3.bf16.msra.mxu0 %v7345_v13  ;;  %v5978_v13 = vld [vmem:[%s8973_s10 + $0x4] sm:$0x1] }
0x100b   : > { %7135 = vmatprep.subr.bf16.mxu0 %v7470_v9 }
0x10ad   : > { %v4080_v50 = vpop.f32.mrf.mxu1 }
0x10ae   : > { %v4086_v62 = vadd.f32 %v4080_v50, %v3963_v20  ;;  %v7356_v20 = vld [vmem:[%s8974_s11 + $0x2f0] ss:$8 sps:$4 sm:$0xff]   ;;  %v7352_v50 = vld [vmem:[%s8974_s11 + $0x274] ss:$8 sps:$4 sm:$0xff]  }
0x10af   : > { %v7061_v32 = vpop.f32.mrf.mxu1 }
0x10b0   : > { %v7350_v32 = vld [vmem:[%s8974_s11 + $0x270] ss:$8 sps:$4 sm:$0xff]  }
0x10b1   : > { %v4083_v28 = vpop.f32.mrf.mxu1 }
0x10b2   : > { %v7355_v28 = vld [vmem:[%s8974_s11 + $0x264] ss:$8 sps:$4 sm:$0xff]  }
0x10b3   : > { %v7062_v34 = vpop.f32.mrf.mxu1 }
0x10b4   : > { %v7353_v34 = vld [vmem:[%s8974_s11 + $0x260] ss:$8 sps:$4 sm:$0xff]  }
0x10b5   : > { %v4203_v54 = vpop.f32.mrf.mxu0  ;;  %v4249_v36 = vpop.f32.mrf.mxu1 }
0x10b6   : > { %v4209_v33 = vadd.f32 %v4203_v54, %v4086_v62  ;;  %v4255_v39 = vpack.c.bf16 %v4249_v36, %v4249_v36  ;;  %v5996_v62 = vld [vmem:[%s8973_s10 + $0x5] sm:$0x1]  ;;  %v7361_v54 = vld [vmem:[%s8974_s11 + $0x254] ss:$8 sps:$4 sm:$0xff]   ;;  %v7359_v36 = vld [vmem:[%s8974_s11 + $0x250] ss:$8 sps:$4 sm:$0xff]  }
0x10b7   : > { %v7079_v57 = vpop.f32.mrf.mxu0  ;;  %v7085_v56 = vpop.f32.mrf.mxu1 }
0x10b8   : > { %7096 = vmatmul.mubr.msk.bf16.vlgmr.msra.gmra.mxu1 %vm2430_vm3, %v4255_v39  ;;  %v7365_v39 = vld [vmem:[%s8974_s11 + $0x240] ss:$8 sps:$4 sm:$0xff]   ;;  %v7373_v57 = vld [vmem:[%s8974_s11 + $0x234] ss:$8 sps:$4 sm:$0xff]   ;;  %v7371_v56 = vld [vmem:[%s8974_s11 + $0x230] ss:$8 sps:$4 sm:$0xff]  }
0x10b9   : > { %7118 = vmatpush3.bf16.msra.mxu1 %v8433_v41  ;;  %v4206_v8 = vpop.f32.mrf.mxu0  ;;  %v4252_v11 = vpop.f32.mrf.mxu1  ;;  %7119 = vmatprep.mubr.msk.bf16.mxu1 %vm7471_vm2, %v7470_v9 }
0x10ba   : > { %7123 = vmatprep.subr.bf16.mxu1 %v7470_v9  ;;  %v7379_v8 = vld [vmem:[%s8974_s11 + $0x224] ss:$8 sps:$4 sm:$0xff]   ;;  %v7377_v11 = vld [vmem:[%s8974_s11 + $0x220] ss:$8 sps:$4 sm:$0xff]  }
0x10bb   : > { %v7080_v17 = vpop.f32.mrf.mxu0  ;;  %v7086_v15 = vpop.f32.mrf.mxu1 }
0x10bc   : > { %v7385_v17 = vld [vmem:[%s8974_s11 + $0x214] ss:$8 sps:$4 sm:$0xff]   ;;  %v7383_v15 = vld [vmem:[%s8974_s11 + $0x210] ss:$8 sps:$4 sm:$0xff]  }
0x10bd   : > { %v4372_v40 = vpop.f32.mrf.mxu0 }
0x10be   : > { %v4378_v6 = vpack.c.bf16 %v4372_v40, %v4372_v40  ;;  %v7391_v40 = vld [vmem:[%s8974_s11 + $0x204] ss:$8 sps:$4 sm:$0xff]  }
0x10bf   : > { %v7103_v41 = vpop.f32.mrf.mxu0 }
0x10c0   : > { %7114 = vmatmul.mubr.msk.bf16.vlgmr.msra.gmra.mxu0 %vm2430_vm3, %v4378_v6  ;;  %7120 = vmatmul.mubr.msk.bf16.vlgmr.msra.gmra.mxu1 %vm3476_vm5, %v5962_v46  ;;  %v7389_v46 = vld [vmem:[%s8974_s11 + $0x200] ss:$8 sps:$4 sm:$0xff]   ;;  %v7392_v6 = vld [vmem:[%s8974_s11 + $0x290] ss:$8 sps:$4 sm:$0xff]   ;;  %v7472_v41 = vmov 0  }
0x10c1   : > { %7124 = vmatpush3.bf16.msra.mxu1 %v7346_v51  ;;  %v4375_v30 = vpop.f32.mrf.mxu0  ;;  %7131 = vmatprep.mubr.msk.bf16.mxu1 %vm7471_vm2, %v7470_v9  ;;  %v7394_v51 = vld [vmem:[%s8974_s11 + $0x294] ss:$8 sps:$4 sm:$0xff]  }
0x10c2   : > { %7125 = vmatprep.subr.bf16.mxu1 %v7470_v9  ;;  %7137 = vmatprep.mubr.msk.bf16.mxu0 %vm7471_vm2, %v7470_v9  ;;  %v7397_v30 = vld [vmem:[%s8974_s11 + $0x284] ss:$8 sps:$4 sm:$0xff]  }
0x10c3   : > { %v7104_v31 = vpop.f32.mrf.mxu0 }
0x10c4   : > { %v7395_v31 = vld [vmem:[%s8974_s11 + $0x280] ss:$8 sps:$4 sm:$0xff]  }
0x10c5   : > { %7126 = vmatpush3.bf16.msra.mxu1 %v7347_v1  ;;  %v7400_v1 = vld [vmem:[%s8974_s11 + $0x3f4] ss:$8 sps:$4 sm:$0xff]  }
0x10c6   : > { %7127 = vmatprep.subr.bf16.mxu1 %v7470_v9 }
0x10c9   : > { %7128 = vmatpush3.bf16.msra.mxu1 %v7348_v12 }
0x10ca   : > { %7129 = vmatprep.subr.bf16.mxu1 %v7470_v9 }
0x10cd   : > { %7130 = vmatpush3.bf16.msra.mxu1 %v7349_v25  ;;  %v7398_v25 = vld [vmem:[%s8974_s11 + $0x3f0] ss:$8 sps:$4 sm:$0xff]  }
0x10ce   : > { %4798 = vmatprep.subr.bf16.mxu1 %v7358_v63  ;;  %v7409_v63 = vld [vmem:[%s8974_s11 + $0x474] ss:$8 sps:$4 sm:$0xff]  }
0x1178   : > { %v4326_v26 = vpop.f32.mrf.mxu1 }
0x1179   : > { %v4332_v5 = vadd.f32 %v4326_v26, %v4209_v33  ;;  %v7367_v33 = vld [vmem:[%s8974_s11 + $0x244] ss:$8 sps:$4 sm:$0xff]  }
0x117a   : > { %v7097_v24 = vpop.f32.mrf.mxu1 }
0x117c   : > { %v4329_v10 = vpop.f32.mrf.mxu1 }
0x117e   : > { %v7098_v16 = vpop.f32.mrf.mxu1 }
0x117f   : > { %v7401_v16 = vld [vmem:[%s8974_s11 + $0x3e0] ss:$8 sps:$4 sm:$0xff]  }
0x1180   : > { %v4449_v21 = vpop.f32.mrf.mxu0  ;;  %v4495_v22 = vpop.f32.mrf.mxu1 }
0x1181   : > { %v4455_v27 = vadd.f32 %v4449_v21, %v4332_v5  ;;  %v4501_v29 = vpack.c.bf16 %v4495_v22, %v4495_v22  ;;  %v7403_v5 = vld [vmem:[%s8974_s11 + $0x3e4] ss:$8 sps:$4 sm:$0xff]   ;;  %v7406_v21 = vld [vmem:[%s8974_s11 + $0x3d4] ss:$8 sps:$4 sm:$0xff]  }
0x1182   : > { %v7121_v35 = vpop.f32.mrf.mxu1  ;;  %v7115_v38 = vpop.f32.mrf.mxu0 }
0x1183   : > { %7132 = vmatmul.mubr.msk.bf16.vlgmr.msra.gmra.mxu1 %vm2430_vm3, %v4501_v29  ;;  %v7404_v35 = vld [vmem:[%s8974_s11 + $0x3d0] ss:$8 sps:$4 sm:$0xff]  }
0x1184   : > { %v4498_v44 = vpop.f32.mrf.mxu1  ;;  %v4452_v48 = vpop.f32.mrf.mxu0  ;;  %4799 = vmatpush1.bf16.msra.mxu1 %v7356_v20  ;;  %4830 = vmatprep.mubr.bf16.mxu1 %v7472_v41  ;;  %v6046_v20 = vld [vmem:[%s8973_s10 + $0x7] sm:$0x1] }
0x1185   : > { %4800 = vmatprep.subr.bf16.mxu1 %v7364_v0  ;;  %v7412_v44 = vld [vmem:[%s8974_s11 + $0x3c4] ss:$8 sps:$4 sm:$0xff]   ;;  %v7407_v0 = vld [vmem:[%s8974_s11 + $0x470] ss:$8 sps:$4 sm:$0xff]  }
0x1186   : > { %v7122_v49 = vpop.f32.mrf.mxu1  ;;  %v7116_v19 = vpop.f32.mrf.mxu0 }
0x1187   : > { %v7410_v49 = vld [vmem:[%s8974_s11 + $0x3c0] ss:$8 sps:$4 sm:$0xff]  }
0x1188   : > { %4801 = vmatpush1.bf16.msra.mxu1 %v7362_v47  ;;  %v6080_v47 = vld [vmem:[%s8973_s10 + $0x8] sm:$0x1] }
0x1189   : > { %4802 = vmatprep.subr.bf16.mxu1 %v7370_v4  ;;  %v7416_v4 = vld [vmem:[%s8974_s11 + $0x3b0] ss:$8 sps:$4 sm:$0xff]  }
0x118c   : > { %4803 = vmatpush1.bf16.msra.mxu1 %v7368_v2  ;;  %v7415_v2 = vld [vmem:[%s8974_s11 + $0x464] ss:$8 sps:$4 sm:$0xff]  }
0x118d   : > { %4804 = vmatprep.subr.bf16.mxu1 %v7376_v23  ;;  %v7419_v23 = vld [vmem:[%s8974_s11 + $0x450] ss:$8 sps:$4 sm:$0xff]  }
0x1190   : > { %4805 = vmatpush1.bf16.msra.mxu1 %v7374_v7  ;;  %v7418_v7 = vld [vmem:[%s8974_s11 + $0x3b4] ss:$8 sps:$4 sm:$0xff]  }
0x1191   : > { %4806 = vmatprep.subr.bf16.mxu1 %v7382_v18  ;;  %v7422_v18 = vld [vmem:[%s8974_s11 + $0x3a0] ss:$8 sps:$4 sm:$0xff]  }
0x1194   : > { %4807 = vmatpush1.bf16.msra.mxu1 %v7380_v14  ;;  %v7421_v14 = vld [vmem:[%s8974_s11 + $0x454] ss:$8 sps:$4 sm:$0xff]  }
0x1195   : > { %4808 = vmatprep.subr.bf16.mxu1 %v7388_v52  ;;  %v7425_v52 = vld [vmem:[%s8974_s11 + $0x440] ss:$8 sps:$4 sm:$0xff]  }
0x1198   : > { %4809 = vmatpush1.bf16.msra.mxu1 %v7386_v42  ;;  %v7424_v42 = vld [vmem:[%s8974_s11 + $0x3a4] ss:$8 sps:$4 sm:$0xff]  }
0x1199   : > { %4810 = vmatprep.subr.bf16.mxu1 %v7394_v51 }
0x119c   : > { %4811 = vmatpush1.bf16.msra.mxu1 %v7392_v6 }
0x119d   : > { %4812 = vmatprep.subr.bf16.mxu1 %v7397_v30  ;;  %v7450_v30 = vld [vmem:[%s8976_s13 + $0x68] sm:$0xff]  }
0x11a0   : > { %4813 = vmatpush1.bf16.msra.mxu1 %v7395_v31 }
0x11a1   : > { %7147 = vmatprep.subr.bf16.mxu1 %v7470_v9 }
0x1243   : > { %v4572_v53 = vpop.f32.mrf.mxu1 }
0x1244   : > { %v4578_v58 = vadd.f32 %v4572_v53, %v4455_v27  ;;  %v7427_v53 = vld [vmem:[%s8974_s11 + $0x444] ss:$8 sps:$4 sm:$0xff]  }
0x1245   : > { %v7133_v3 = vpop.f32.mrf.mxu1 }
0x1246   : > { %v4586_v59 = vadd.f32 %v5977_v55, %v4578_v58  ;;  %v7430_v55 = vld [vmem:[%s8974_s11 + $0x394] ss:$8 sps:$4 sm:$0xff]   ;;  %v7428_v3 = vld [vmem:[%s8974_s11 + $0x390] ss:$8 sps:$4 sm:$0xff]  }
0x1247   : > { %v4575_v37 = vpop.f32.mrf.mxu1  ;;  %v7433_v58 = vld [vmem:[%s8974_s11 + $0x434] ss:$8 sps:$4 sm:$0xff]  }
0x1248   : > { %v4587_v60 = vmax.f32 %v4586_v59, 0.0  ;;  %v7431_v59 = vld [vmem:[%s8974_s11 + $0x430] ss:$8 sps:$4 sm:$0xff]   ;;  %v7434_v37 = vld [vmem:[%s8974_s11 + $0x380] ss:$8 sps:$4 sm:$0xff]  }
0x1249   : > { %v7134_v61 = vpop.f32.mrf.mxu1 }
0x124a   : > { %v4588_v43 = vpack.c.bf16 %v4587_v60, %v4587_v60  ;;  %v7436_v60 = vld [vmem:[%s8974_s11 + $0x384] ss:$8 sps:$4 sm:$0xff]   ;;  %v7437_v61 = vld [vmem:[%s8974_s11 + $0x420] ss:$8 sps:$4 sm:$0xff]  }
0x124c   : > { %v8715_v45 = vsel %vm791_vm0, %v4588_v43, 0  ;;  %v7439_v43 = vld [vmem:[%s8974_s11 + $0x424] ss:$8 sps:$4 sm:$0xff]  }
0x124d   : > { %7136 = vmatpush3.bf16.msra.mxu0 %v8715_v45 }
0x124e   : > { %7141 = vmatprep.subr.bf16.mxu0 %v7470_v9 }
0x1250   : > { %7138 = vmatmul.mubr.msk.bf16.vlgmr.msra.gmra.mxu0 %vm778_vm1, %v5978_v13  ;;  %v7440_v13 = vld [vmem:[%s8974_s11 + $0x410] ss:$8 sps:$4 sm:$0xff]  }
0x1251   : > { %7142 = vmatpush3.bf16.msra.mxu0 %v8715_v45  ;;  %7143 = vmatprep.mubr.msk.bf16.mxu0 %vm7471_vm2, %v7470_v9 }
0x1252   : > { %4919 = vmatprep.subr.bf16.mxu0 %v7352_v50  ;;  %v7443_v50 = vld [vmem:[%s8974_s11 + $0x400] ss:$8 sps:$4 sm:$0xff]  }
0x1258   : > { %7144 = vmatmul.mubr.msk.bf16.vlgmr.msra.gmra.mxu0 %vm778_vm1, %v5996_v62  ;;  %v7445_v62 = vld [vmem:[%s8974_s11 + $0x404] ss:$8 sps:$4 sm:$0xff]  }
0x1259   : > { %4920 = vmatpush1.bf16.msra.mxu0 %v7350_v32  ;;  %4951 = vmatprep.mubr.bf16.mxu0 %v7472_v41  ;;  %v7446_v32 = vld [vmem:[%s8976_s13 + $0x78] sm:$0xff]  }
0x125a   : > { %4921 = vmatprep.subr.bf16.mxu0 %v7355_v28 }
0x125d   : > { %4922 = vmatpush1.bf16.msra.mxu0 %v7353_v34 }
0x125e   : > { %4923 = vmatprep.subr.bf16.mxu0 %v7361_v54 }
0x1261   : > { %4924 = vmatpush1.bf16.msra.mxu0 %v7359_v36 }
0x1262   : > { %4925 = vmatprep.subr.bf16.mxu0 %v7367_v33 }
0x1265   : > { %4926 = vmatpush1.bf16.msra.mxu0 %v7365_v39 }
0x1266   : > { %4927 = vmatprep.subr.bf16.mxu0 %v7373_v57 }
0x1269   : > { %4928 = vmatpush1.bf16.msra.mxu0 %v7371_v56 }
0x126a   : > { %4929 = vmatprep.subr.bf16.mxu0 %v7379_v8 }
0x126d   : > { %4930 = vmatpush1.bf16.msra.mxu0 %v7377_v11 }
0x126e   : > { %4931 = vmatprep.subr.bf16.mxu0 %v7385_v17 }
0x1271   : > { %4932 = vmatpush1.bf16.msra.mxu0 %v7383_v15  ;;  %v7447_v15 = vld [vmem:[%s8976_s13 + $0x38] sm:$0xff]  }
0x1272   : > { %4933 = vmatprep.subr.bf16.mxu0 %v7391_v40 }
0x1275   : > { %4934 = vmatpush1.bf16.msra.mxu0 %v7389_v46  ;;  %v7448_v46 = vld [vmem:[%s8976_s13 + $0x70] sm:$0xff]  }
0x1276   : > { %5103 = vmatprep.subr.bf16.mxu0 %v7400_v1 }
0x1310   : > { %v4631_v12 = vpop.f32.mrf.mxu0 }
0x1311   : > { %v4637_v26 = vpack.c.bf16 %v4631_v12, %v4631_v12  ;;  %v7451_v12 = vld [vmem:[%s8976_s13 + $0x28] sm:$0xff]  }
0x1312   : > { %v7139_v24 = vpop.f32.mrf.mxu0 }
0x1313   : > { %4952 = vmatmul.mubr.bf16.vlgmr.msra.gmra.mxu0 %v4637_v26 }
0x1314   : > { %v4634_v10 = vpop.f32.mrf.mxu0  ;;  %5104 = vmatpush1.bf16.msra.mxu0 %v7398_v25  ;;  %5135 = vmatprep.mubr.bf16.mxu0 %v7472_v41 }
0x1315   : > { %5105 = vmatprep.subr.bf16.mxu0 %v7403_v5  ;;  %v7452_v10 = vld [vmem:[%s8976_s13 + $0x60] sm:$0xff]  }
0x1316   : > { %v7140_v22 = vpop.f32.mrf.mxu0 }
0x1317   : > { %v7455_v22 = vld [vmem:[%s8976_s13 + $0x18] sm:$0xff]  }
0x1318   : > { %v4694_v27 = vpop.f32.mrf.mxu0  ;;  %5106 = vmatpush1.bf16.msra.mxu0 %v7401_v16  ;;  %v7453_v16 = vld [vmem:[%s8976_s13 + $0x20] sm:$0xff]  }
0x1319   : > { %v4700_v29 = vpack.c.bf16 %v4694_v27, %v4694_v27  ;;  %5107 = vmatprep.subr.bf16.mxu0 %v7406_v21  ;;  %v7454_v21 = vld [vmem:[%s8976_s13 + $0x58] sm:$0xff]   ;;  %v7456_v27 = vld [vmem:[%s8976_s13 + $0x50] sm:$0xff]  }
0x131a   : > { %v7145_v38 = vpop.f32.mrf.mxu0 }
0x131b   : > { %4831 = vmatmul.mubr.bf16.vlgmr.msra.gmra.mxu1 %v4700_v29  ;;  %v7457_v29 = vld [vmem:[%s8976_s13 + $0x10] sm:$0xff]   ;;  %v7459_v38 = vld [vmem:[%s8976_s13 + $0x8] sm:$0xff]  }
0x131c   : > { %7148 = vmatpush3.bf16.msra.mxu1 %v8715_v45  ;;  %v4697_v48 = vpop.f32.mrf.mxu0  ;;  %7149 = vmatprep.mubr.msk.bf16.mxu1 %vm7471_vm2, %v7470_v9 }
0x131d   : > { %7153 = vmatprep.subr.bf16.mxu1 %v7470_v9  ;;  %5108 = vmatpush1.bf16.msra.mxu0 %v7404_v35  ;;  %v7458_v35 = vld [vmem:[%s8976_s13 + $0x48] sm:$0xff]   ;;  %v7461_v48 = vld [vmem:[%s8976_s13] sm:$0xff]  }
0x131e   : > { %v7146_v19 = vpop.f32.mrf.mxu0  ;;  %5109 = vmatprep.subr.bf16.mxu0 %v7412_v44  ;;  %v7460_v44 = vld [vmem:[%s8976_s13 + $0x40] sm:$0xff]  }
0x1321   : > { %5110 = vmatpush1.bf16.msra.mxu0 %v7410_v49  ;;  %v5334_v49 = vlaneseq }
0x1322   : > { %5111 = vmatprep.subr.bf16.mxu0 %v7418_v7 }
0x1323   : > { %7150 = vmatmul.mubr.msk.bf16.vlgmr.msra.gmra.mxu1 %vm778_vm1, %v6046_v20  ;;  %v5335_v19 = vshrl.u32 %v5334_v49, 7 }
0x1324   : > { %7154 = vmatpush3.bf16.msra.mxu1 %v8715_v45  ;;  %7155 = vmatprep.mubr.msk.bf16.mxu1 %vm7471_vm2, %v7470_v9  ;;  %v7413_v9 = vld [vmem:[%s8974_s11 + $0x460] ss:$8 sps:$4 sm:$0xff]   ;;  %v7442_v45 = vld [vmem:[%s8974_s11 + $0x414] ss:$8 sps:$4 sm:$0xff]  }
0x1325   : > { %5289 = vmatprep.subr.bf16.mxu1 %v7409_v63  ;;  %5112 = vmatpush1.bf16.msra.mxu0 %v7416_v4 }
0x1326   : > { %5113 = vmatprep.subr.bf16.mxu0 %v7424_v42 }
0x1329   : > { %5114 = vmatpush1.bf16.msra.mxu0 %v7422_v18 }
0x132a   : > { %5115 = vmatprep.subr.bf16.mxu0 %v7430_v55 }
0x132b   : > { %7156 = vmatmul.mubr.msk.bf16.vlgmr.msra.gmra.mxu1 %vm778_vm1, %v6080_v47  ;;  %v5336_v47 = vsub.s32 0, %v5335_v19 }
0x132c   : > { %5290 = vmatpush1.bf16.msra.mxu1 %v7407_v0  ;;  %5321 = vmatprep.mubr.bf16.mxu1 %v7472_v41  ;;  %v7449_v41 = vld [vmem:[%s8976_s13 + $0x30] sm:$0xff]  }
0x132d   : > { %5291 = vmatprep.subr.bf16.mxu1 %v7415_v2  ;;  %5116 = vmatpush1.bf16.msra.mxu0 %v7428_v3  ;;  %v5332_v2 = vld [vmem:[%s8975_s12] sm:$0x3] }
0x132e   : > { %5117 = vmatprep.subr.bf16.mxu0 %v7436_v60 }
0x1330   : > { %5292 = vmatpush1.bf16.msra.mxu1 %v7413_v9  ;;  %v5340_v9 = vsub.s32 1, %v5335_v19 }
0x1331   : > { %5293 = vmatprep.subr.bf16.mxu1 %v7421_v14  ;;  %5118 = vmatpush1.bf16.msra.mxu0 %v7434_v37 }
0x1332   : > { %6681 = vmatprep.subr.bf16.mxu0 %v7446_v32 }
0x1334   : > { %5294 = vmatpush1.bf16.msra.mxu1 %v7419_v23  ;;  %v5337_v23 = vrot.slane %v5332_v2, %v5336_v47 }
0x1335   : > { %5295 = vmatprep.subr.bf16.mxu1 %v7427_v53 }
0x1338   : > { %5296 = vmatpush1.bf16.msra.mxu1 %v7425_v52  ;;  %v5341_v52 = vrot.slane %v5332_v2, %v5340_v9 }
0x1339   : > { %5297 = vmatprep.subr.bf16.mxu1 %v7433_v58 }
0x133c   : > { %5298 = vmatpush1.bf16.msra.mxu1 %v7431_v59 }
0x133d   : > { %5299 = vmatprep.subr.bf16.mxu1 %v7439_v43 }
0x1340   : > { %5300 = vmatpush1.bf16.msra.mxu1 %v7437_v61 }
0x1341   : > { %5301 = vmatprep.subr.bf16.mxu1 %v7442_v45 }
0x1344   : > { %5302 = vmatpush1.bf16.msra.mxu1 %v7440_v13 }
0x1345   : > { %5303 = vmatprep.subr.bf16.mxu1 %v7445_v62 }
0x1348   : > { %5304 = vmatpush1.bf16.msra.mxu1 %v7443_v50  ;;  %v5350_v50 = vld [vmem:[%s8977_s14] sm:$0x1] }
0x13d3   : > { %v4953_v28 = vpop.f32.mrf.mxu0 }
0x13d5   : > { %v4955_v34 = vpop.f32.mrf.mxu0 }
0x13d7   : > { %v4957_v54 = vpop.f32.mrf.mxu0 }
0x13d9   : > { %v4958_v36 = vpop.f32.mrf.mxu0 }
0x13db   : > { %v4832_v33 = vpop.f32.mrf.mxu1 }
0x13dc   : > { %v4954_v39 = vadd.f32 %v4953_v28, %v4832_v33 }
0x13dd   : > { %v4834_v57 = vpop.f32.mrf.mxu1 }
0x13de   : > { %v4956_v56 = vadd.f32 %v4955_v34, %v4834_v57 }
0x13df   : > { %v4836_v8 = vpop.f32.mrf.mxu1 }
0x13e1   : > { %v4837_v11 = vpop.f32.mrf.mxu1 }
0x13e3   : > { %v4999_v17 = vpop.f32.mrf.mxu1 }
0x13e4   : > { %v5005_v40 = vpack.c.bf16 %v4999_v17, %v4999_v17 }
0x13e5   : > { %v7151_v51 = vpop.f32.mrf.mxu1 }
0x13e6   : > { %5136 = vmatmul.mubr.bf16.vlgmr.msra.gmra.mxu0 %v5005_v40 }
0x13e7   : > { %v5002_v6 = vpop.f32.mrf.mxu1  ;;  %6682 = vmatpush3.bf16.msra.mxu0 %v7447_v15 }
0x13e8   : > { %6683 = vmatprep.subr.bf16.mxu0 %v7448_v46 }
0x13e9   : > { %v7152_v31 = vpop.f32.mrf.mxu1 }
0x13eb   : > { %v5185_v1 = vpop.f32.mrf.mxu1  ;;  %6684 = vmatpush3.bf16.msra.mxu0 %v7449_v41 }
0x13ec   : > { %v5191_v25 = vpack.c.bf16 %v5185_v1, %v5185_v1  ;;  %6685 = vmatprep.subr.bf16.mxu0 %v7450_v30 }
0x13ed   : > { %v7157_v26 = vpop.f32.mrf.mxu1 }
0x13ee   : > { %5322 = vmatmul.mubr.bf16.vlgmr.msra.gmra.mxu1 %v5191_v25 }
0x13ef   : > { %v5188_v5 = vpop.f32.mrf.mxu1  ;;  %6686 = vmatpush3.bf16.msra.mxu0 %v7451_v12 }
0x13f0   : > { %6687 = vmatprep.subr.bf16.mxu0 %v7452_v10 }
0x13f1   : > { %v7158_v24 = vpop.f32.mrf.mxu1 }
0x13f3   : > { %6688 = vmatpush3.bf16.msra.mxu0 %v7453_v16 }
0x13f4   : > { %6689 = vmatprep.subr.bf16.mxu0 %v7454_v21 }
0x13f7   : > { %6690 = vmatpush3.bf16.msra.mxu0 %v7455_v22 }
0x13f8   : > { %6691 = vmatprep.subr.bf16.mxu0 %v7456_v27 }
0x13fb   : > { %6692 = vmatpush3.bf16.msra.mxu0 %v7457_v29 }
0x13fc   : > { %6693 = vmatprep.subr.bf16.mxu0 %v7458_v35 }
0x13ff   : > { %6694 = vmatpush3.bf16.msra.mxu0 %v7459_v38 }
0x1400   : > { %6695 = vmatprep.subr.bf16.mxu0 %v7460_v44 }
0x1403   : > { %6696 = vmatpush3.bf16.msra.mxu0 %v7461_v48 }
0x14a6   : > { %v5137_v20 = vpop.f32.mrf.mxu0 }
0x14a7   : > { %v5144_v7 = vadd.f32 %v5137_v20, %v4954_v39 }
0x14a8   : > { %v5139_v63 = vpop.f32.mrf.mxu0 }
0x14a9   : > { %v5145_v18 = vadd.f32 %v5139_v63, %v4956_v56 }
0x14aa   : > { %v5141_v0 = vpop.f32.mrf.mxu0 }
0x14ac   : > { %v5142_v4 = vpop.f32.mrf.mxu0 }
0x14ae   : > { %v5323_v14 = vpop.f32.mrf.mxu1 }
0x14af   : > { %v5330_v42 = vadd.f32 %v5323_v14, %v5144_v7 }
0x14b0   : > { %v5325_v53 = vpop.f32.mrf.mxu1 }
0x14b1   : > { %v5344_v55 = vadd.f32 %v5337_v23, %v5330_v42  ;;  %v5331_v58 = vadd.f32 %v5325_v53, %v5145_v18 }
0x14b2   : > { %v5327_v3 = vpop.f32.mrf.mxu1 }
0x14b3   : > { %v5345_v59 = vadd.f32 %v5341_v52, %v5331_v58  ;;  %v5346_v37 = vmax.f32 %v5344_v55, 0.0 }
0x14b4   : > { %v5328_v60 = vpop.f32.mrf.mxu1 }
0x14b5   : > { %v5347_v61 = vmax.f32 %v5345_v59, 0.0  ;;  %v5348_v45 = vpack.c.bf16 %v5346_v37, %v5346_v37 }
0x14b7   : > { %v5349_v43 = vpack.c.bf16 %v5347_v61, %v5347_v61 }
0x14b9   : > { %5511 = vmatprep.mubr.bf16.mxu0 %v5349_v43 }
0x14ba   : > { %5512 = vmatmul.mubr.bf16.vlgmr.msra.gmra.mxu0 %v5348_v45 }
0x157a   : > { %v6697_v13 = vpop.f32.mrf.mxu0 }
0x157c   : > { %v6698_v62 = vpop.f32.mrf.mxu0 }
0x157d   : > { %v6699_v32 = vadd.f32 %v6698_v62, %v6697_v13 }
0x157e   : > { %v6700_v28 = vpop.f32.mrf.mxu0 }
0x157f   : > { %v5519_v34 = vadd.f32 %v6699_v32, %v5350_v50 }
0x1580   : > { %v6701_v54 = vpop.f32.mrf.mxu0 }
0x1581   : > { %5521 = vst.msk [vmem:[%s490_s29] sm:$0x1] %vm5520_vm6, %v5519_v34 }
0x1582 PF: > { %s25_s18 = sadd.s32 1, %s7468_s18  }
0x1583   : > { %p22_p4 = scmp.ge.s32.totalorder %s25_s18, 4  }
0x1585   :  { %24 = sbr.rel (!%p22_p4) target bundleno = 1 (0x1), region = 166 }

</bundles_post_ra>
